<compile_context>
chip_gen: v5e
topology: v5e:2x2
jax: 0.10.0
libtpu: 0.0.40
codegen_flags: <defaults>
</compile_context>

<pallas_src>
import functools

import jax
import jax.numpy as jnp
from jax import lax
from jax.experimental import pallas as pl
from jax.experimental.pallas import tpu as pltpu

# ----------------------------- configuration --------------------------------
DIM = 16                  # input channels
KEY_DIM = 8
NUM_HEADS = 2
ATTN_RATIO = 2
NH_KD = KEY_DIM * NUM_HEADS            # 16
D_HEAD = int(ATTN_RATIO * KEY_DIM)     # 16
DH = D_HEAD * NUM_HEADS                # 32
C_QKV = 2 * NH_KD + DH                 # 64
C_DW = 2 * DH                          # 64  (dwconv output channels)
SCALE = KEY_DIM ** -0.5
POS_LEN = 16                           # SqueezeAxialPositionalEmbedding shape

B, H, W = 2, 16, 16

NT_DIMS = (((1,), (1,)), ((), ()))     # A @ B.T (contract last dim of both)


# ------------------------------ fused kernel ---------------------------------
def sea_attention_kernel(
        x_ref,                                   # (1, C, HW)  channels-first image
        w_qkv_ref, b_qkv_ref,                    # (C_QKV, C), (C_QKV, 1)
        w_q_ref, b_q_ref,                        # (C, NH_KD), (1, NH_KD)
        w_dw_ref, b_dw_ref,                      # (9*C_DW, C_QKV), (C_DW, 1)
        w_pw_ref, b_pw_ref,                      # (C, C_DW), (C, 1)
        w_row_ref, b_row_ref,                    # (DH, DH), (DH, 1)
        w_col_ref, b_col_ref,                    # (DH, DH), (DH, 1)
        w_proj_ref, b_proj_ref,                  # (C, DH), (C, 1)
        pos_rq_ref, pos_rk_ref,                  # (H, NH_KD), (NH_KD, H)
        pos_cq_ref, pos_ck_ref,                  # (W, NH_KD), (NH_KD, W)
        e_row_ref, e_col_ref,                    # (H, HW), (W, HW)  one-hot broadcast
        m_rowT_ref, m_colT_ref,                  # (HW, H), (HW, W)  mean matrices
        conv_mask_ref,                           # (9, 1, HW)        3x3 halo masks
        o_ref,                                   # (1, C, HW)
        *, nh, kd, d, scale, hs, ws, cdw):
    f32 = jnp.float32
    nh_kd = nh * kd
    x = x_ref[0]                                 # (C, HW)
    hw = x.shape[1]

    # ---- fused 1x1 q/k/v projection (== torch.cat([q, k, v], dim=1)) ----
    qkvc = jnp.dot(w_qkv_ref[...], x, preferred_element_type=f32) + b_qkv_ref[...]
    v = qkvc[2 * nh_kd:]                         # (dh, HW) full-resolution value

    # ---- detail branch: single stacked MXU matmul for all 9 conv taps, then
    #      per-tap XLU lane-roll + halo mask + add (ReLU, 1x1 pwconv fused). ----
    big = jnp.dot(w_dw_ref[...], qkvc, preferred_element_type=f32)  # (9*cdw, HW)
    acc = big[4 * cdw:5 * cdw]                   # center tap: no roll, mask is all-ones
    for t in range(9):
        if t == 4:
            continue
        dy, dx = t // 3 - 1, t % 3 - 1
        off = dy * ws + dx                                   # flat-index offset of tap
        part = pltpu.roll(big[t * cdw:(t + 1) * cdw], (-off) % hw, 1)
        acc = acc + part * conv_mask_ref[t]                  # zero out-of-image taps
    dwout = jnp.maximum(acc + b_dw_ref[...], 0.0)
    qkv_det = jnp.dot(w_pw_ref[...], dwout, preferred_element_type=f32) + b_pw_ref[...]

    # ---- axial squeezes (row: mean over W, col: mean over H) ----
    # k/v means stay channels-first; q means are built spatial-major directly from x
    # (mean and 1x1 projection commute), so all attention matmuls are plain NN / NT.
    means_row = jnp.dot(qkvc, m_rowT_ref[...], preferred_element_type=f32)   # (C_QKV, H)
    means_col = jnp.dot(qkvc, m_colT_ref[...], preferred_element_type=f32)   # (C_QKV, W)
    kr = means_row[nh_kd:2 * nh_kd] + pos_rk_ref[...]        # (nh_kd, H)
    vr = means_row[2 * nh_kd:]                               # (dh, H)
    kc = means_col[nh_kd:2 * nh_kd] + pos_ck_ref[...]        # (nh_kd, W)
    vc = means_col[2 * nh_kd:]                               # (dh, W)

    x_rm = lax.dot_general(e_row_ref[...], x, NT_DIMS,
                           preferred_element_type=f32) * (1.0 / ws)          # (H, C)
    x_cm = lax.dot_general(e_col_ref[...], x, NT_DIMS,
                           preferred_element_type=f32) * (1.0 / hs)          # (W, C)
    qr = (jnp.dot(x_rm, w_q_ref[...], preferred_element_type=f32)
          + b_q_ref[...] + pos_rq_ref[...])                                  # (H, nh_kd)
    qc = (jnp.dot(x_cm, w_q_ref[...], preferred_element_type=f32)
          + b_q_ref[...] + pos_cq_ref[...])                                  # (W, nh_kd)

    def axial(q_sm, k_cf, v_cf):
        # q_sm: (L, nh*kd) spatial-major; k_cf: (nh*kd, L), v_cf: (nh*d, L) channels-first
        outs = []
        for h in range(nh):
            q_h = q_sm[:, h * kd:(h + 1) * kd]               # (L, kd)
            k_h = k_cf[h * kd:(h + 1) * kd]                  # (kd, L)
            v_h = v_cf[h * d:(h + 1) * d]                    # (d, L)
            s = jnp.dot(q_h, k_h, preferred_element_type=f32) * scale        # (L, L)
            s = s - jnp.max(s, axis=-1, keepdims=True)
            e = jnp.exp(s)
            # exact reciprocal: approx=True is available but not needed (overhead-bound)
            attn = e * pl.reciprocal(jnp.sum(e, axis=-1, keepdims=True), approx=False)
            outs.append(lax.dot_general(v_h, attn, NT_DIMS,
                                        preferred_element_type=f32))         # (d, L)
        return jnp.concatenate(outs, axis=0)                 # (nh*d, L) channels-first

    xx_row = axial(qr, kr, vr)                               # (dh, H)
    xx_col = axial(qc, kc, vc)                               # (dh, W)

    row_p = (jnp.dot(w_row_ref[...], jnp.maximum(xx_row, 0.0),
                     preferred_element_type=f32) + b_row_ref[...])           # (dh, H)
    col_p = (jnp.dot(w_col_ref[...], jnp.maximum(xx_col, 0.0),
                     preferred_element_type=f32) + b_col_ref[...])           # (dh, W)

    # broadcast the axial results back over the full map with one-hot matmuls (MXU)
    row_bc = jnp.dot(row_p, e_row_ref[...], preferred_element_type=f32)      # (dh, HW)
    col_bc = jnp.dot(col_p, e_col_ref[...], preferred_element_type=f32)      # (dh, HW)

    # ---- final fusion: ReLU -> 1x1 proj -> sigmoid gate (lane-dense store) ----
    xx = jnp.maximum(v + row_bc + col_bc, 0.0)
    y = jnp.dot(w_proj_ref[...], xx, preferred_element_type=f32) + b_proj_ref[...]
    o_ref[0] = jax.nn.sigmoid(y) * qkv_det + y


# ------------------------------- JAX wrapper ----------------------------------
def interp_pos(pos, n):
    """F.interpolate(mode='linear', align_corners=False): pos (C, S) -> (C, n)."""
    S = pos.shape[-1]
    src = (jnp.arange(n, dtype=jnp.float32) + 0.5) * (S / n) - 0.5
    src = jnp.clip(src, 0.0, S - 1.0)
    lo = jnp.floor(src).astype(jnp.int32)
    hi = jnp.minimum(lo + 1, S - 1)
    wgt = src - lo.astype(jnp.float32)
    return pos[:, lo] * (1.0 - wgt) + pos[:, hi] * wgt


def sea_attention_pallas(x_nchw, p):
    Bn, C, Hn, Wn = x_nchw.shape
    HW = Hn * Wn

    x_cf = x_nchw.reshape(Bn, C, HW).astype(jnp.float32)     # NCHW -> (B, C, H*W), free

    # ---- trace-time constants: mean / broadcast matrices and 3x3 halo masks ----
    ii = jnp.arange(HW, dtype=jnp.int32)
    hh, ww = ii // Wn, ii % Wn
    e_row = (hh[None, :] == jnp.arange(Hn, dtype=jnp.int32)[:, None]).astype(jnp.float32)
    e_col = (ww[None, :] == jnp.arange(Wn, dtype=jnp.int32)[:, None]).astype(jnp.float32)
    m_rowT = e_row.T / float(Wn)                             # (HW, H): mean over W
    m_colT = e_col.T / float(Hn)                             # (HW, W): mean over H
    masks = []
    for t in range(9):
        dy, dx = t // 3 - 1, t % 3 - 1
        valid = ((hh + dy >= 0) & (hh + dy < Hn) & (ww + dx >= 0) & (ww + dx < Wn))
        masks.append(valid.astype(jnp.float32))
    conv_mask = jnp.stack(masks, axis=0).reshape(9, 1, HW)

    # ---- channels-first weights (Cout, Cin), column biases, pos embeds ----
    w_qkv_t = p['w_qkv'].T
    w_q = p['w_qkv'][:, :NH_KD]                              # q slice, (C, nh_kd)
    b_q = p['b_qkv'][:NH_KD][None, :]
    # stack 9 taps on the output-row axis: (9, C_QKV, C_DW) -> (9*C_DW, C_QKV)
    w_dw_stk = jnp.transpose(p['w_dw'], (0, 2, 1)).reshape(9 * C_DW, C_QKV)
    w_pw_t = p['w_pw'].T
    w_row_t = p['w_row'].T
    w_col_t = p['w_col'].T
    w_proj_t = p['w_proj'].T
    col = lambda b: b[:, None]

    pos_rq = interp_pos(p['pos_rowq'], Hn).T                 # (H, nh_kd) spatial-major
    pos_rk = interp_pos(p['pos_rowk'], Hn)                   # (nh_kd, H)
    pos_cq = interp_pos(p['pos_colq'], Wn).T                 # (W, nh_kd)
    pos_ck = interp_pos(p['pos_colk'], Wn)                   # (nh_kd, W)

    def full(*shape):
        n = len(shape)
        return pl.BlockSpec(shape, lambda b: (0,) * n)

    kernel = functools.partial(
        sea_attention_kernel,
        nh=NUM_HEADS, kd=KEY_DIM, d=D_HEAD, scale=SCALE, hs=Hn, ws=Wn, cdw=C_DW)

    out = pl.pallas_call(
        kernel,
        out_shape=jax.ShapeDtypeStruct((Bn, C, HW), jnp.float32),
        grid=(Bn,),
        in_specs=[
            pl.BlockSpec((1, C, HW), lambda b: (b, 0, 0)),   # x (per image)
            full(C_QKV, C), full(C_QKV, 1),                  # w_qkv_t, b_qkv
            full(C, NH_KD), full(1, NH_KD),                  # w_q, b_q
            full(9 * C_DW, C_QKV), full(C_DW, 1),            # w_dw_stk, b_dw
            full(C, C_DW), full(C, 1),                       # w_pw_t, b_pw
            full(DH, DH), full(DH, 1),                       # w_row_t, b_row
            full(DH, DH), full(DH, 1),                       # w_col_t, b_col
            full(C, DH), full(C, 1),                         # w_proj_t, b_proj
            full(Hn, NH_KD), full(NH_KD, Hn),                # pos_rq, pos_rk
            full(Wn, NH_KD), full(NH_KD, Wn),                # pos_cq, pos_ck
            full(Hn, HW), full(Wn, HW),                      # e_row, e_col
            full(HW, Hn), full(HW, Wn),                      # m_rowT, m_colT
            full(9, 1, HW),                                  # conv halo masks
        ],
        out_specs=pl.BlockSpec((1, C, HW), lambda b: (b, 0, 0)),
        compiler_params=pltpu.CompilerParams(
            dimension_semantics=("parallel",)),              # one image per core on v7x
    )(x_cf,
      w_qkv_t, col(p['b_qkv']),
      w_q, b_q,
      w_dw_stk, col(p['b_dw']),
      w_pw_t, col(p['b_pw']),
      w_row_t, col(p['b_row']),
      w_col_t, col(p['b_col']),
      w_proj_t, col(p['b_proj']),
      pos_rq, pos_rk, pos_cq, pos_ck,
      e_row, e_col, m_rowT, m_colT, conv_mask)

    return out.reshape(Bn, C, Hn, Wn)                        # back to NCHW (free reshape)


# --------------------------- pure-JAX reference -------------------------------
def sea_attention_ref(x, p):
    """Literal NCHW re-implementation of the PyTorch forward (for validation)."""
    Bn, C, Hn, Wn = x.shape
    nh, kd, d, dh, nh_kd = NUM_HEADS, KEY_DIM, D_HEAD, DH, NH_KD

    def c1x1(inp, w, b):   # w: (Cin, Cout)
        return jnp.einsum('bchw,co->bohw', inp, w) + b[None, :, None, None]

    qkvc = c1x1(x, p['w_qkv'], p['b_qkv'])
    q, k, v = qkvc[:, :nh_kd], qkvc[:, nh_kd:2 * nh_kd], qkvc[:, 2 * nh_kd:]

    w_hwio = p['w_dw'].reshape(3, 3, C_QKV, 2 * dh)
    qkv = lax.conv_general_dilated(qkvc, w_hwio, (1, 1), ((1, 1), (1, 1)),
                                   dimension_numbers=('NCHW', 'HWIO', 'NCHW'))
    qkv = jnp.maximum(qkv + p['b_dw'][None, :, None, None], 0.0)
    qkv = c1x1(qkv, p['w_pw'], p['b_pw'])

    def add_pos(xm, pos):
        return xm + interp_pos(pos, xm.shape[-1])[None]

    qrow = add_pos(q.mean(-1), p['pos_rowq']).reshape(Bn, nh, kd, Hn).transpose(0, 1, 3, 2)
    krow = add_pos(k.mean(-1), p['pos_rowk']).reshape(Bn, nh, kd, Hn)
    vrow = v.mean(-1).reshape(Bn, nh, d, Hn).transpose(0, 1, 3, 2)
    attn_row = jax.nn.softmax(jnp.einsum('bnhk,bnkg->bnhg', qrow, krow) * SCALE, axis=-1)
    xx_row = jnp.einsum('bnhg,bngd->bnhd', attn_row, vrow)
    xx_row = xx_row.transpose(0, 1, 3, 2).reshape(Bn, dh, Hn, 1)
    xx_row = c1x1(jnp.maximum(xx_row, 0.0), p['w_row'], p['b_row'])

    qcol = add_pos(q.mean(-2), p['pos_colq']).reshape(Bn, nh, kd, Wn).transpose(0, 1, 3, 2)
    kcol = add_pos(k.mean(-2), p['pos_colk']).reshape(Bn, nh, kd, Wn)
    vcol = v.mean(-2).reshape(Bn, nh, d, Wn).transpose(0, 1, 3, 2)
    attn_col = jax.nn.softmax(jnp.einsum('bnwk,bnkg->bnwg', qcol, kcol) * SCALE, axis=-1)
    xx_col = jnp.einsum('bnwg,bngd->bnwd', attn_col, vcol)
    xx_col = xx_col.transpose(0, 1, 3, 2).reshape(Bn, dh, 1, Wn)
    xx_col = c1x1(jnp.maximum(xx_col, 0.0), p['w_col'], p['b_col'])

    xx = v + xx_row + xx_col
    xx = c1x1(jnp.maximum(xx, 0.0), p['w_proj'], p['b_proj'])
    return jax.nn.sigmoid(xx) * qkv + xx


# ------------------------------- params init ---------------------------------
def init_params(key):
    ks = jax.random.split(key, 16)

    def wn(k, shape, fan_in):
        return jax.random.normal(k, shape, jnp.float32) / jnp.sqrt(float(fan_in))

    return {
        'w_qkv': wn(ks[0], (DIM, C_QKV), DIM),
        'b_qkv': 0.05 * jax.random.normal(ks[1], (C_QKV,), jnp.float32),
        'w_dw':  wn(ks[2], (9, C_QKV, 2 * DH), 9 * C_QKV),
        'b_dw':  0.05 * jax.random.normal(ks[3], (2 * DH,), jnp.float32),
        'w_pw':  wn(ks[4], (2 * DH, DIM), 2 * DH),
        'b_pw':  0.05 * jax.random.normal(ks[5], (DIM,), jnp.float32),
        'w_row': wn(ks[6], (DH, DH), DH),
        'b_row': 0.05 * jax.random.normal(ks[7], (DH,), jnp.float32),
        'w_col': wn(ks[8], (DH, DH), DH),
        'b_col': 0.05 * jax.random.normal(ks[9], (DH,), jnp.float32),
        'w_proj': wn(ks[10], (DH, DIM), DH),
        'b_proj': 0.05 * jax.random.normal(ks[11], (DIM,), jnp.float32),
        # pos embeds are zeros in torch __init__; small randoms exercise the path
        'pos_rowq': 0.02 * jax.random.normal(ks[12], (NH_KD, POS_LEN), jnp.float32),
        'pos_rowk': 0.02 * jax.random.normal(ks[13], (NH_KD, POS_LEN), jnp.float32),
        'pos_colq': 0.02 * jax.random.normal(ks[14], (NH_KD, POS_LEN), jnp.float32),
        'pos_colk': 0.02 * jax.random.normal(ks[15], (NH_KD, POS_LEN), jnp.float32),
    }


# ---------------------------------- main --------------------------------------
if __name__ == "__main__":
    root = jax.random.PRNGKey(0)
    kx, kp = jax.random.split(root)
    x = jax.random.normal(kx, (B, DIM, H, W), jnp.float32)      # NCHW input
    params = init_params(kp)

    fwd = jax.jit(sea_attention_pallas)
    out = fwd(x, params)
    out = jax.block_until_ready(out)

    ref = sea_attention_ref(x, params)
    err = float(jnp.max(jnp.abs(out - ref)))
    assert out.shape == (B, DIM, H, W), out.shape
    assert err < 1e-2, f"max abs diff vs reference = {err}"

    print("KERNEL_OK")
</pallas_src>

<mosaic_0001>
module attributes {stable_mosaic.version = 11 : i64} {
  func.func @sea_attention_kernel(%arg0: i32, %arg1: memref<1x16x256xf32, #tpu.memory_space<vmem>>, %arg2: memref<64x16xf32, #tpu.memory_space<vmem>>, %arg3: memref<64x1xf32, #tpu.memory_space<vmem>>, %arg4: memref<16x16xf32, #tpu.memory_space<vmem>>, %arg5: memref<1x16xf32, #tpu.memory_space<vmem>>, %arg6: memref<576x64xf32, #tpu.memory_space<vmem>>, %arg7: memref<64x1xf32, #tpu.memory_space<vmem>>, %arg8: memref<16x64xf32, #tpu.memory_space<vmem>>, %arg9: memref<16x1xf32, #tpu.memory_space<vmem>>, %arg10: memref<32x32xf32, #tpu.memory_space<vmem>>, %arg11: memref<32x1xf32, #tpu.memory_space<vmem>>, %arg12: memref<32x32xf32, #tpu.memory_space<vmem>>, %arg13: memref<32x1xf32, #tpu.memory_space<vmem>>, %arg14: memref<16x32xf32, #tpu.memory_space<vmem>>, %arg15: memref<16x1xf32, #tpu.memory_space<vmem>>, %arg16: memref<16x16xf32, #tpu.memory_space<vmem>>, %arg17: memref<16x16xf32, #tpu.memory_space<vmem>>, %arg18: memref<16x16xf32, #tpu.memory_space<vmem>>, %arg19: memref<16x16xf32, #tpu.memory_space<vmem>>, %arg20: memref<16x256xf32, #tpu.memory_space<vmem>>, %arg21: memref<16x256xf32, #tpu.memory_space<vmem>>, %arg22: memref<256x16xf32, #tpu.memory_space<vmem>>, %arg23: memref<256x16xf32, #tpu.memory_space<vmem>>, %arg24: memref<9x1x256xf32, #tpu.memory_space<vmem>>, %arg25: memref<1x16x256xf32, #tpu.memory_space<vmem>>) attributes {dimension_semantics = [#tpu.dimension_semantics<parallel>], iteration_bounds = array<i64: 2>, scalar_prefetch = 0 : i64, scratch_operands = 0 : i64, tpu.core_type = #tpu.core_type<tc>, window_params = [{transform_indices = @transform_0, window_bounds = array<i64: 1, 16, 256>}, {pipeline_mode = #tpu.pipeline_mode<synchronous>, transform_indices = @transform_1, window_bounds = array<i64: 64, 16>}, {pipeline_mode = #tpu.pipeline_mode<synchronous>, transform_indices = @transform_2, window_bounds = array<i64: 64, 1>}, {pipeline_mode = #tpu.pipeline_mode<synchronous>, transform_indices = @transform_3, window_bounds = array<i64: 16, 16>}, {pipeline_mode = #tpu.pipeline_mode<synchronous>, transform_indices = @transform_4, window_bounds = array<i64: 1, 16>}, {pipeline_mode = #tpu.pipeline_mode<synchronous>, transform_indices = @transform_5, window_bounds = array<i64: 576, 64>}, {pipeline_mode = #tpu.pipeline_mode<synchronous>, transform_indices = @transform_6, window_bounds = array<i64: 64, 1>}, {pipeline_mode = #tpu.pipeline_mode<synchronous>, transform_indices = @transform_7, window_bounds = array<i64: 16, 64>}, {pipeline_mode = #tpu.pipeline_mode<synchronous>, transform_indices = @transform_8, window_bounds = array<i64: 16, 1>}, {pipeline_mode = #tpu.pipeline_mode<synchronous>, transform_indices = @transform_9, window_bounds = array<i64: 32, 32>}, {pipeline_mode = #tpu.pipeline_mode<synchronous>, transform_indices = @transform_10, window_bounds = array<i64: 32, 1>}, {pipeline_mode = #tpu.pipeline_mode<synchronous>, transform_indices = @transform_11, window_bounds = array<i64: 32, 32>}, {pipeline_mode = #tpu.pipeline_mode<synchronous>, transform_indices = @transform_12, window_bounds = array<i64: 32, 1>}, {pipeline_mode = #tpu.pipeline_mode<synchronous>, transform_indices = @transform_13, window_bounds = array<i64: 16, 32>}, {pipeline_mode = #tpu.pipeline_mode<synchronous>, transform_indices = @transform_14, window_bounds = array<i64: 16, 1>}, {pipeline_mode = #tpu.pipeline_mode<synchronous>, transform_indices = @transform_15, window_bounds = array<i64: 16, 16>}, {pipeline_mode = #tpu.pipeline_mode<synchronous>, transform_indices = @transform_16, window_bounds = array<i64: 16, 16>}, {pipeline_mode = #tpu.pipeline_mode<synchronous>, transform_indices = @transform_17, window_bounds = array<i64: 16, 16>}, {pipeline_mode = #tpu.pipeline_mode<synchronous>, transform_indices = @transform_18, window_bounds = array<i64: 16, 16>}, {pipeline_mode = #tpu.pipeline_mode<synchronous>, transform_indices = @transform_19, window_bounds = array<i64: 16, 256>}, {pipeline_mode = #tpu.pipeline_mode<synchronous>, transform_indices = @transform_20, window_bounds = array<i64: 16, 256>}, {pipeline_mode = #tpu.pipeline_mode<synchronous>, transform_indices = @transform_21, window_bounds = array<i64: 256, 16>}, {pipeline_mode = #tpu.pipeline_mode<synchronous>, transform_indices = @transform_22, window_bounds = array<i64: 256, 16>}, {pipeline_mode = #tpu.pipeline_mode<synchronous>, transform_indices = @transform_23, window_bounds = array<i64: 9, 1, 256>}, {transform_indices = @transform_24, window_bounds = array<i64: 1, 16, 256>}]} {
    %c0 = arith.constant 0 : index
    %c0_0 = arith.constant 0 : index
    %c0_1 = arith.constant 0 : index
    %0 = vector.load %arg1[%c0, %c0_0, %c0_1] : memref<1x16x256xf32, #tpu.memory_space<vmem>>, vector<1x16x256xf32>
    %1 = vector.shape_cast %0 : vector<1x16x256xf32> to vector<16x256xf32>
    %c0_2 = arith.constant 0 : index
    %c0_3 = arith.constant 0 : index
    %2 = vector.load %arg2[%c0_2, %c0_3] : memref<64x16xf32, #tpu.memory_space<vmem>>, vector<64x16xf32>
    %cst = arith.constant dense<0.000000e+00> : vector<64x256xf32>
    %3 = tpu.matmul %2, %1, %cst {dimension_numbers = #tpu.dot_dimension_numbers<[1], [0], [0], [1], [0, 0, 1, 1], [], []>} : vector<64x16xf32>, vector<16x256xf32>, vector<64x256xf32> -> vector<64x256xf32>
    %c0_4 = arith.constant 0 : index
    %c0_5 = arith.constant 0 : index
    %4 = vector.load %arg3[%c0_4, %c0_5] : memref<64x1xf32, #tpu.memory_space<vmem>>, vector<64x1xf32>
    %5 = vector.broadcast %4 : vector<64x1xf32> to vector<64x256xf32>
    %6 = arith.addf %3, %5 : vector<64x256xf32>
    %7 = vector.extract_strided_slice %6 {offsets = [32, 0], sizes = [32, 256], strides = [1, 1]} : vector<64x256xf32> to vector<32x256xf32>
    %c0_6 = arith.constant 0 : index
    %c0_7 = arith.constant 0 : index
    %8 = vector.load %arg6[%c0_6, %c0_7] : memref<576x64xf32, #tpu.memory_space<vmem>>, vector<576x64xf32>
    %cst_8 = arith.constant dense<0.000000e+00> : vector<576x256xf32>
    %9 = tpu.matmul %8, %6, %cst_8 {dimension_numbers = #tpu.dot_dimension_numbers<[1], [0], [0], [1], [0, 0, 1, 1], [], []>} : vector<576x64xf32>, vector<64x256xf32>, vector<576x256xf32> -> vector<576x256xf32>
    %10 = vector.extract_strided_slice %9 {offsets = [256, 0], sizes = [64, 256], strides = [1, 1]} : vector<576x256xf32> to vector<64x256xf32>
    %11 = vector.extract_strided_slice %9 {offsets = [0, 0], sizes = [64, 256], strides = [1, 1]} : vector<576x256xf32> to vector<64x256xf32>
    %c17_i32 = arith.constant 17 : i32
    %12 = tpu.dynamic_rotate %11 by %c17_i32 dim 1 : vector<64x256xf32>, i32 -> vector<64x256xf32>
    %c0_9 = arith.constant 0 : index
    %c0_10 = arith.constant 0 : index
    %c0_11 = arith.constant 0 : index
    %13 = vector.load %arg24[%c0_9, %c0_10, %c0_11] : memref<9x1x256xf32, #tpu.memory_space<vmem>>, vector<1x1x256xf32>
    %14 = vector.shape_cast %13 : vector<1x1x256xf32> to vector<1x256xf32>
    %15 = vector.broadcast %14 : vector<1x256xf32> to vector<64x256xf32>
    %16 = arith.mulf %12, %15 : vector<64x256xf32>
    %17 = arith.addf %10, %16 : vector<64x256xf32>
    %18 = vector.extract_strided_slice %9 {offsets = [64, 0], sizes = [64, 256], strides = [1, 1]} : vector<576x256xf32> to vector<64x256xf32>
    %c16_i32 = arith.constant 16 : i32
    %19 = tpu.dynamic_rotate %18 by %c16_i32 dim 1 : vector<64x256xf32>, i32 -> vector<64x256xf32>
    %c1 = arith.constant 1 : index
    %c0_12 = arith.constant 0 : index
    %c0_13 = arith.constant 0 : index
    %20 = vector.load %arg24[%c1, %c0_12, %c0_13] : memref<9x1x256xf32, #tpu.memory_space<vmem>>, vector<1x1x256xf32>
    %21 = vector.shape_cast %20 : vector<1x1x256xf32> to vector<1x256xf32>
    %22 = vector.broadcast %21 : vector<1x256xf32> to vector<64x256xf32>
    %23 = arith.mulf %19, %22 : vector<64x256xf32>
    %24 = arith.addf %17, %23 : vector<64x256xf32>
    %25 = vector.extract_strided_slice %9 {offsets = [128, 0], sizes = [64, 256], strides = [1, 1]} : vector<576x256xf32> to vector<64x256xf32>
    %c15_i32 = arith.constant 15 : i32
    %26 = tpu.dynamic_rotate %25 by %c15_i32 dim 1 : vector<64x256xf32>, i32 -> vector<64x256xf32>
    %c2 = arith.constant 2 : index
    %c0_14 = arith.constant 0 : index
    %c0_15 = arith.constant 0 : index
    %27 = vector.load %arg24[%c2, %c0_14, %c0_15] : memref<9x1x256xf32, #tpu.memory_space<vmem>>, vector<1x1x256xf32>
    %28 = vector.shape_cast %27 : vector<1x1x256xf32> to vector<1x256xf32>
    %29 = vector.broadcast %28 : vector<1x256xf32> to vector<64x256xf32>
    %30 = arith.mulf %26, %29 : vector<64x256xf32>
    %31 = arith.addf %24, %30 : vector<64x256xf32>
    %32 = vector.extract_strided_slice %9 {offsets = [192, 0], sizes = [64, 256], strides = [1, 1]} : vector<576x256xf32> to vector<64x256xf32>
    %c1_i32 = arith.constant 1 : i32
    %33 = tpu.dynamic_rotate %32 by %c1_i32 dim 1 : vector<64x256xf32>, i32 -> vector<64x256xf32>
    %c3 = arith.constant 3 : index
    %c0_16 = arith.constant 0 : index
    %c0_17 = arith.constant 0 : index
    %34 = vector.load %arg24[%c3, %c0_16, %c0_17] : memref<9x1x256xf32, #tpu.memory_space<vmem>>, vector<1x1x256xf32>
    %35 = vector.shape_cast %34 : vector<1x1x256xf32> to vector<1x256xf32>
    %36 = vector.broadcast %35 : vector<1x256xf32> to vector<64x256xf32>
    %37 = arith.mulf %33, %36 : vector<64x256xf32>
    %38 = arith.addf %31, %37 : vector<64x256xf32>
    %39 = vector.extract_strided_slice %9 {offsets = [320, 0], sizes = [64, 256], strides = [1, 1]} : vector<576x256xf32> to vector<64x256xf32>
    %c255_i32 = arith.constant 255 : i32
    %40 = tpu.dynamic_rotate %39 by %c255_i32 dim 1 : vector<64x256xf32>, i32 -> vector<64x256xf32>
    %c5 = arith.constant 5 : index
    %c0_18 = arith.constant 0 : index
    %c0_19 = arith.constant 0 : index
    %41 = vector.load %arg24[%c5, %c0_18, %c0_19] : memref<9x1x256xf32, #tpu.memory_space<vmem>>, vector<1x1x256xf32>
    %42 = vector.shape_cast %41 : vector<1x1x256xf32> to vector<1x256xf32>
    %43 = vector.broadcast %42 : vector<1x256xf32> to vector<64x256xf32>
    %44 = arith.mulf %40, %43 : vector<64x256xf32>
    %45 = arith.addf %38, %44 : vector<64x256xf32>
    %46 = vector.extract_strided_slice %9 {offsets = [384, 0], sizes = [64, 256], strides = [1, 1]} : vector<576x256xf32> to vector<64x256xf32>
    %c241_i32 = arith.constant 241 : i32
    %47 = tpu.dynamic_rotate %46 by %c241_i32 dim 1 : vector<64x256xf32>, i32 -> vector<64x256xf32>
    %c6 = arith.constant 6 : index
    %c0_20 = arith.constant 0 : index
    %c0_21 = arith.constant 0 : index
    %48 = vector.load %arg24[%c6, %c0_20, %c0_21] : memref<9x1x256xf32, #tpu.memory_space<vmem>>, vector<1x1x256xf32>
    %49 = vector.shape_cast %48 : vector<1x1x256xf32> to vector<1x256xf32>
    %50 = vector.broadcast %49 : vector<1x256xf32> to vector<64x256xf32>
    %51 = arith.mulf %47, %50 : vector<64x256xf32>
    %52 = arith.addf %45, %51 : vector<64x256xf32>
    %53 = vector.extract_strided_slice %9 {offsets = [448, 0], sizes = [64, 256], strides = [1, 1]} : vector<576x256xf32> to vector<64x256xf32>
    %c240_i32 = arith.constant 240 : i32
    %54 = tpu.dynamic_rotate %53 by %c240_i32 dim 1 : vector<64x256xf32>, i32 -> vector<64x256xf32>
    %c7 = arith.constant 7 : index
    %c0_22 = arith.constant 0 : index
    %c0_23 = arith.constant 0 : index
    %55 = vector.load %arg24[%c7, %c0_22, %c0_23] : memref<9x1x256xf32, #tpu.memory_space<vmem>>, vector<1x1x256xf32>
    %56 = vector.shape_cast %55 : vector<1x1x256xf32> to vector<1x256xf32>
    %57 = vector.broadcast %56 : vector<1x256xf32> to vector<64x256xf32>
    %58 = arith.mulf %54, %57 : vector<64x256xf32>
    %59 = arith.addf %52, %58 : vector<64x256xf32>
    %60 = vector.extract_strided_slice %9 {offsets = [512, 0], sizes = [64, 256], strides = [1, 1]} : vector<576x256xf32> to vector<64x256xf32>
    %c239_i32 = arith.constant 239 : i32
    %61 = tpu.dynamic_rotate %60 by %c239_i32 dim 1 : vector<64x256xf32>, i32 -> vector<64x256xf32>
    %c8 = arith.constant 8 : index
    %c0_24 = arith.constant 0 : index
    %c0_25 = arith.constant 0 : index
    %62 = vector.load %arg24[%c8, %c0_24, %c0_25] : memref<9x1x256xf32, #tpu.memory_space<vmem>>, vector<1x1x256xf32>
    %63 = vector.shape_cast %62 : vector<1x1x256xf32> to vector<1x256xf32>
    %64 = vector.broadcast %63 : vector<1x256xf32> to vector<64x256xf32>
    %65 = arith.mulf %61, %64 : vector<64x256xf32>
    %66 = arith.addf %59, %65 : vector<64x256xf32>
    %c0_26 = arith.constant 0 : index
    %c0_27 = arith.constant 0 : index
    %67 = vector.load %arg7[%c0_26, %c0_27] : memref<64x1xf32, #tpu.memory_space<vmem>>, vector<64x1xf32>
    %68 = vector.broadcast %67 : vector<64x1xf32> to vector<64x256xf32>
    %69 = arith.addf %66, %68 : vector<64x256xf32>
    %cst_28 = arith.constant 0.000000e+00 : f32
    %70 = vector.broadcast %cst_28 : f32 to vector<64x256xf32>
    %71 = arith.maximumf %69, %70 : vector<64x256xf32>
    %c0_29 = arith.constant 0 : index
    %c0_30 = arith.constant 0 : index
    %72 = vector.load %arg8[%c0_29, %c0_30] : memref<16x64xf32, #tpu.memory_space<vmem>>, vector<16x64xf32>
    %cst_31 = arith.constant dense<0.000000e+00> : vector<16x256xf32>
    %73 = tpu.matmul %72, %71, %cst_31 {dimension_numbers = #tpu.dot_dimension_numbers<[1], [0], [0], [1], [0, 0, 1, 1], [], []>} : vector<16x64xf32>, vector<64x256xf32>, vector<16x256xf32> -> vector<16x256xf32>
    %c0_32 = arith.constant 0 : index
    %c0_33 = arith.constant 0 : index
    %74 = vector.load %arg9[%c0_32, %c0_33] : memref<16x1xf32, #tpu.memory_space<vmem>>, vector<16x1xf32>
    %75 = vector.broadcast %74 : vector<16x1xf32> to vector<16x256xf32>
    %76 = arith.addf %73, %75 : vector<16x256xf32>
    %c0_34 = arith.constant 0 : index
    %c0_35 = arith.constant 0 : index
    %77 = vector.load %arg22[%c0_34, %c0_35] : memref<256x16xf32, #tpu.memory_space<vmem>>, vector<256x16xf32>
    %cst_36 = arith.constant dense<0.000000e+00> : vector<64x16xf32>
    %78 = tpu.matmul %6, %77, %cst_36 {dimension_numbers = #tpu.dot_dimension_numbers<[1], [0], [0], [1], [0, 0, 1, 1], [], []>} : vector<64x256xf32>, vector<256x16xf32>, vector<64x16xf32> -> vector<64x16xf32>
    %c0_37 = arith.constant 0 : index
    %c0_38 = arith.constant 0 : index
    %79 = vector.load %arg23[%c0_37, %c0_38] : memref<256x16xf32, #tpu.memory_space<vmem>>, vector<256x16xf32>
    %cst_39 = arith.constant dense<0.000000e+00> : vector<64x16xf32>
    %80 = tpu.matmul %6, %79, %cst_39 {dimension_numbers = #tpu.dot_dimension_numbers<[1], [0], [0], [1], [0, 0, 1, 1], [], []>} : vector<64x256xf32>, vector<256x16xf32>, vector<64x16xf32> -> vector<64x16xf32>
    %81 = vector.extract_strided_slice %78 {offsets = [16, 0], sizes = [16, 16], strides = [1, 1]} : vector<64x16xf32> to vector<16x16xf32>
    %c0_40 = arith.constant 0 : index
    %c0_41 = arith.constant 0 : index
    %82 = vector.load %arg17[%c0_40, %c0_41] : memref<16x16xf32, #tpu.memory_space<vmem>>, vector<16x16xf32>
    %83 = arith.addf %81, %82 : vector<16x16xf32>
    %84 = vector.extract_strided_slice %78 {offsets = [32, 0], sizes = [32, 16], strides = [1, 1]} : vector<64x16xf32> to vector<32x16xf32>
    %85 = vector.extract_strided_slice %80 {offsets = [16, 0], sizes = [16, 16], strides = [1, 1]} : vector<64x16xf32> to vector<16x16xf32>
    %c0_42 = arith.constant 0 : index
    %c0_43 = arith.constant 0 : index
    %86 = vector.load %arg19[%c0_42, %c0_43] : memref<16x16xf32, #tpu.memory_space<vmem>>, vector<16x16xf32>
    %87 = arith.addf %85, %86 : vector<16x16xf32>
    %88 = vector.extract_strided_slice %80 {offsets = [32, 0], sizes = [32, 16], strides = [1, 1]} : vector<64x16xf32> to vector<32x16xf32>
    %c0_44 = arith.constant 0 : index
    %c0_45 = arith.constant 0 : index
    %89 = vector.load %arg20[%c0_44, %c0_45] : memref<16x256xf32, #tpu.memory_space<vmem>>, vector<16x256xf32>
    %cst_46 = arith.constant dense<0.000000e+00> : vector<16x16xf32>
    %90 = tpu.matmul %89, %1, %cst_46 {dimension_numbers = #tpu.dot_dimension_numbers<[1], [1], [0], [0], [0, 0, 1, 0], [], []>} : vector<16x256xf32>, vector<16x256xf32>, vector<16x16xf32> -> vector<16x16xf32>
    %cst_47 = arith.constant 6.250000e-02 : f32
    %91 = vector.broadcast %cst_47 : f32 to vector<16x16xf32>
    %92 = arith.mulf %90, %91 : vector<16x16xf32>
    %c0_48 = arith.constant 0 : index
    %c0_49 = arith.constant 0 : index
    %93 = vector.load %arg21[%c0_48, %c0_49] : memref<16x256xf32, #tpu.memory_space<vmem>>, vector<16x256xf32>
    %cst_50 = arith.constant dense<0.000000e+00> : vector<16x16xf32>
    %94 = tpu.matmul %93, %1, %cst_50 {dimension_numbers = #tpu.dot_dimension_numbers<[1], [1], [0], [0], [0, 0, 1, 0], [], []>} : vector<16x256xf32>, vector<16x256xf32>, vector<16x16xf32> -> vector<16x16xf32>
    %cst_51 = arith.constant 6.250000e-02 : f32
    %95 = vector.broadcast %cst_51 : f32 to vector<16x16xf32>
    %96 = arith.mulf %94, %95 : vector<16x16xf32>
    %c0_52 = arith.constant 0 : index
    %c0_53 = arith.constant 0 : index
    %97 = vector.load %arg4[%c0_52, %c0_53] : memref<16x16xf32, #tpu.memory_space<vmem>>, vector<16x16xf32>
    %cst_54 = arith.constant dense<0.000000e+00> : vector<16x16xf32>
    %98 = tpu.matmul %92, %97, %cst_54 {dimension_numbers = #tpu.dot_dimension_numbers<[1], [0], [0], [1], [0, 0, 1, 1], [], []>} : vector<16x16xf32>, vector<16x16xf32>, vector<16x16xf32> -> vector<16x16xf32>
    %c0_55 = arith.constant 0 : index
    %c0_56 = arith.constant 0 : index
    %99 = vector.load %arg5[%c0_55, %c0_56] : memref<1x16xf32, #tpu.memory_space<vmem>>, vector<1x16xf32>
    %100 = vector.broadcast %99 : vector<1x16xf32> to vector<16x16xf32>
    %101 = arith.addf %98, %100 : vector<16x16xf32>
    %c0_57 = arith.constant 0 : index
    %c0_58 = arith.constant 0 : index
    %102 = vector.load %arg16[%c0_57, %c0_58] : memref<16x16xf32, #tpu.memory_space<vmem>>, vector<16x16xf32>
    %103 = arith.addf %101, %102 : vector<16x16xf32>
    %c0_59 = arith.constant 0 : index
    %c0_60 = arith.constant 0 : index
    %104 = vector.load %arg4[%c0_59, %c0_60] : memref<16x16xf32, #tpu.memory_space<vmem>>, vector<16x16xf32>
    %cst_61 = arith.constant dense<0.000000e+00> : vector<16x16xf32>
    %105 = tpu.matmul %96, %104, %cst_61 {dimension_numbers = #tpu.dot_dimension_numbers<[1], [0], [0], [1], [0, 0, 1, 1], [], []>} : vector<16x16xf32>, vector<16x16xf32>, vector<16x16xf32> -> vector<16x16xf32>
    %c0_62 = arith.constant 0 : index
    %c0_63 = arith.constant 0 : index
    %106 = vector.load %arg5[%c0_62, %c0_63] : memref<1x16xf32, #tpu.memory_space<vmem>>, vector<1x16xf32>
    %107 = vector.broadcast %106 : vector<1x16xf32> to vector<16x16xf32>
    %108 = arith.addf %105, %107 : vector<16x16xf32>
    %c0_64 = arith.constant 0 : index
    %c0_65 = arith.constant 0 : index
    %109 = vector.load %arg18[%c0_64, %c0_65] : memref<16x16xf32, #tpu.memory_space<vmem>>, vector<16x16xf32>
    %110 = arith.addf %108, %109 : vector<16x16xf32>
    %111 = vector.extract_strided_slice %103 {offsets = [0, 0], sizes = [16, 8], strides = [1, 1]} : vector<16x16xf32> to vector<16x8xf32>
    %112 = vector.extract_strided_slice %83 {offsets = [0, 0], sizes = [8, 16], strides = [1, 1]} : vector<16x16xf32> to vector<8x16xf32>
    %113 = vector.extract_strided_slice %84 {offsets = [0, 0], sizes = [16, 16], strides = [1, 1]} : vector<32x16xf32> to vector<16x16xf32>
    %cst_66 = arith.constant dense<0.000000e+00> : vector<16x16xf32>
    %114 = tpu.matmul %111, %112, %cst_66 {dimension_numbers = #tpu.dot_dimension_numbers<[1], [0], [0], [1], [0, 0, 1, 1], [], []>} : vector<16x8xf32>, vector<8x16xf32>, vector<16x16xf32> -> vector<16x16xf32>
    %cst_67 = arith.constant 0.353553385 : f32
    %115 = vector.broadcast %cst_67 : f32 to vector<16x16xf32>
    %116 = arith.mulf %114, %115 : vector<16x16xf32>
    %cst_68 = arith.constant dense<0xFF800000> : vector<16xf32>
    %117 = vector.multi_reduction <maximumf>, %116, %cst_68 [1] : vector<16x16xf32> to vector<16xf32>
    %118 = vector.shape_cast %117 : vector<16xf32> to vector<16x1xf32>
    %119 = vector.broadcast %118 : vector<16x1xf32> to vector<16x16xf32>
    %120 = arith.subf %116, %119 : vector<16x16xf32>
    %121 = math.exp %120 : vector<16x16xf32>
    %cst_69 = arith.constant dense<0.000000e+00> : vector<16xf32>
    %122 = vector.multi_reduction <add>, %121, %cst_69 [1] : vector<16x16xf32> to vector<16xf32>
    %123 = vector.shape_cast %122 : vector<16xf32> to vector<16x1xf32>
    %124 = tpu.reciprocal %123 : vector<16x1xf32> -> vector<16x1xf32>
    %125 = vector.broadcast %124 : vector<16x1xf32> to vector<16x16xf32>
    %126 = arith.mulf %121, %125 : vector<16x16xf32>
    %cst_70 = arith.constant dense<0.000000e+00> : vector<16x16xf32>
    %127 = tpu.matmul %113, %126, %cst_70 {dimension_numbers = #tpu.dot_dimension_numbers<[1], [1], [0], [0], [0, 0, 1, 0], [], []>} : vector<16x16xf32>, vector<16x16xf32>, vector<16x16xf32> -> vector<16x16xf32>
    %128 = vector.extract_strided_slice %103 {offsets = [0, 8], sizes = [16, 8], strides = [1, 1]} : vector<16x16xf32> to vector<16x8xf32>
    %129 = vector.extract_strided_slice %83 {offsets = [8, 0], sizes = [8, 16], strides = [1, 1]} : vector<16x16xf32> to vector<8x16xf32>
    %130 = vector.extract_strided_slice %84 {offsets = [16, 0], sizes = [16, 16], strides = [1, 1]} : vector<32x16xf32> to vector<16x16xf32>
    %cst_71 = arith.constant dense<0.000000e+00> : vector<16x16xf32>
    %131 = tpu.matmul %128, %129, %cst_71 {dimension_numbers = #tpu.dot_dimension_numbers<[1], [0], [0], [1], [0, 0, 1, 1], [], []>} : vector<16x8xf32>, vector<8x16xf32>, vector<16x16xf32> -> vector<16x16xf32>
    %cst_72 = arith.constant 0.353553385 : f32
    %132 = vector.broadcast %cst_72 : f32 to vector<16x16xf32>
    %133 = arith.mulf %131, %132 : vector<16x16xf32>
    %cst_73 = arith.constant dense<0xFF800000> : vector<16xf32>
    %134 = vector.multi_reduction <maximumf>, %133, %cst_73 [1] : vector<16x16xf32> to vector<16xf32>
    %135 = vector.shape_cast %134 : vector<16xf32> to vector<16x1xf32>
    %136 = vector.broadcast %135 : vector<16x1xf32> to vector<16x16xf32>
    %137 = arith.subf %133, %136 : vector<16x16xf32>
    %138 = math.exp %137 : vector<16x16xf32>
    %cst_74 = arith.constant dense<0.000000e+00> : vector<16xf32>
    %139 = vector.multi_reduction <add>, %138, %cst_74 [1] : vector<16x16xf32> to vector<16xf32>
    %140 = vector.shape_cast %139 : vector<16xf32> to vector<16x1xf32>
    %141 = tpu.reciprocal %140 : vector<16x1xf32> -> vector<16x1xf32>
    %142 = vector.broadcast %141 : vector<16x1xf32> to vector<16x16xf32>
    %143 = arith.mulf %138, %142 : vector<16x16xf32>
    %cst_75 = arith.constant dense<0.000000e+00> : vector<16x16xf32>
    %144 = tpu.matmul %130, %143, %cst_75 {dimension_numbers = #tpu.dot_dimension_numbers<[1], [1], [0], [0], [0, 0, 1, 0], [], []>} : vector<16x16xf32>, vector<16x16xf32>, vector<16x16xf32> -> vector<16x16xf32>
    %145 = tpu.concatenate %127, %144 in 0 : vector<16x16xf32>, vector<16x16xf32> -> vector<32x16xf32>
    %146 = vector.extract_strided_slice %110 {offsets = [0, 0], sizes = [16, 8], strides = [1, 1]} : vector<16x16xf32> to vector<16x8xf32>
    %147 = vector.extract_strided_slice %87 {offsets = [0, 0], sizes = [8, 16], strides = [1, 1]} : vector<16x16xf32> to vector<8x16xf32>
    %148 = vector.extract_strided_slice %88 {offsets = [0, 0], sizes = [16, 16], strides = [1, 1]} : vector<32x16xf32> to vector<16x16xf32>
    %cst_76 = arith.constant dense<0.000000e+00> : vector<16x16xf32>
    %149 = tpu.matmul %146, %147, %cst_76 {dimension_numbers = #tpu.dot_dimension_numbers<[1], [0], [0], [1], [0, 0, 1, 1], [], []>} : vector<16x8xf32>, vector<8x16xf32>, vector<16x16xf32> -> vector<16x16xf32>
    %cst_77 = arith.constant 0.353553385 : f32
    %150 = vector.broadcast %cst_77 : f32 to vector<16x16xf32>
    %151 = arith.mulf %149, %150 : vector<16x16xf32>
    %cst_78 = arith.constant dense<0xFF800000> : vector<16xf32>
    %152 = vector.multi_reduction <maximumf>, %151, %cst_78 [1] : vector<16x16xf32> to vector<16xf32>
    %153 = vector.shape_cast %152 : vector<16xf32> to vector<16x1xf32>
    %154 = vector.broadcast %153 : vector<16x1xf32> to vector<16x16xf32>
    %155 = arith.subf %151, %154 : vector<16x16xf32>
    %156 = math.exp %155 : vector<16x16xf32>
    %cst_79 = arith.constant dense<0.000000e+00> : vector<16xf32>
    %157 = vector.multi_reduction <add>, %156, %cst_79 [1] : vector<16x16xf32> to vector<16xf32>
    %158 = vector.shape_cast %157 : vector<16xf32> to vector<16x1xf32>
    %159 = tpu.reciprocal %158 : vector<16x1xf32> -> vector<16x1xf32>
    %160 = vector.broadcast %159 : vector<16x1xf32> to vector<16x16xf32>
    %161 = arith.mulf %156, %160 : vector<16x16xf32>
    %cst_80 = arith.constant dense<0.000000e+00> : vector<16x16xf32>
    %162 = tpu.matmul %148, %161, %cst_80 {dimension_numbers = #tpu.dot_dimension_numbers<[1], [1], [0], [0], [0, 0, 1, 0], [], []>} : vector<16x16xf32>, vector<16x16xf32>, vector<16x16xf32> -> vector<16x16xf32>
    %163 = vector.extract_strided_slice %110 {offsets = [0, 8], sizes = [16, 8], strides = [1, 1]} : vector<16x16xf32> to vector<16x8xf32>
    %164 = vector.extract_strided_slice %87 {offsets = [8, 0], sizes = [8, 16], strides = [1, 1]} : vector<16x16xf32> to vector<8x16xf32>
    %165 = vector.extract_strided_slice %88 {offsets = [16, 0], sizes = [16, 16], strides = [1, 1]} : vector<32x16xf32> to vector<16x16xf32>
    %cst_81 = arith.constant dense<0.000000e+00> : vector<16x16xf32>
    %166 = tpu.matmul %163, %164, %cst_81 {dimension_numbers = #tpu.dot_dimension_numbers<[1], [0], [0], [1], [0, 0, 1, 1], [], []>} : vector<16x8xf32>, vector<8x16xf32>, vector<16x16xf32> -> vector<16x16xf32>
    %cst_82 = arith.constant 0.353553385 : f32
    %167 = vector.broadcast %cst_82 : f32 to vector<16x16xf32>
    %168 = arith.mulf %166, %167 : vector<16x16xf32>
    %cst_83 = arith.constant dense<0xFF800000> : vector<16xf32>
    %169 = vector.multi_reduction <maximumf>, %168, %cst_83 [1] : vector<16x16xf32> to vector<16xf32>
    %170 = vector.shape_cast %169 : vector<16xf32> to vector<16x1xf32>
    %171 = vector.broadcast %170 : vector<16x1xf32> to vector<16x16xf32>
    %172 = arith.subf %168, %171 : vector<16x16xf32>
    %173 = math.exp %172 : vector<16x16xf32>
    %cst_84 = arith.constant dense<0.000000e+00> : vector<16xf32>
    %174 = vector.multi_reduction <add>, %173, %cst_84 [1] : vector<16x16xf32> to vector<16xf32>
    %175 = vector.shape_cast %174 : vector<16xf32> to vector<16x1xf32>
    %176 = tpu.reciprocal %175 : vector<16x1xf32> -> vector<16x1xf32>
    %177 = vector.broadcast %176 : vector<16x1xf32> to vector<16x16xf32>
    %178 = arith.mulf %173, %177 : vector<16x16xf32>
    %cst_85 = arith.constant dense<0.000000e+00> : vector<16x16xf32>
    %179 = tpu.matmul %165, %178, %cst_85 {dimension_numbers = #tpu.dot_dimension_numbers<[1], [1], [0], [0], [0, 0, 1, 0], [], []>} : vector<16x16xf32>, vector<16x16xf32>, vector<16x16xf32> -> vector<16x16xf32>
    %180 = tpu.concatenate %162, %179 in 0 : vector<16x16xf32>, vector<16x16xf32> -> vector<32x16xf32>
    %c0_86 = arith.constant 0 : index
    %c0_87 = arith.constant 0 : index
    %181 = vector.load %arg10[%c0_86, %c0_87] : memref<32x32xf32, #tpu.memory_space<vmem>>, vector<32x32xf32>
    %cst_88 = arith.constant 0.000000e+00 : f32
    %182 = vector.broadcast %cst_88 : f32 to vector<32x16xf32>
    %183 = arith.maximumf %145, %182 : vector<32x16xf32>
    %cst_89 = arith.constant dense<0.000000e+00> : vector<32x16xf32>
    %184 = tpu.matmul %181, %183, %cst_89 {dimension_numbers = #tpu.dot_dimension_numbers<[1], [0], [0], [1], [0, 0, 1, 1], [], []>} : vector<32x32xf32>, vector<32x16xf32>, vector<32x16xf32> -> vector<32x16xf32>
    %c0_90 = arith.constant 0 : index
    %c0_91 = arith.constant 0 : index
    %185 = vector.load %arg11[%c0_90, %c0_91] : memref<32x1xf32, #tpu.memory_space<vmem>>, vector<32x1xf32>
    %186 = vector.broadcast %185 : vector<32x1xf32> to vector<32x16xf32>
    %187 = arith.addf %184, %186 : vector<32x16xf32>
    %c0_92 = arith.constant 0 : index
    %c0_93 = arith.constant 0 : index
    %188 = vector.load %arg12[%c0_92, %c0_93] : memref<32x32xf32, #tpu.memory_space<vmem>>, vector<32x32xf32>
    %cst_94 = arith.constant 0.000000e+00 : f32
    %189 = vector.broadcast %cst_94 : f32 to vector<32x16xf32>
    %190 = arith.maximumf %180, %189 : vector<32x16xf32>
    %cst_95 = arith.constant dense<0.000000e+00> : vector<32x16xf32>
    %191 = tpu.matmul %188, %190, %cst_95 {dimension_numbers = #tpu.dot_dimension_numbers<[1], [0], [0], [1], [0, 0, 1, 1], [], []>} : vector<32x32xf32>, vector<32x16xf32>, vector<32x16xf32> -> vector<32x16xf32>
    %c0_96 = arith.constant 0 : index
    %c0_97 = arith.constant 0 : index
    %192 = vector.load %arg13[%c0_96, %c0_97] : memref<32x1xf32, #tpu.memory_space<vmem>>, vector<32x1xf32>
    %193 = vector.broadcast %192 : vector<32x1xf32> to vector<32x16xf32>
    %194 = arith.addf %191, %193 : vector<32x16xf32>
    %c0_98 = arith.constant 0 : index
    %c0_99 = arith.constant 0 : index
    %195 = vector.load %arg20[%c0_98, %c0_99] : memref<16x256xf32, #tpu.memory_space<vmem>>, vector<16x256xf32>
    %cst_100 = arith.constant dense<0.000000e+00> : vector<32x256xf32>
    %196 = tpu.matmul %187, %195, %cst_100 {dimension_numbers = #tpu.dot_dimension_numbers<[1], [0], [0], [1], [0, 0, 1, 1], [], []>} : vector<32x16xf32>, vector<16x256xf32>, vector<32x256xf32> -> vector<32x256xf32>
    %c0_101 = arith.constant 0 : index
    %c0_102 = arith.constant 0 : index
    %197 = vector.load %arg21[%c0_101, %c0_102] : memref<16x256xf32, #tpu.memory_space<vmem>>, vector<16x256xf32>
    %cst_103 = arith.constant dense<0.000000e+00> : vector<32x256xf32>
    %198 = tpu.matmul %194, %197, %cst_103 {dimension_numbers = #tpu.dot_dimension_numbers<[1], [0], [0], [1], [0, 0, 1, 1], [], []>} : vector<32x16xf32>, vector<16x256xf32>, vector<32x256xf32> -> vector<32x256xf32>
    %199 = arith.addf %7, %196 : vector<32x256xf32>
    %200 = arith.addf %199, %198 : vector<32x256xf32>
    %cst_104 = arith.constant 0.000000e+00 : f32
    %201 = vector.broadcast %cst_104 : f32 to vector<32x256xf32>
    %202 = arith.maximumf %200, %201 : vector<32x256xf32>
    %c0_105 = arith.constant 0 : index
    %c0_106 = arith.constant 0 : index
    %203 = vector.load %arg14[%c0_105, %c0_106] : memref<16x32xf32, #tpu.memory_space<vmem>>, vector<16x32xf32>
    %cst_107 = arith.constant dense<0.000000e+00> : vector<16x256xf32>
    %204 = tpu.matmul %203, %202, %cst_107 {dimension_numbers = #tpu.dot_dimension_numbers<[1], [0], [0], [1], [0, 0, 1, 1], [], []>} : vector<16x32xf32>, vector<32x256xf32>, vector<16x256xf32> -> vector<16x256xf32>
    %c0_108 = arith.constant 0 : index
    %c0_109 = arith.constant 0 : index
    %205 = vector.load %arg15[%c0_108, %c0_109] : memref<16x1xf32, #tpu.memory_space<vmem>>, vector<16x1xf32>
    %206 = vector.broadcast %205 : vector<16x1xf32> to vector<16x256xf32>
    %207 = arith.addf %204, %206 : vector<16x256xf32>
    %208 = arith.negf %207 : vector<16x256xf32>
    %209 = math.exp %208 : vector<16x256xf32>
    %cst_110 = arith.constant 1.000000e+00 : f32
    %210 = vector.broadcast %cst_110 : f32 to vector<16x256xf32>
    %211 = arith.addf %210, %209 : vector<16x256xf32>
    %212 = arith.divf %210, %211 : vector<16x256xf32>
    %213 = arith.mulf %212, %76 : vector<16x256xf32>
    %214 = arith.addf %213, %207 : vector<16x256xf32>
    %c0_111 = arith.constant 0 : index
    %c0_112 = arith.constant 0 : index
    %c0_113 = arith.constant 0 : index
    %215 = vector.load %arg25[%c0_111, %c0_112, %c0_113] : memref<1x16x256xf32, #tpu.memory_space<vmem>>, vector<1x16x256xf32>
    %216 = vector.shape_cast %215 : vector<1x16x256xf32> to vector<16x256xf32>
    %217 = vector.shape_cast %214 : vector<16x256xf32> to vector<1x16x256xf32>
    tpu.vector_store %arg25[%c0_111, %c0_112, %c0_113], %217 {strides = array<i32>} : memref<1x16x256xf32, #tpu.memory_space<vmem>>, vector<1x16x256xf32>,
    return
  }
  func.func @transform_0(%arg0: i32) -> (i32, i32, i32) {
    %c0_i32 = arith.constant 0 : i32
    %c0_i32_0 = arith.constant 0 : i32
    %c0_i32_1 = arith.constant 0 : i32
    return %arg0, %c0_i32, %c0_i32_0 : i32, i32, i32
  }
  func.func @transform_1(%arg0: i32) -> (i32, i32) {
    %c0_i32 = arith.constant 0 : i32
    %c0_i32_0 = arith.constant 0 : i32
    %c0_i32_1 = arith.constant 0 : i32
    return %c0_i32, %c0_i32_0 : i32, i32
  }
  func.func @transform_2(%arg0: i32) -> (i32, i32) {
    %c0_i32 = arith.constant 0 : i32
    %c0_i32_0 = arith.constant 0 : i32
    %c0_i32_1 = arith.constant 0 : i32
    return %c0_i32, %c0_i32_0 : i32, i32
  }
  func.func @transform_3(%arg0: i32) -> (i32, i32) {
    %c0_i32 = arith.constant 0 : i32
    %c0_i32_0 = arith.constant 0 : i32
    %c0_i32_1 = arith.constant 0 : i32
    return %c0_i32, %c0_i32_0 : i32, i32
  }
  func.func @transform_4(%arg0: i32) -> (i32, i32) {
    %c0_i32 = arith.constant 0 : i32
    %c0_i32_0 = arith.constant 0 : i32
    %c0_i32_1 = arith.constant 0 : i32
    return %c0_i32, %c0_i32_0 : i32, i32
  }
  func.func @transform_5(%arg0: i32) -> (i32, i32) {
    %c0_i32 = arith.constant 0 : i32
    %c0_i32_0 = arith.constant 0 : i32
    %c0_i32_1 = arith.constant 0 : i32
    return %c0_i32, %c0_i32_0 : i32, i32
  }
  func.func @transform_6(%arg0: i32) -> (i32, i32) {
    %c0_i32 = arith.constant 0 : i32
    %c0_i32_0 = arith.constant 0 : i32
    %c0_i32_1 = arith.constant 0 : i32
    return %c0_i32, %c0_i32_0 : i32, i32
  }
  func.func @transform_7(%arg0: i32) -> (i32, i32) {
    %c0_i32 = arith.constant 0 : i32
    %c0_i32_0 = arith.constant 0 : i32
    %c0_i32_1 = arith.constant 0 : i32
    return %c0_i32, %c0_i32_0 : i32, i32
  }
  func.func @transform_8(%arg0: i32) -> (i32, i32) {
    %c0_i32 = arith.constant 0 : i32
    %c0_i32_0 = arith.constant 0 : i32
    %c0_i32_1 = arith.constant 0 : i32
    return %c0_i32, %c0_i32_0 : i32, i32
  }
  func.func @transform_9(%arg0: i32) -> (i32, i32) {
    %c0_i32 = arith.constant 0 : i32
    %c0_i32_0 = arith.constant 0 : i32
    %c0_i32_1 = arith.constant 0 : i32
    return %c0_i32, %c0_i32_0 : i32, i32
  }
  func.func @transform_10(%arg0: i32) -> (i32, i32) {
    %c0_i32 = arith.constant 0 : i32
    %c0_i32_0 = arith.constant 0 : i32
    %c0_i32_1 = arith.constant 0 : i32
    return %c0_i32, %c0_i32_0 : i32, i32
  }
  func.func @transform_11(%arg0: i32) -> (i32, i32) {
    %c0_i32 = arith.constant 0 : i32
    %c0_i32_0 = arith.constant 0 : i32
    %c0_i32_1 = arith.constant 0 : i32
    return %c0_i32, %c0_i32_0 : i32, i32
  }
  func.func @transform_12(%arg0: i32) -> (i32, i32) {
    %c0_i32 = arith.constant 0 : i32
    %c0_i32_0 = arith.constant 0 : i32
    %c0_i32_1 = arith.constant 0 : i32
    return %c0_i32, %c0_i32_0 : i32, i32
  }
  func.func @transform_13(%arg0: i32) -> (i32, i32) {
    %c0_i32 = arith.constant 0 : i32
    %c0_i32_0 = arith.constant 0 : i32
    %c0_i32_1 = arith.constant 0 : i32
    return %c0_i32, %c0_i32_0 : i32, i32
  }
  func.func @transform_14(%arg0: i32) -> (i32, i32) {
    %c0_i32 = arith.constant 0 : i32
    %c0_i32_0 = arith.constant 0 : i32
    %c0_i32_1 = arith.constant 0 : i32
    return %c0_i32, %c0_i32_0 : i32, i32
  }
  func.func @transform_15(%arg0: i32) -> (i32, i32) {
    %c0_i32 = arith.constant 0 : i32
    %c0_i32_0 = arith.constant 0 : i32
    %c0_i32_1 = arith.constant 0 : i32
    return %c0_i32, %c0_i32_0 : i32, i32
  }
  func.func @transform_16(%arg0: i32) -> (i32, i32) {
    %c0_i32 = arith.constant 0 : i32
    %c0_i32_0 = arith.constant 0 : i32
    %c0_i32_1 = arith.constant 0 : i32
    return %c0_i32, %c0_i32_0 : i32, i32
  }
  func.func @transform_17(%arg0: i32) -> (i32, i32) {
    %c0_i32 = arith.constant 0 : i32
    %c0_i32_0 = arith.constant 0 : i32
    %c0_i32_1 = arith.constant 0 : i32
    return %c0_i32, %c0_i32_0 : i32, i32
  }
  func.func @transform_18(%arg0: i32) -> (i32, i32) {
    %c0_i32 = arith.constant 0 : i32
    %c0_i32_0 = arith.constant 0 : i32
    %c0_i32_1 = arith.constant 0 : i32
    return %c0_i32, %c0_i32_0 : i32, i32
  }
  func.func @transform_19(%arg0: i32) -> (i32, i32) {
    %c0_i32 = arith.constant 0 : i32
    %c0_i32_0 = arith.constant 0 : i32
    %c0_i32_1 = arith.constant 0 : i32
    return %c0_i32, %c0_i32_0 : i32, i32
  }
  func.func @transform_20(%arg0: i32) -> (i32, i32) {
    %c0_i32 = arith.constant 0 : i32
    %c0_i32_0 = arith.constant 0 : i32
    %c0_i32_1 = arith.constant 0 : i32
    return %c0_i32, %c0_i32_0 : i32, i32
  }
  func.func @transform_21(%arg0: i32) -> (i32, i32) {
    %c0_i32 = arith.constant 0 : i32
    %c0_i32_0 = arith.constant 0 : i32
    %c0_i32_1 = arith.constant 0 : i32
    return %c0_i32, %c0_i32_0 : i32, i32
  }
  func.func @transform_22(%arg0: i32) -> (i32, i32) {
    %c0_i32 = arith.constant 0 : i32
    %c0_i32_0 = arith.constant 0 : i32
    %c0_i32_1 = arith.constant 0 : i32
    return %c0_i32, %c0_i32_0 : i32, i32
  }
  func.func @transform_23(%arg0: i32) -> (i32, i32, i32) {
    %c0_i32 = arith.constant 0 : i32
    %c0_i32_0 = arith.constant 0 : i32
    %c0_i32_1 = arith.constant 0 : i32
    %c0_i32_2 = arith.constant 0 : i32
    return %c0_i32, %c0_i32_0, %c0_i32_1 : i32, i32, i32
  }
  func.func @transform_24(%arg0: i32) -> (i32, i32, i32) {
    %c0_i32 = arith.constant 0 : i32
    %c0_i32_0 = arith.constant 0 : i32
    %c0_i32_1 = arith.constant 0 : i32
    return %arg0, %c0_i32, %c0_i32_0 : i32, i32, i32
  }
}

</mosaic_0001>

<bundles_post_ra>
// kernel: sea_attention_pallas.1
= control target key start
LH: loop header
LB: loop body
LE: loop exit
PB: predicated region body
PF: predicated region fallthrough
CT: control target
= control target key end

     0   :  { %s6492_s0 = inlined_call_operand.vmem [shape: f32[2,16,256], index: 0, kind: input, shape index: {}]   ;;  %s6493_s1 = inlined_call_operand.vmem [shape: f32[64,16], index: 1, kind: input, shape index: {}]   ;;  %s6494_s2 = inlined_call_operand.vmem [shape: f32[64,1], index: 2, kind: input, shape index: {}]   ;;  %s6495_s3 = inlined_call_operand.vmem [shape: f32[16,16], index: 3, kind: input, shape index: {}]   ;;  %s6496_s4 = inlined_call_operand.vmem [shape: f32[1,16], index: 4, kind: input, shape index: {}]   ;;  %s6497_s5 = inlined_call_operand.vmem [shape: f32[576,64], index: 5, kind: input, shape index: {}]   ;;  %s6498_s6 = inlined_call_operand.vmem [shape: f32[64,1], index: 6, kind: input, shape index: {}]   ;;  %s6499_s7 = inlined_call_operand.vmem [shape: f32[16,64], index: 7, kind: input, shape index: {}]   ;;  %s6500_s8 = inlined_call_operand.vmem [shape: f32[16,1], index: 8, kind: input, shape index: {}]   ;;  %s6501_s9 = inlined_call_operand.vmem [shape: f32[32,32], index: 9, kind: input, shape index: {}]   ;;  %s6502_s10 = inlined_call_operand.vmem [shape: f32[32,1], index: 10, kind: input, shape index: {}]   ;;  %s6503_s11 = inlined_call_operand.vmem [shape: f32[32,32], index: 11, kind: input, shape index: {}]   ;;  %s6504_s12 = inlined_call_operand.vmem [shape: f32[32,1], index: 12, kind: input, shape index: {}]   ;;  %s6505_s13 = inlined_call_operand.vmem [shape: f32[16,32], index: 13, kind: input, shape index: {}]   ;;  %s6506_s14 = inlined_call_operand.vmem [shape: f32[16,1], index: 14, kind: input, shape index: {}]   ;;  %s6507_s15 = inlined_call_operand.vmem [shape: f32[16,16], index: 15, kind: input, shape index: {}]   ;;  %s6508_s16 = inlined_call_operand.vmem [shape: f32[16,16], index: 16, kind: input, shape index: {}]   ;;  %s6509_s17 = inlined_call_operand.vmem [shape: f32[16,16], index: 17, kind: input, shape index: {}]   ;;  %s6510_s18 = inlined_call_operand.vmem [shape: f32[16,16], index: 18, kind: input, shape index: {}]   ;;  %s6511_s19 = inlined_call_operand.vmem [shape: f32[16,256], index: 19, kind: input, shape index: {}]   ;;  %s6512_s20 = inlined_call_operand.vmem [shape: f32[16,256], index: 20, kind: input, shape index: {}]   ;;  %s6513_s21 = inlined_call_operand.vmem [shape: f32[256,16], index: 21, kind: input, shape index: {}]   ;;  %s6514_s22 = inlined_call_operand.vmem [shape: f32[256,16], index: 22, kind: input, shape index: {}]   ;;  %s6515_s23 = inlined_call_operand.vmem [shape: f32[9,1,256], index: 23, kind: input, shape index: {}]   ;;  %s6516_s24 = inlined_call_operand.vmem [shape: f32[2,16,256], index: 24, kind: output, shape index: {}]  }
   0x1   :  { %6543 = sst [smem:[#allocation10_spill]] %s6492_s0 }
   0x2   :  { %6544 = sst [smem:[#allocation11_spill]] %s6493_s1 }
   0x3   :  { %6545 = sst [smem:[#allocation12_spill]] %s6494_s2 }
   0x4   :  { %6546 = sst [smem:[#allocation13_spill]] %s6495_s3 }
   0x5   :  { %6547 = sst [smem:[#allocation14_spill]] %s6496_s4 }
   0x6   :  { %6548 = sst [smem:[#allocation15_spill]] %s6497_s5  ;;  %s4373_s5 = smov 0  }
   0x7   :  { %6549 = sst [smem:[#allocation16_spill]] %s6498_s6 }
   0x8   :  { %6550 = sst [smem:[#allocation17_spill]] %s6499_s7 }
   0x9   :  { %6551 = sst [smem:[#allocation18_spill]] %s6500_s8 }
   0xa   :  { %6552 = sst [smem:[#allocation19_spill]] %s6515_s23 }
   0xb LB: > { %s3896_s26 = sadd.s32 4294967295, %s4236_s5   ;;  %p3900_p0 = scmp.ge.s32.totalorder %s4236_s5, 1  ;;  %s4236_s5 = sphi %s4373_s5, %s34_s5  }
   0xc   : > { %p662_p1 = scmp.lt.s32.totalorder %s4236_s5, 3 }
   0xe   : > { %p663_p2 = pnand %p3900_p0, %p662_p1 }
  0x10   : > { %666 = sbr.rel (%p663_p2) target bundleno = 2594 (0xa22), region = 116 }
  0x15   : > { %s6553_s6 = sld [smem:[#allocation12_spill]]  ;;  %p728_p3 = scmp.lt.s32.totalorder %s3896_s26, 1  ;;  %v4238_v2 = vmov 0   ;;  %vm798_vm0 = vcmask 130048   ;;  %vm977_vm1 = vcmask 523264   ;;  %vm2915_vm10 = vcmask 64512  }
  0x16   : > { %4175 = vset.pattern.permute.xlu1 %v4238_v2  ;;  %4174 = vset.pattern.permute.xlu0 %v4238_v2  ;;  %s6554_s3 = sld [smem:[#allocation10_spill]]  ;;  %s4239_s7 = smov 17  }
  0x17   : > { %s6587_s26 = smov (!%p728_p3, %s3896_s26), 1  ;;  %4176 = vset.pattern.permute.xlu2 %v4238_v2  ;;  %s6555_s1 = sld [smem:[#allocation11_spill]] }
  0x18   : > { %s6524_s0 = sshll.u32 %s6587_s26, 5  ;;  %s6556_s27 = sld [smem:[#allocation16_spill]] }
  0x19   : > { %s6565_s29 = sld [smem:[#allocation15_spill]]  ;;  %s4240_s30 = smov 16  }
  0x1a   : > { %s4241_s4 = smov 15   ;;  %s4242_s8 = smov 1  }
  0x1b   : > { %v755_v0 = vld [vmem:[%s6553_s6 + $0x28] sm:$0xff]  ;;  %v757_v1 = vld [vmem:[%s6553_s6 + $0x38] sm:$0xff]  ;;  %v754_v8 = vld [vmem:[%s6553_s6 + $0x20] sm:$0xff]  ;;  %s6566_s23 = sld [smem:[#allocation19_spill]]  ;;  %s4246_s28 = smov 111  }
  0x1c   : > { %785 = vperm.xlu1 %4175, %v755_v0   ;;  %795 = vperm.xlu0 %4174, %v757_v1   ;;  %s4395_s25 = scalar_lea.vmem %s6554_s3, %s6524_s0  ;;  %v756_v9 = vld [vmem:[%s6553_s6 + $0x30] sm:$0xff]  ;;  %v750_v11 = vld [vmem:[%s6553_s6] sm:$0xff]  ;;  %v751_v12 = vld [vmem:[%s6553_s6 + $0x8] sm:$0xff]  ;;  %s4244_s3 = smov 113  }
  0x1d   : > { %v740_v3 = vld [vmem:[%s4395_s25 + $0x10] sm:$0xff]  ;;  %v741_v4 = vld [vmem:[%s4395_s25 + $0x18] sm:$0xff]  ;;  %v738_v5 = vld [vmem:[%s4395_s25] sm:$0xff] }
  0x1e   : > { %837 = vmatpush.msra.mxu0 %v740_v3  ;;  %878 = vmatpush.msra.mxu1 %v741_v4  ;;  %v739_v6 = vld [vmem:[%s4395_s25 + $0x8] sm:$0xff]  ;;  %v742_v7 = vld [vmem:[%s6555_s1] sm:$0xff]  ;;  %v753_v13 = vld [vmem:[%s6553_s6 + $0x18] sm:$0xff] }
  0x1f   : > { %v743_v10 = vld [vmem:[%s6555_s1 + $0x8] sm:$0xff]  ;;  %775 = vperm.xlu2 %4176, %v753_v13   ;;  %v744_v14 = vld [vmem:[%s6555_s1 + $0x10] sm:$0xff]  ;;  %v745_v17 = vld [vmem:[%s6555_s1 + $0x18] sm:$0xff] }
  0x20   : > { %838 = vmatpush.msra.mxu0 %v738_v5  ;;  %879 = vmatpush.msra.mxu1 %v739_v6  ;;  %v752_v15 = vld [vmem:[%s6553_s6 + $0x10] sm:$0xff]  ;;  %v2372_v18 = vld [vmem:[%s6556_s27 + $0x38] sm:$0xff]  ;;  %v2370_v19 = vld [vmem:[%s6556_s27 + $0x28] sm:$0xff]  ;;  %s6576_s6 = sld [smem:[#allocation13_spill]] }
  0x21   : > { %3905 = vmatmul.msk.f32.vlgmr.msra.gmra.mxu0 %vm798_vm0, %v742_v7  ;;  %3913 = vmatmul.msk.f32.vlgmr.msra.gmra.mxu1 %vm798_vm0, %v742_v7  ;;  %v2371_v16 = vld [vmem:[%s6556_s27 + $0x30] sm:$0xff]  ;;  %v746_v20 = vld [vmem:[%s6555_s1 + $0x20] sm:$0xff]  ;;  %v747_v22 = vld [vmem:[%s6555_s1 + $0x28] sm:$0xff] }
  0x22   : > { %v2369_v21 = vld [vmem:[%s6556_s27 + $0x20] sm:$0xff]  ;;  %v748_v23 = vld [vmem:[%s6555_s1 + $0x30] sm:$0xff]  ;;  %v749_v24 = vld [vmem:[%s6555_s1 + $0x38] sm:$0xff] }
  0x23   : > { %v913_v1 = vld [vmem:[%s6565_s29 + $0x40] sm:$0xff]  ;;  %v914_v3 = vld [vmem:[%s6565_s29 + $0x48] sm:$0xff]  ;;  %v915_v5 = vld [vmem:[%s6565_s29 + $0x50] sm:$0xff] }
  0x24   : > { %780 = vperm.xlu1 %4175, %v754_v8   ;;  %790 = vperm.xlu0 %4174, %v756_v9   ;;  %v905_v2 = vld [vmem:[%s6565_s29] sm:$0xff]  ;;  %v906_v4 = vld [vmem:[%s6565_s29 + $0x8] sm:$0xff]  ;;  %v907_v6 = vld [vmem:[%s6565_s29 + $0x10] sm:$0xff] }
  0x25   : > { %v916_v7 = vld [vmem:[%s6565_s29 + $0x58] sm:$0xff]  ;;  %v917_v9 = vld [vmem:[%s6565_s29 + $0x60] sm:$0xff]  ;;  %v919_v13 = vld [vmem:[%s6565_s29 + $0x70] sm:$0xff] }
  0x26   : > { %v908_v8 = vld [vmem:[%s6565_s29 + $0x18] sm:$0xff] }
  0x27   : > { %770 = vperm.xlu2 %4176, %v752_v15   ;;  %v920_v15 = vld [vmem:[%s6565_s29 + $0x78] sm:$0xff] }
  0x29   : > { %3906 = vmatmul.msk.f32.gmra.mxu0 %vm798_vm0, %v743_v10  ;;  %3914 = vmatmul.msk.f32.gmra.mxu1 %vm798_vm0, %v743_v10  ;;  %v909_v10 = vld [vmem:[%s6565_s29 + $0x20] sm:$0xff] }
  0x2c   : > { %760 = vperm.xlu1 %4175, %v750_v11   ;;  %765 = vperm.xlu0 %4174, %v751_v12   ;;  %v918_v11 = vld [vmem:[%s6565_s29 + $0x68] sm:$0xff] }
  0x2d   : > { %v910_v12 = vld [vmem:[%s6565_s29 + $0x28] sm:$0xff] }
  0x31   : > { %3907 = vmatmul.msk.f32.gmra.mxu0 %vm798_vm0, %v744_v14  ;;  %3915 = vmatmul.msk.f32.gmra.mxu1 %vm798_vm0, %v744_v14  ;;  %v911_v14 = vld [vmem:[%s6565_s29 + $0x30] sm:$0xff] }
  0x34   : > { %2405 = vperm.xlu0 %4174, %v2371_v16   ;;  %2410 = vperm.xlu1 %4175, %v2372_v18   ;;  %v912_v16 = vld [vmem:[%s6565_s29 + $0x38] sm:$0xff]  ;;  %v922_v18 = vld [vmem:[%s6565_s29 + $0x88] sm:$0xff] }
  0x39   : > { %3908 = vmatmul.msk.f32.gmra.mxu0 %vm798_vm0, %v745_v17  ;;  %3916 = vmatmul.msk.f32.gmra.mxu1 %vm798_vm0, %v745_v17  ;;  %v921_v17 = vld [vmem:[%s6565_s29 + $0x80] sm:$0xff] }
  0x3c   : > { %2400 = vperm.xlu0 %4174, %v2370_v19   ;;  %2395 = vperm.xlu1 %4175, %v2369_v21   ;;  %v923_v19 = vld [vmem:[%s6565_s29 + $0x90] sm:$0xff]  ;;  %v925_v21 = vld [vmem:[%s6565_s29 + $0xa0] sm:$0xff] }
  0x41   : > { %3909 = vmatmul.msk.f32.gmra.mxu0 %vm798_vm0, %v746_v20  ;;  %3917 = vmatmul.msk.f32.gmra.mxu1 %vm798_vm0, %v746_v20  ;;  %v924_v20 = vld [vmem:[%s6565_s29 + $0x98] sm:$0xff] }
  0x49   : > { %3910 = vmatmul.msk.f32.gmra.mxu0 %vm798_vm0, %v747_v22  ;;  %3918 = vmatmul.msk.f32.gmra.mxu1 %vm798_vm0, %v747_v22  ;;  %v926_v22 = vld [vmem:[%s6565_s29 + $0xa8] sm:$0xff] }
  0x51   : > { %3911 = vmatmul.msk.f32.gmra.mxu0 %vm798_vm0, %v748_v23  ;;  %3919 = vmatmul.msk.f32.gmra.mxu1 %vm798_vm0, %v748_v23  ;;  %v927_v23 = vld [vmem:[%s6565_s29 + $0xb0] sm:$0xff] }
  0x59   : > { %3912 = vmatmul.msk.f32.gmra.mxu0 %vm798_vm0, %v749_v24  ;;  %3920 = vmatmul.msk.f32.gmra.mxu1 %vm798_vm0, %v749_v24  ;;  %v928_v24 = vld [vmem:[%s6565_s29 + $0xb8] sm:$0xff] }
  0x79   : > { %v776_v41 = vpop.permute.xlu2 %775 }
  0x81   : > { %v771_v54 = vpop.permute.xlu2 %770 }
  0x8e   : > { %v796_v37 = vpop.permute.xlu0 %795  ;;  %v786_v40 = vpop.permute.xlu1 %785 }
  0x96   : > { %v791_v44 = vpop.permute.xlu0 %790  ;;  %v781_v47 = vpop.permute.xlu1 %780 }
  0x9e   : > { %v840_v25 = vpop.f32.mrf.mxu0  ;;  %v4471_v26 = vpop.f32.mrf.mxu1 }
  0x9f   : > { %v766_v57 = vpop.permute.xlu0 %765  ;;  %v761_v60 = vpop.permute.xlu1 %760 }
  0xa0   : > { %v4525_v63 = vadd.f32 %v840_v25, %v761_v60  ;;  %v4530_v0 = vadd.f32 %v4471_v26, %v761_v60  ;;  %v929_v26 = vld [vmem:[%s6565_s29 + $0xc0] sm:$0xff] }
  0xa6   : > { %v843_v27 = vpop.f32.mrf.mxu0  ;;  %v884_v28 = vpop.f32.mrf.mxu1 }
  0xa7   : > { %v4517_v61 = vadd.f32 %v843_v27, %v766_v57  ;;  %v4521_v62 = vadd.f32 %v884_v28, %v766_v57 }
  0xae   : > { %v846_v29 = vpop.f32.mrf.mxu0  ;;  %v887_v30 = vpop.f32.mrf.mxu1 }
  0xaf   : > { %v4509_v58 = vadd.f32 %v846_v29, %v771_v54  ;;  %v4513_v59 = vadd.f32 %v887_v30, %v771_v54  ;;  %v930_v30 = vld [vmem:[%s6565_s29 + $0xc8] sm:$0xff] }
  0xb6   : > { %v849_v31 = vpop.f32.mrf.mxu0  ;;  %v890_v32 = vpop.f32.mrf.mxu1 }
  0xb7   : > { %v4501_v55 = vadd.f32 %v849_v31, %v776_v41  ;;  %v4505_v56 = vadd.f32 %v890_v32, %v776_v41 }
  0xbe   : > { %v852_v33 = vpop.f32.mrf.mxu0  ;;  %v893_v34 = vpop.f32.mrf.mxu1 }
  0xbf   : > { %v4493_v52 = vadd.f32 %v852_v33, %v781_v47  ;;  %v4497_v53 = vadd.f32 %v893_v34, %v781_v47  ;;  %v933_v47 = vld [vmem:[%s6565_s29 + $0xe0] sm:$0xff] }
  0xc1   : > { %6563 = vst [vmem:[#allocation8_spill] sm:$0xff] %v4493_v52 }
  0xc2   : > { %6564 = vst [vmem:[#allocation9_spill] sm:$0xff] %v4497_v53 }
  0xc6   : > { %v855_v35 = vpop.f32.mrf.mxu0  ;;  %v896_v36 = vpop.f32.mrf.mxu1 }
  0xc7   : > { %v4485_v50 = vadd.f32 %v855_v35, %v786_v40  ;;  %v4489_v51 = vadd.f32 %v896_v36, %v786_v40  ;;  %v931_v35 = vld [vmem:[%s6565_s29 + $0xd0] sm:$0xff]  ;;  %v932_v40 = vld [vmem:[%s6565_s29 + $0xd8] sm:$0xff] }
  0xc9   : > { %6561 = vst [vmem:[#allocation6_spill] sm:$0xff] %v4485_v50 }
  0xca   : > { %6562 = vst [vmem:[#allocation7_spill] sm:$0xff] %v4489_v51 }
  0xce   : > { %v858_v38 = vpop.f32.mrf.mxu0  ;;  %v899_v39 = vpop.f32.mrf.mxu1 }
  0xcf   : > { %v4477_v48 = vadd.f32 %v858_v38, %v791_v44  ;;  %v4481_v49 = vadd.f32 %v899_v39, %v791_v44 }
  0xd1   : > { %6559 = vst [vmem:[#allocation4_spill] sm:$0xff] %v4477_v48 }
  0xd2   : > { %6560 = vst [vmem:[#allocation5_spill] sm:$0xff] %v4481_v49 }
  0xd6   : > { %v861_v42 = vpop.f32.mrf.mxu0  ;;  %v902_v43 = vpop.f32.mrf.mxu1 }
  0xd7   : > { %v4473_v45 = vadd.f32 %v861_v42, %v796_v37  ;;  %v4475_v46 = vadd.f32 %v902_v43, %v796_v37 }
  0xd9   : > { %6557 = vst [vmem:[#allocation2_spill] sm:$0xff] %v4473_v45  ;;  %1202 = vmatpush.msrb.mxu0 %v4473_v45  ;;  %4140 = vmatpush.msra.mxu2 %v4473_v45 }
  0xda   : > { %6558 = vst [vmem:[#allocation3_spill] sm:$0xff] %v4475_v46  ;;  %1435 = vmatpush.msrb.mxu1 %v4475_v46  ;;  %4148 = vmatpush.msra.mxu3 %v4475_v46 }
  0xdb   : > { %1203 = vmatpush.msrb.mxu0 %v4477_v48  ;;  %4141 = vmatpush.msra.mxu2 %v4477_v48 }
  0xdc   : > { %1436 = vmatpush.msrb.mxu1 %v4481_v49  ;;  %4149 = vmatpush.msra.mxu3 %v4481_v49 }
  0xdd   : > { %1204 = vmatpush.msrb.mxu0 %v4485_v50  ;;  %4142 = vmatpush.msra.mxu2 %v4485_v50 }
  0xde   : > { %1437 = vmatpush.msrb.mxu1 %v4489_v51  ;;  %4150 = vmatpush.msra.mxu3 %v4489_v51 }
  0xdf   : > { %1205 = vmatpush.msrb.mxu0 %v4493_v52  ;;  %4143 = vmatpush.msra.mxu2 %v4493_v52 }
  0xe0   : > { %1438 = vmatpush.msrb.mxu1 %v4497_v53  ;;  %4151 = vmatpush.msra.mxu3 %v4497_v53 }
  0xe1   : > { %1206 = vmatpush.msrb.mxu0 %v4501_v55  ;;  %4144 = vmatpush.msra.mxu2 %v4501_v55 }
  0xe2   : > { %1439 = vmatpush.msrb.mxu1 %v4505_v56  ;;  %4152 = vmatpush.msra.mxu3 %v4505_v56 }
  0xe3   : > { %1207 = vmatpush.msrb.mxu0 %v4509_v58  ;;  %4145 = vmatpush.msra.mxu2 %v4509_v58 }
  0xe4   : > { %1440 = vmatpush.msrb.mxu1 %v4513_v59  ;;  %4153 = vmatpush.msra.mxu3 %v4513_v59 }
  0xe5   : > { %1208 = vmatpush.msrb.mxu0 %v4517_v61  ;;  %4146 = vmatpush.msra.mxu2 %v4517_v61 }
  0xe6   : > { %1441 = vmatpush.msrb.mxu1 %v4521_v62  ;;  %4154 = vmatpush.msra.mxu3 %v4521_v62 }
  0xe7   : > { %1209 = vmatpush.msrb.mxu0 %v4525_v63  ;;  %4147 = vmatpush.msra.mxu2 %v4525_v63 }
  0xe8   : > { %1442 = vmatpush.msrb.mxu1 %v4530_v0  ;;  %4155 = vmatpush.msra.mxu3 %v4530_v0 }
  0xe9   : > { %3929 = vmatmul.msk.f32.vlgmr.msra.gmra.mxu2 %vm977_vm1, %v913_v1  ;;  %3993 = vmatmul.msk.f32.vlgmr.msrb.gmra.mxu1 %vm977_vm1, %v905_v2 }
  0xea   : > { %4001 = vmatmul.msk.f32.vlgmr.msra.gmra.mxu3 %vm977_vm1, %v913_v1  ;;  %3921 = vmatmul.msk.f32.vlgmr.msrb.gmra.mxu0 %vm977_vm1, %v905_v2  ;;  %v934_v1 = vld [vmem:[%s6565_s29 + $0xe8] sm:$0xff] }
  0xf1   : > { %3930 = vmatmul.msk.f32.gmra.mxu2 %vm977_vm1, %v914_v3  ;;  %3994 = vmatmul.msk.f32.gmra.mxu1 %vm977_vm1, %v906_v4 }
  0xf2   : > { %4002 = vmatmul.msk.f32.gmra.mxu3 %vm977_vm1, %v914_v3  ;;  %3922 = vmatmul.msk.f32.gmra.mxu0 %vm977_vm1, %v906_v4 }
  0xf9   : > { %3931 = vmatmul.msk.f32.gmra.mxu2 %vm977_vm1, %v915_v5  ;;  %3995 = vmatmul.msk.f32.gmra.mxu1 %vm977_vm1, %v907_v6 }
  0xfa   : > { %4003 = vmatmul.msk.f32.gmra.mxu3 %vm977_vm1, %v915_v5  ;;  %3923 = vmatmul.msk.f32.gmra.mxu0 %vm977_vm1, %v907_v6  ;;  %v935_v6 = vld [vmem:[%s6565_s29 + $0xf0] sm:$0xff] }
 0x101   : > { %3932 = vmatmul.msk.f32.gmra.mxu2 %vm977_vm1, %v916_v7  ;;  %3996 = vmatmul.msk.f32.gmra.mxu1 %vm977_vm1, %v908_v8 }
 0x102   : > { %4004 = vmatmul.msk.f32.gmra.mxu3 %vm977_vm1, %v916_v7  ;;  %3924 = vmatmul.msk.f32.gmra.mxu0 %vm977_vm1, %v908_v8 }
 0x109   : > { %3933 = vmatmul.msk.f32.gmra.mxu2 %vm977_vm1, %v917_v9  ;;  %3997 = vmatmul.msk.f32.gmra.mxu1 %vm977_vm1, %v909_v10 }
 0x10a   : > { %4005 = vmatmul.msk.f32.gmra.mxu3 %vm977_vm1, %v917_v9  ;;  %3925 = vmatmul.msk.f32.gmra.mxu0 %vm977_vm1, %v909_v10 }
 0x111   : > { %3934 = vmatmul.msk.f32.gmra.mxu2 %vm977_vm1, %v918_v11  ;;  %3998 = vmatmul.msk.f32.gmra.mxu1 %vm977_vm1, %v910_v12 }
 0x112   : > { %4006 = vmatmul.msk.f32.gmra.mxu3 %vm977_vm1, %v918_v11  ;;  %3926 = vmatmul.msk.f32.gmra.mxu0 %vm977_vm1, %v910_v12  ;;  %v936_v11 = vld [vmem:[%s6565_s29 + $0xf8] sm:$0xff] }
 0x119   : > { %3935 = vmatmul.msk.f32.gmra.mxu2 %vm977_vm1, %v919_v13  ;;  %3999 = vmatmul.msk.f32.gmra.mxu1 %vm977_vm1, %v911_v14 }
 0x11a   : > { %4007 = vmatmul.msk.f32.gmra.mxu3 %vm977_vm1, %v919_v13  ;;  %3927 = vmatmul.msk.f32.gmra.mxu0 %vm977_vm1, %v911_v14 }
 0x121   : > { %3936 = vmatmul.msk.f32.gmra.mxu2 %vm977_vm1, %v920_v15  ;;  %4000 = vmatmul.msk.f32.gmra.mxu1 %vm977_vm1, %v912_v16 }
 0x122   : > { %4008 = vmatmul.msk.f32.gmra.mxu3 %vm977_vm1, %v920_v15  ;;  %3928 = vmatmul.msk.f32.gmra.mxu0 %vm977_vm1, %v912_v16  ;;  %v937_v16 = vld [vmem:[%s6565_s29 + $0x100] sm:$0xff] }
 0x129   : > { %3937 = vmatmul.msk.f32.gmra.mxu2 %vm977_vm1, %v921_v17 }
 0x12a   : > { %4009 = vmatmul.msk.f32.gmra.mxu3 %vm977_vm1, %v921_v17 }
 0x131   : > { %3938 = vmatmul.msk.f32.gmra.mxu2 %vm977_vm1, %v922_v18 }
 0x132   : > { %4010 = vmatmul.msk.f32.gmra.mxu3 %vm977_vm1, %v922_v18 }
 0x139   : > { %3939 = vmatmul.msk.f32.gmra.mxu2 %vm977_vm1, %v923_v19 }
 0x13a   : > { %4011 = vmatmul.msk.f32.gmra.mxu3 %vm977_vm1, %v923_v19  ;;  %v938_v19 = vld [vmem:[%s6565_s29 + $0x108] sm:$0xff] }
 0x141   : > { %3940 = vmatmul.msk.f32.gmra.mxu2 %vm977_vm1, %v924_v20 }
 0x142   : > { %4012 = vmatmul.msk.f32.gmra.mxu3 %vm977_vm1, %v924_v20 }
 0x149   : > { %3941 = vmatmul.msk.f32.gmra.mxu2 %vm977_vm1, %v925_v21 }
 0x14a   : > { %4013 = vmatmul.msk.f32.gmra.mxu3 %vm977_vm1, %v925_v21 }
 0x151   : > { %3942 = vmatmul.msk.f32.gmra.mxu2 %vm977_vm1, %v926_v22 }
 0x152   : > { %4014 = vmatmul.msk.f32.gmra.mxu3 %vm977_vm1, %v926_v22  ;;  %v939_v22 = vld [vmem:[%s6565_s29 + $0x110] sm:$0xff] }
 0x159   : > { %3943 = vmatmul.msk.f32.gmra.mxu2 %vm977_vm1, %v927_v23 }
 0x15a   : > { %4015 = vmatmul.msk.f32.gmra.mxu3 %vm977_vm1, %v927_v23 }
 0x161   : > { %3944 = vmatmul.msk.f32.gmra.mxu2 %vm977_vm1, %v928_v24 }
 0x162   : > { %4016 = vmatmul.msk.f32.gmra.mxu3 %vm977_vm1, %v928_v24 }
 0x166   : > { %v1444_v25 = vpop.f32.mrf.mxu1 }
 0x167   : > { %1676 = vrot.lane.b32.xlu2 %v1444_v25, %s4239_s7  ;;  %v1211_v27 = vpop.f32.mrf.mxu0  ;;  %v940_v25 = vld [vmem:[%s6565_s29 + $0x118] sm:$0xff] }
 0x168   : > { %1660 = vrot.lane.b32.xlu1 %v1211_v27, %s4239_s7 }
 0x169   : > { %3945 = vmatmul.msk.f32.gmra.mxu2 %vm977_vm1, %v929_v26 }
 0x16a   : > { %4017 = vmatmul.msk.f32.gmra.mxu3 %vm977_vm1, %v929_v26 }
 0x16c   : > { %v1235_v28 = vpop.f32.mrf.mxu2 }
 0x16d   : > { %v1468_v29 = vpop.f32.mrf.mxu3 }
 0x16e   : > { %1765 = vrot.lane.b32.xlu0 %v1468_v29, %s4240_s30  ;;  %v1447_v31 = vpop.f32.mrf.mxu1 }
 0x16f   : > { %1749 = vrot.lane.b32.xlu2 %v1235_v28, %s4240_s30  ;;  %v1214_v32 = vpop.f32.mrf.mxu0 }
 0x171   : > { %3946 = vmatmul.msk.f32.gmra.mxu2 %vm977_vm1, %v930_v30 }
 0x172   : > { %4018 = vmatmul.msk.f32.gmra.mxu3 %vm977_vm1, %v930_v30  ;;  %v941_v30 = vld [vmem:[%s6565_s29 + $0x120] sm:$0xff] }
 0x174   : > { %v1238_v33 = vpop.f32.mrf.mxu2 }
 0x175   : > { %v1471_v34 = vpop.f32.mrf.mxu3 }
 0x176   : > { %1678 = vrot.lane.b32.xlu0 %v1447_v31, %s4239_s7  ;;  %1767 = vrot.lane.b32.xlu1 %v1471_v34, %s4240_s30  ;;  %v1450_v36 = vpop.f32.mrf.mxu1 }
 0x177   : > { %1662 = vrot.lane.b32.xlu2 %v1214_v32, %s4239_s7  ;;  %v1217_v37 = vpop.f32.mrf.mxu0  ;;  %v4763_v32 = vpop.permute.xlu1 %2410 }
 0x179   : > { %3947 = vmatmul.msk.f32.gmra.mxu2 %vm977_vm1, %v931_v35 }
 0x17a   : > { %4019 = vmatmul.msk.f32.gmra.mxu3 %vm977_vm1, %v931_v35  ;;  %v4765_v35 = vpop.permute.xlu0 %2405 }
 0x17c   : > { %v1241_v38 = vpop.f32.mrf.mxu2 }
 0x17d   : > { %v1474_v39 = vpop.f32.mrf.mxu3 }
 0x17e   : > { %1751 = vrot.lane.b32.xlu0 %v1238_v33, %s4240_s30  ;;  %1753 = vrot.lane.b32.xlu1 %v1241_v38, %s4240_s30  ;;  %v1453_v41 = vpop.f32.mrf.mxu1 }
 0x17f   : > { %1664 = vrot.lane.b32.xlu2 %v1217_v37, %s4239_s7  ;;  %v1220_v42 = vpop.f32.mrf.mxu0 }
 0x181   : > { %3948 = vmatmul.msk.f32.gmra.mxu2 %vm977_vm1, %v932_v40 }
 0x182   : > { %4020 = vmatmul.msk.f32.gmra.mxu3 %vm977_vm1, %v932_v40  ;;  %v4777_v40 = vpop.permute.xlu1 %2395 }
 0x184   : > { %v1244_v43 = vpop.f32.mrf.mxu2 }
 0x185   : > { %v1477_v44 = vpop.f32.mrf.mxu3 }
 0x186   : > { %1680 = vrot.lane.b32.xlu0 %v1450_v36, %s4239_s7  ;;  %1666 = vrot.lane.b32.xlu1 %v1220_v42, %s4239_s7  ;;  %v1456_v54 = vpop.f32.mrf.mxu1  ;;  %v942_v36 = vld [vmem:[%s6565_s29 + $0x128] sm:$0xff]  ;;  %v4785_v42 = vpop.permute.xlu0 %2400 }
 0x187   : > { %1769 = vrot.lane.b32.xlu2 %v1474_v39, %s4240_s30  ;;  %v1223_v2 = vpop.f32.mrf.mxu0 }
 0x189   : > { %3949 = vmatmul.msk.f32.gmra.mxu2 %vm977_vm1, %v933_v47 }
 0x18a   : > { %4021 = vmatmul.msk.f32.gmra.mxu3 %vm977_vm1, %v933_v47 }
 0x18c   : > { %v1247_v57 = vpop.f32.mrf.mxu2 }
 0x18d   : > { %v1480_v60 = vpop.f32.mrf.mxu3 }
 0x18e   : > { %1684 = vrot.lane.b32.xlu0 %v1456_v54, %s4239_s7  ;;  %1755 = vrot.lane.b32.xlu1 %v1244_v43, %s4240_s30  ;;  %v1459_v3 = vpop.f32.mrf.mxu1 }
 0x18f   : > { %1682 = vrot.lane.b32.xlu2 %v1453_v41, %s4239_s7  ;;  %v1226_v7 = vpop.f32.mrf.mxu0  ;;  %v943_v41 = vld [vmem:[%s6565_s29 + $0x130] sm:$0xff] }
 0x191   : > { %3950 = vmatmul.msk.f32.gmra.mxu2 %vm977_vm1, %v934_v1 }
 0x192   : > { %4022 = vmatmul.msk.f32.gmra.mxu3 %vm977_vm1, %v934_v1 }
 0x194   : > { %v1250_v4 = vpop.f32.mrf.mxu2 }
 0x195   : > { %v1483_v5 = vpop.f32.mrf.mxu3 }
 0x196   : > { %1757 = vrot.lane.b32.xlu0 %v1247_v57, %s4240_s30  ;;  %1773 = vrot.lane.b32.xlu1 %v1480_v60, %s4240_s30  ;;  %v1462_v8 = vpop.f32.mrf.mxu1  ;;  %v944_v57 = vld [vmem:[%s6565_s29 + $0x138] sm:$0xff] }
 0x197   : > { %1771 = vrot.lane.b32.xlu2 %v1477_v44, %s4240_s30  ;;  %v1229_v12 = vpop.f32.mrf.mxu0 }
 0x199   : > { %3951 = vmatmul.msk.f32.gmra.mxu2 %vm977_vm1, %v935_v6 }
 0x19a   : > { %4023 = vmatmul.msk.f32.gmra.mxu3 %vm977_vm1, %v935_v6 }
 0x19c   : > { %v1253_v9 = vpop.f32.mrf.mxu2 }
 0x19d   : > { %v1486_v10 = vpop.f32.mrf.mxu3 }
 0x19e   : > { %1686 = vrot.lane.b32.xlu0 %v1459_v3, %s4239_s7  ;;  %1759 = vrot.lane.b32.xlu1 %v1250_v4, %s4240_s30  ;;  %v1465_v13 = vpop.f32.mrf.mxu1  ;;  %v945_v4 = vld [vmem:[%s6565_s29 + $0x140] sm:$0xff] }
 0x19f   : > { %1668 = vrot.lane.b32.xlu2 %v1223_v2, %s4239_s7  ;;  %v1232_v28 = vpop.f32.mrf.mxu0 }
 0x1a1   : > { %3952 = vmatmul.msk.f32.gmra.mxu2 %vm977_vm1, %v936_v11 }
 0x1a2   : > { %4024 = vmatmul.msk.f32.gmra.mxu3 %vm977_vm1, %v936_v11 }
 0x1a4   : > { %v1256_v14 = vpop.f32.mrf.mxu2 }
 0x1a5   : > { %v1489_v15 = vpop.f32.mrf.mxu3 }
 0x1a6   : > { %1690 = vrot.lane.b32.xlu0 %v1465_v13, %s4239_s7  ;;  %1672 = vrot.lane.b32.xlu1 %v1229_v12, %s4239_s7 }
 0x1a7   : > { %1670 = vrot.lane.b32.xlu2 %v1226_v7, %s4239_s7 }
 0x1a9   : > { %3953 = vmatmul.msk.f32.gmra.mxu2 %vm977_vm1, %v937_v16 }
 0x1aa   : > { %4025 = vmatmul.msk.f32.gmra.mxu3 %vm977_vm1, %v937_v16  ;;  %v947_v16 = vld [vmem:[%s6565_s29 + $0x150] sm:$0xff] }
 0x1ac   : > { %v1259_v17 = vpop.f32.mrf.mxu2 }
 0x1ad   : > { %v1492_v18 = vpop.f32.mrf.mxu3 }
 0x1ae   : > { %1763 = vrot.lane.b32.xlu0 %v1256_v14, %s4240_s30  ;;  %1761 = vrot.lane.b32.xlu1 %v1253_v9, %s4240_s30 }
 0x1af   : > { %1775 = vrot.lane.b32.xlu2 %v1483_v5, %s4240_s30 }
 0x1b1   : > { %3954 = vmatmul.msk.f32.gmra.mxu2 %vm977_vm1, %v938_v19 }
 0x1b2   : > { %4026 = vmatmul.msk.f32.gmra.mxu3 %vm977_vm1, %v938_v19 }
 0x1b4   : > { %v1262_v20 = vpop.f32.mrf.mxu2 }
 0x1b5   : > { %v1495_v21 = vpop.f32.mrf.mxu3 }
 0x1b6   : > { %1779 = vrot.lane.b32.xlu1 %v1489_v15, %s4240_s30 }
 0x1b7   : > { %1688 = vrot.lane.b32.xlu2 %v1462_v8, %s4239_s7 }
 0x1b9   : > { %3955 = vmatmul.msk.f32.gmra.mxu2 %vm977_vm1, %v939_v22 }
 0x1ba   : > { %4027 = vmatmul.msk.f32.gmra.mxu3 %vm977_vm1, %v939_v22  ;;  %v948_v22 = vld [vmem:[%s6565_s29 + $0x158] sm:$0xff] }
 0x1bc   : > { %v1265_v23 = vpop.f32.mrf.mxu2 }
 0x1bd   : > { %v1498_v24 = vpop.f32.mrf.mxu3 }
 0x1be   : > { %1857 = vrot.lane.b32.xlu0 %v1498_v24, %s4241_s4  ;;  %1837 = vrot.lane.b32.xlu1 %v1259_v17, %s4241_s4 }
 0x1bf   : > { %1777 = vrot.lane.b32.xlu2 %v1486_v10, %s4240_s30  ;;  %v946_v10 = vld [vmem:[%s6565_s29 + $0x148] sm:$0xff]  ;;  %s6585_s30 = sshll.u32 %s6587_s26, 5 }
 0x1c1   : > { %v4749_v26 = vpop.permute.xlu2 %1676  ;;  %3956 = vmatmul.msk.f32.gmra.mxu2 %vm977_vm1, %v940_v25 }
 0x1c2   : > { %4028 = vmatmul.msk.f32.gmra.mxu3 %vm977_vm1, %v940_v25 }
 0x1c4   : > { %v1268_v27 = vpop.f32.mrf.mxu2 }
 0x1c5   : > { %v1501_v29 = vpop.f32.mrf.mxu3 }
 0x1c6   : > { %1843 = vrot.lane.b32.xlu0 %v1268_v27, %s4241_s4  ;;  %1839 = vrot.lane.b32.xlu1 %v1262_v20, %s4241_s4 }
 0x1c7   : > { %1674 = vrot.lane.b32.xlu2 %v1232_v28, %s4239_s7  ;;  %s4247_s7 = smov 120  }
 0x1c9   : > { %v4759_v31 = vpop.permute.xlu2 %1749  ;;  %3957 = vmatmul.msk.f32.gmra.mxu2 %vm977_vm1, %v941_v30 }
 0x1ca   : > { %4029 = vmatmul.msk.f32.gmra.mxu3 %vm977_vm1, %v941_v30 }
 0x1cc   : > { %v1271_v33 = vpop.f32.mrf.mxu2 }
 0x1cd   : > { %v1504_v34 = vpop.f32.mrf.mxu3 }
 0x1ce   : > { %1845 = vrot.lane.b32.xlu0 %v1271_v33, %s4241_s4  ;;  %1859 = vrot.lane.b32.xlu1 %v1501_v29, %s4241_s4  ;;  %v949_v33 = vld [vmem:[%s6565_s29 + $0x160] sm:$0xff] }
 0x1cf   : > { %1853 = vrot.lane.b32.xlu2 %v1492_v18, %s4241_s4 }
 0x1d1   : > { %3958 = vmatmul.msk.f32.gmra.mxu2 %vm977_vm1, %v942_v36  ;;  %v4774_v37 = vpop.permute.xlu2 %1662 }
 0x1d2   : > { %4030 = vmatmul.msk.f32.gmra.mxu3 %vm977_vm1, %v942_v36 }
 0x1d4   : > { %v1274_v38 = vpop.f32.mrf.mxu2 }
 0x1d5   : > { %v1507_v39 = vpop.f32.mrf.mxu3 }
 0x1d6   : > { %1863 = vrot.lane.b32.xlu0 %v1507_v39, %s4241_s4  ;;  %1861 = vrot.lane.b32.xlu1 %v1504_v34, %s4241_s4 }
 0x1d7   : > { %1855 = vrot.lane.b32.xlu2 %v1495_v21, %s4241_s4 }
 0x1d9   : > { %3959 = vmatmul.msk.f32.gmra.mxu2 %vm977_vm1, %v943_v41  ;;  %v4788_v43 = vpop.permute.xlu2 %1664 }
 0x1da   : > { %4031 = vmatmul.msk.f32.gmra.mxu3 %vm977_vm1, %v943_v41  ;;  %v4793_v54 = vpop.permute.xlu1 %1660 }
 0x1dc   : > { %v1277_v44 = vpop.f32.mrf.mxu2 }
 0x1dd   : > { %v1510_v47 = vpop.f32.mrf.mxu3 }
 0x1de   : > { %1849 = vrot.lane.b32.xlu0 %v1277_v44, %s4241_s4  ;;  %1865 = vrot.lane.b32.xlu1 %v1510_v47, %s4241_s4 }
 0x1df   : > { %1841 = vrot.lane.b32.xlu2 %v1265_v23, %s4241_s4  ;;  %v1692_v23 = vlaneseq }
 0x1e0   : > { %v4799_v60 = vpop.permute.xlu0 %1765 }
 0x1e1   : > { %3960 = vmatmul.msk.f32.gmra.mxu2 %vm977_vm1, %v944_v57  ;;  %v4802_v1 = vpop.permute.xlu2 %1769  ;;  %v4856_v28 = vand.u32 127, %v1692_v23 }
 0x1e2   : > { %4032 = vmatmul.msk.f32.gmra.mxu3 %vm977_vm1, %v944_v57  ;;  %v950_v57 = vld [vmem:[%s6565_s29 + $0x168] sm:$0xff] }
 0x1e3   : > { %vm1781_vm2 = vcmp.lt.s32.totalorder %v4856_v28, 16  ;;  %vm1694_vm3 = vcmp.lt.s32.totalorder %v4856_v28, 17  ;;  %vm1869_vm4 = vcmp.lt.s32.totalorder %v4856_v28, 15  ;;  %vm1957_vm5 = vcmp.lt.s32.totalorder %v4856_v28, 1 }
 0x1e4   : > { %v1280_v2 = vpop.f32.mrf.mxu2  ;;  %vm2045_vm6 = vcmp.lt.s32.totalorder %v4856_v28, 127  ;;  %vm2133_vm7 = vcmp.lt.s32.totalorder %v4856_v28, 113  ;;  %vm2221_vm8 = vcmp.lt.s32.totalorder %v4856_v28, 112  ;;  %vm2309_vm9 = vcmp.lt.s32.totalorder %v4856_v28, 111 }
 0x1e5   : > { %v1513_v3 = vpop.f32.mrf.mxu3 }
 0x1e6   : > { %1851 = vrot.lane.b32.xlu0 %v1280_v2, %s4241_s4  ;;  %1867 = vrot.lane.b32.xlu1 %v1513_v3, %s4241_s4 }
 0x1e7   : > { %1847 = vrot.lane.b32.xlu2 %v1274_v38, %s4241_s4  ;;  %s4243_s4 = smov 127  }
 0x1e8   : > { %v4811_v5 = vpop.permute.xlu0 %1678  ;;  %v4813_v6 = vpop.permute.xlu1 %1767 }
 0x1e9   : > { %3961 = vmatmul.msk.f32.gmra.mxu2 %vm977_vm1, %v945_v4  ;;  %v4816_v7 = vpop.permute.xlu2 %1682 }
 0x1ea   : > { %4033 = vmatmul.msk.f32.gmra.mxu3 %vm977_vm1, %v945_v4 }
 0x1ec   : > { %v1283_v8 = vpop.f32.mrf.mxu2 }
 0x1ed   : > { %v1516_v9 = vpop.f32.mrf.mxu3 }
 0x1ee   : > { %1941 = vrot.lane.b32.xlu0 %v1516_v9, %s4242_s8 }
 0x1ef   : > { %1925 = vrot.lane.b32.xlu2 %v1283_v8, %s4242_s8 }
 0x1f0   : > { %v4824_v11 = vpop.permute.xlu0 %1751  ;;  %v4826_v12 = vpop.permute.xlu1 %1753 }
 0x1f1   : > { %3962 = vmatmul.msk.f32.gmra.mxu2 %vm977_vm1, %v946_v10  ;;  %v4829_v13 = vpop.permute.xlu2 %1771 }
 0x1f2   : > { %4034 = vmatmul.msk.f32.gmra.mxu3 %vm977_vm1, %v946_v10 }
 0x1f4   : > { %v1286_v14 = vpop.f32.mrf.mxu2 }
 0x1f5   : > { %v1519_v15 = vpop.f32.mrf.mxu3 }
 0x1f6   : > { %1927 = vrot.lane.b32.xlu0 %v1286_v14, %s4242_s8  ;;  %1943 = vrot.lane.b32.xlu1 %v1519_v15, %s4242_s8 }
 0x1f8   : > { %v4837_v17 = vpop.permute.xlu0 %1680  ;;  %v4839_v18 = vpop.permute.xlu1 %1666 }
 0x1f9   : > { %3963 = vmatmul.msk.f32.gmra.mxu2 %vm977_vm1, %v947_v16  ;;  %v4842_v19 = vpop.permute.xlu2 %1668 }
 0x1fa   : > { %4035 = vmatmul.msk.f32.gmra.mxu3 %vm977_vm1, %v947_v16 }
 0x1fc   : > { %v1289_v20 = vpop.f32.mrf.mxu2 }
 0x1fd   : > { %v1522_v21 = vpop.f32.mrf.mxu3 }
 0x1fe   : > { %1929 = vrot.lane.b32.xlu0 %v1289_v20, %s4242_s8  ;;  %1945 = vrot.lane.b32.xlu1 %v1522_v21, %s4242_s8  ;;  %v951_v20 = vld [vmem:[%s6565_s29 + $0x170] sm:$0xff] }
 0x200   : > { %v4850_v24 = vpop.permute.xlu0 %1684  ;;  %v4852_v25 = vpop.permute.xlu1 %1755 }
 0x201   : > { %3964 = vmatmul.msk.f32.gmra.mxu2 %vm977_vm1, %v948_v22  ;;  %v1671_v27 = vpop.permute.xlu2 %1670 }
 0x202   : > { %4036 = vmatmul.msk.f32.gmra.mxu3 %vm977_vm1, %v948_v22 }
 0x204   : > { %v1292_v29 = vpop.f32.mrf.mxu2 }
 0x205   : > { %v1525_v30 = vpop.f32.mrf.mxu3 }
 0x206   : > { %1931 = vrot.lane.b32.xlu1 %v1292_v29, %s4242_s8  ;;  %1947 = vrot.lane.b32.xlu2 %v1525_v30, %s4242_s8 }
 0x208   : > { %v1758_v34 = vpop.permute.xlu0 %1757  ;;  %v1774_v36 = vpop.permute.xlu1 %1773 }
 0x209   : > { %v4866_v38 = vsel %vm1781_vm2, %v1758_v34, %v1774_v36  ;;  %v4870_v39 = vsel %vm1781_vm2, %v1774_v36, %v1758_v34  ;;  %3965 = vmatmul.msk.f32.gmra.mxu2 %vm977_vm1, %v949_v33  ;;  %v1776_v41 = vpop.permute.xlu2 %1775  ;;  %v952_v34 = vld [vmem:[%s6565_s29 + $0x178] sm:$0xff] }
 0x20a   : > { %4037 = vmatmul.msk.f32.gmra.mxu3 %vm977_vm1, %v949_v33 }
 0x20c   : > { %v1295_v44 = vpop.f32.mrf.mxu2 }
 0x20d   : > { %v1528_v47 = vpop.f32.mrf.mxu3 }
 0x20e   : > { %1949 = vrot.lane.b32.xlu0 %v1528_v47, %s4242_s8  ;;  %1933 = vrot.lane.b32.xlu2 %v1295_v44, %s4242_s8 }
 0x210   : > { %v1687_v2 = vpop.permute.xlu0 %1686  ;;  %v1760_v3 = vpop.permute.xlu1 %1759 }
 0x211   : > { %v4882_v4 = vsel %vm1694_vm3, %v1671_v27, %v1687_v2  ;;  %v4886_v8 = vsel %vm1694_vm3, %v1687_v2, %v1671_v27  ;;  %v4890_v9 = vsel %vm1781_vm2, %v1760_v3, %v1776_v41  ;;  %v4894_v10 = vsel %vm1781_vm2, %v1776_v41, %v1760_v3  ;;  %3966 = vmatmul.msk.f32.gmra.mxu2 %vm977_vm1, %v950_v57  ;;  %v1689_v14 = vpop.permute.xlu2 %1688  ;;  %v1711_v3 = vld [vmem:[%s6566_s23] sm:$0x3] }
 0x212   : > { %4038 = vmatmul.msk.f32.gmra.mxu3 %vm977_vm1, %v950_v57 }
 0x214   : > { %v1298_v15 = vpop.f32.mrf.mxu2 }
 0x215   : > { %v1531_v16 = vpop.f32.mrf.mxu3 }
 0x216   : > { %1951 = vrot.lane.b32.xlu0 %v1531_v16, %s4242_s8  ;;  %1935 = vrot.lane.b32.xlu2 %v1298_v15, %s4242_s8  ;;  %v4939_v16 = vperm.slane %v1711_v3, 0 }
 0x218   : > { %v1673_v21 = vpop.permute.xlu1 %1672  ;;  %v1691_v33 = vpop.permute.xlu0 %1690 }
 0x219   : > { %v4905_v22 = vsel %vm1694_vm3, %v1673_v21, %v1689_v14  ;;  %v4909_v23 = vsel %vm1694_vm3, %v1689_v14, %v1673_v21  ;;  %3967 = vmatmul.msk.f32.gmra.mxu2 %vm977_vm1, %v951_v20  ;;  %v1778_v27 = vpop.permute.xlu2 %1777  ;;  %v953_v21 = vld [vmem:[%s6565_s29 + $0x180] sm:$0xff] }
 0x21a   : > { %4039 = vmatmul.msk.f32.gmra.mxu3 %vm977_vm1, %v951_v20  ;;  %v4941_v20 = vperm.slane %v1711_v3, 1 }
 0x21c   : > { %v1301_v29 = vpop.f32.mrf.mxu2 }
 0x21d   : > { %v1534_v30 = vpop.f32.mrf.mxu3  ;;  %1937 = vrot.lane.b32.xlu1 %v1301_v29, %s4242_s8  ;;  %v1703_v29 = vsel %vm1694_vm3, %v4749_v26, %v4793_v54 }
 0x21e   : > { %1953 = vrot.lane.b32.xlu2 %v1534_v30, %s4242_s8 }
 0x220   : > { %v1762_v36 = vpop.permute.xlu1 %1761  ;;  %v1764_v30 = vpop.permute.xlu0 %1763 }
 0x221   : > { %v4920_v41 = vsel %vm1781_vm2, %v1762_v36, %v1778_v27  ;;  %v4924_v44 = vsel %vm1781_vm2, %v1778_v27, %v1762_v36  ;;  %3968 = vmatmul.msk.f32.gmra.mxu2 %vm977_vm1, %v952_v34  ;;  %v1675_v47 = vpop.permute.xlu2 %1674  ;;  %v1695_v27 = vsel %vm1694_vm3, %v4793_v54, %v4749_v26  ;;  %v1717_v26 = vmul.f32 %v4939_v16, %v1703_v29 }
 0x222   : > { %4040 = vmatmul.msk.f32.gmra.mxu3 %vm977_vm1, %v952_v34  ;;  %v4930_v57 = vsel %vm1694_vm3, %v1675_v47, %v1691_v33  ;;  %v4934_v2 = vsel %vm1694_vm3, %v1691_v33, %v1675_v47  ;;  %v4065_v34 = vld [vmem:[%s6566_s23 + $0x2] sm:$0x3]  ;;  %v1718_v54 = vmul.f32 %v4941_v20, %v1695_v27  ;;  %v1696_v27 = vsel %vm1694_vm3, %v4774_v37, %v4811_v5 }
 0x223   : > { %v4976_v46 = vperm.slane %v4065_v34, 1  ;;  %v1704_v29 = vsel %vm1694_vm3, %v4811_v5, %v4774_v37 }
 0x224   : > { %v1304_v14 = vpop.f32.mrf.mxu2 }
 0x225   : > { %v1537_v15 = vpop.f32.mrf.mxu3 }
 0x226   : > { %1955 = vrot.lane.b32.xlu0 %v1537_v15, %s4242_s8  ;;  %1939 = vrot.lane.b32.xlu2 %v1304_v14, %s4242_s8  ;;  %v4066_v14 = vld [vmem:[%s6566_s23 + $0x4] sm:$0x3]  ;;  %v4974_v15 = vperm.slane %v4065_v34, 0  ;;  %s6577_s8 = sld [smem:[#allocation14_spill]] }
 0x227   : > { %v4995_v48 = vperm.slane %v4066_v14, 0  ;;  %v4997_v51 = vperm.slane %v4066_v14, 1  ;;  %v1720_v14 = vmul.f32 %v4941_v20, %v1696_v27  ;;  %v1705_v27 = vsel %vm1694_vm3, %v4837_v17, %v4788_v43 }
 0x228   : > { %v1780_v33 = vpop.permute.xlu1 %1779 }
 0x229   : > { %v4961_v36 = vsel %vm1781_vm2, %v1764_v30, %v1780_v33  ;;  %v4965_v47 = vsel %vm1781_vm2, %v1780_v33, %v1764_v30  ;;  %3969 = vmatmul.msk.f32.gmra.mxu2 %vm977_vm1, %v953_v21  ;;  %v1854_v3 = vpop.permute.xlu2 %1853  ;;  %v1782_v30 = vsel %vm1781_vm2, %v4759_v31, %v4799_v60 }
 0x22a   : > { %4041 = vmatmul.msk.f32.gmra.mxu3 %vm977_vm1, %v953_v21  ;;  %v1790_v21 = vsel %vm1781_vm2, %v4799_v60, %v4759_v31  ;;  %v954_v31 = vld [vmem:[%s6565_s29 + $0x188] sm:$0xff]  ;;  %v1806_v50 = vmul.f32 %v4976_v46, %v1782_v30 }
 0x22b   : > { %v1805_v60 = vmul.f32 %v4974_v15, %v1790_v21 }
 0x22c   : > { %v1307_v33 = vpop.f32.mrf.mxu2 }
 0x22d   : > { %v1540_v34 = vpop.f32.mrf.mxu3  ;;  %v1733_v45 = vadd.f32 %v1717_v26, %v1307_v33 }
 0x22e   : > { %v1734_v49 = vadd.f32 %v1718_v54, %v1540_v34  ;;  %v1719_v54 = vmul.f32 %v4939_v16, %v1704_v29 }
 0x22f   : > { %v1821_v33 = vadd.f32 %v1805_v60, %v1733_v45 }
 0x230   : > { %v1858_v53 = vpop.permute.xlu0 %1857  ;;  %v1838_v52 = vpop.permute.xlu1 %1837  ;;  %v1822_v34 = vadd.f32 %v1806_v50, %v1734_v49  ;;  %v1697_v50 = vsel %vm1694_vm3, %v4788_v43, %v4837_v17  ;;  %v1721_v43 = vmul.f32 %v4939_v16, %v1705_v27 }
 0x231   : > { %v1870_v37 = vsel %vm1869_vm4, %v1838_v52, %v1854_v3  ;;  %v1878_v5 = vsel %vm1869_vm4, %v1854_v3, %v1838_v52  ;;  %3970 = vmatmul.msk.f32.gmra.mxu2 %vm977_vm1, %v954_v31  ;;  %v1856_v26 = vpop.permute.xlu2 %1855  ;;  %v1783_v52 = vsel %vm1781_vm2, %v4824_v11, %v4813_v6  ;;  %v1791_v3 = vsel %vm1781_vm2, %v4813_v6, %v4824_v11  ;;  %v955_v6 = vld [vmem:[%s6565_s29 + $0x190] sm:$0xff] }
 0x232   : > { %v1893_v21 = vmul.f32 %v4995_v48, %v1878_v5  ;;  %v1894_v30 = vmul.f32 %v4997_v51, %v1870_v37  ;;  %4042 = vmatmul.msk.f32.gmra.mxu3 %vm977_vm1, %v954_v31  ;;  %v1807_v11 = vmul.f32 %v4974_v15, %v1791_v3  ;;  %v1808_v5 = vmul.f32 %v4976_v46, %v1783_v52 }
 0x233   : > { %v1722_v17 = vmul.f32 %v4941_v20, %v1697_v50 }
 0x234   : > { %v5022_v29 = vadd.f32 %v1893_v21, %v1821_v33  ;;  %v5024_v45 = vadd.f32 %v1894_v30, %v1822_v34  ;;  %v1310_v49 = vpop.f32.mrf.mxu2  ;;  %v1792_v33 = vsel %vm1781_vm2, %v4802_v1, %v4826_v12 }
 0x235   : > { %v1735_v31 = vadd.f32 %v1719_v54, %v1310_v49  ;;  %v1543_v60 = vpop.f32.mrf.mxu3 }
 0x236   : > { %v1736_v37 = vadd.f32 %v1720_v14, %v1543_v60 }
 0x237   : > { %v1823_v54 = vadd.f32 %v1807_v11, %v1735_v31 }
 0x238   : > { %v1844_v34 = vpop.permute.xlu0 %1843  ;;  %v1840_v21 = vpop.permute.xlu1 %1839  ;;  %v1824_v14 = vadd.f32 %v1808_v5, %v1736_v37  ;;  %v1809_v5 = vmul.f32 %v4974_v15, %v1792_v33 }
 0x239   : > { %v1871_v30 = vsel %vm1869_vm4, %v1840_v21, %v1856_v26  ;;  %v1879_v3 = vsel %vm1869_vm4, %v1856_v26, %v1840_v21  ;;  %3971 = vmatmul.msk.f32.gmra.mxu2 %vm977_vm1, %v955_v6  ;;  %v1842_v52 = vpop.permute.xlu2 %1841  ;;  %v1784_v26 = vsel %vm1781_vm2, %v4826_v12, %v4802_v1  ;;  %v956_v1 = vld [vmem:[%s6565_s29 + $0x198] sm:$0xff]  ;;  %v1698_v12 = vsel %vm1694_vm3, %v4839_v18, %v4816_v7 }
 0x23a   : > { %v1895_v49 = vmul.f32 %v4995_v48, %v1879_v3  ;;  %v1896_v60 = vmul.f32 %v4997_v51, %v1871_v30  ;;  %4043 = vmatmul.msk.f32.gmra.mxu3 %vm977_vm1, %v955_v6  ;;  %v1872_v50 = vsel %vm1869_vm4, %v1842_v52, %v1858_v53  ;;  %v1880_v27 = vsel %vm1869_vm4, %v1858_v53, %v1842_v52 }
 0x23b   : > { %v1810_v30 = vmul.f32 %v4976_v46, %v1784_v26  ;;  %v1706_v53 = vsel %vm1694_vm3, %v4816_v7, %v4839_v18  ;;  %v1897_v33 = vmul.f32 %v4995_v48, %v1880_v27  ;;  %v1793_v18 = vsel %vm1781_vm2, %v4829_v13, %v4852_v25 }
 0x23c   : > { %v5061_v31 = vadd.f32 %v1895_v49, %v1823_v54  ;;  %v5063_v37 = vadd.f32 %v1896_v60, %v1824_v14  ;;  %v1313_v11 = vpop.f32.mrf.mxu2  ;;  %v1898_v54 = vmul.f32 %v4997_v51, %v1872_v50  ;;  %v1723_v7 = vmul.f32 %v4939_v16, %v1706_v53 }
 0x23d   : > { %v1737_v21 = vadd.f32 %v1721_v43, %v1313_v11  ;;  %v1546_v6 = vpop.f32.mrf.mxu3  ;;  %v1724_v27 = vmul.f32 %v4941_v20, %v1698_v12 }
 0x23e   : > { %v1738_v3 = vadd.f32 %v1722_v17, %v1546_v6 }
 0x23f   : > { %v1825_v43 = vadd.f32 %v1809_v5, %v1737_v21  ;;  %v1707_v5 = vsel %vm1694_vm3, %v4850_v24, %v4842_v19  ;;  %v1811_v21 = vmul.f32 %v4974_v15, %v1793_v18 }
 0x240   : > { %v1826_v14 = vadd.f32 %v1810_v30, %v1738_v3  ;;  %v1846_v52 = vpop.permute.xlu0 %1845  ;;  %v1860_v49 = vpop.permute.xlu1 %1859 }
 0x241   : > { %v5080_v60 = vadd.f32 %v1897_v33, %v1825_v43  ;;  %v1873_v17 = vsel %vm1869_vm4, %v1844_v34, %v1860_v49  ;;  %v1881_v26 = vsel %vm1869_vm4, %v1860_v49, %v1844_v34  ;;  %3972 = vmatmul.msk.f32.gmra.mxu2 %vm977_vm1, %v956_v1  ;;  %v1785_v34 = vsel %vm1781_vm2, %v4852_v25, %v4829_v13  ;;  %v1848_v12 = vpop.permute.xlu2 %1847 }
 0x242   : > { %v5092_v50 = vadd.f32 %v1898_v54, %v1826_v14  ;;  %4044 = vmatmul.msk.f32.gmra.mxu3 %vm977_vm1, %v956_v1  ;;  %v1812_v53 = vmul.f32 %v4976_v46, %v1785_v34  ;;  %v957_v1 = vld [vmem:[%s6565_s29 + $0x1a0] sm:$0xff]  ;;  %v1699_v13 = vsel %vm1694_vm3, %v4842_v19, %v4850_v24  ;;  %v1899_v25 = vmul.f32 %v4995_v48, %v1881_v26 }
 0x243   : > { %v1900_v43 = vmul.f32 %v4997_v51, %v1873_v17  ;;  %v1726_v26 = vmul.f32 %v4941_v20, %v1699_v13 }
 0x244   : > { %v1316_v11 = vpop.f32.mrf.mxu2 }
 0x245   : > { %v1739_v6 = vadd.f32 %v1723_v7, %v1316_v11  ;;  %v1549_v30 = vpop.f32.mrf.mxu3  ;;  %v1725_v7 = vmul.f32 %v4939_v16, %v1707_v5  ;;  %v1813_v5 = vmul.f32 %v4974_v15, %v4870_v39  ;;  %v1727_v39 = vmul.f32 %v4939_v16, %v4886_v8 }
 0x246   : > { %v1740_v3 = vadd.f32 %v1724_v27, %v1549_v30  ;;  %v1814_v30 = vmul.f32 %v4976_v46, %v4866_v38  ;;  %v1815_v8 = vmul.f32 %v4974_v15, %v4894_v10  ;;  %v1729_v10 = vmul.f32 %v4939_v16, %v4909_v23  ;;  %v4067_v23 = vld [vmem:[%s6566_s23 + $0x6] sm:$0x3] }
 0x247   : > { %v1827_v33 = vadd.f32 %v1811_v21, %v1739_v6 }
 0x248   : > { %v1828_v54 = vadd.f32 %v1812_v53, %v1740_v3  ;;  %v1864_v14 = vpop.permute.xlu0 %1863  ;;  %v1862_v49 = vpop.permute.xlu1 %1861  ;;  %v958_v3 = vld [vmem:[%s6565_s29 + $0x1a8] sm:$0xff] }
 0x249   : > { %v5116_v18 = vadd.f32 %v1899_v25, %v1827_v33  ;;  %v1875_v27 = vsel %vm1869_vm4, %v1848_v12, %v1864_v14  ;;  %v1883_v34 = vsel %vm1869_vm4, %v1864_v14, %v1848_v12  ;;  %v1874_v19 = vsel %vm1869_vm4, %v1846_v52, %v1862_v49  ;;  %3973 = vmatmul.msk.f32.gmra.mxu2 %vm977_vm1, %v957_v1 }
 0x24a   : > { %v5125_v24 = vadd.f32 %v1900_v43, %v1828_v54  ;;  %v1882_v17 = vsel %vm1869_vm4, %v1862_v49, %v1846_v52  ;;  %4045 = vmatmul.msk.f32.gmra.mxu3 %vm977_vm1, %v957_v1  ;;  %v1902_v1 = vmul.f32 %v4997_v51, %v1874_v19  ;;  %v1728_v14 = vmul.f32 %v4941_v20, %v4882_v4 }
 0x24b   : > { %v1901_v52 = vmul.f32 %v4995_v48, %v1882_v17  ;;  %v1903_v4 = vmul.f32 %v4995_v48, %v1883_v34  ;;  %v1730_v34 = vmul.f32 %v4941_v20, %v4905_v22  ;;  %v5185_v22 = vperm.slane %v4067_v23, 0 }
 0x24c   : > { %v1319_v11 = vpop.f32.mrf.mxu2 }
 0x24d   : > { %v1741_v21 = vadd.f32 %v1725_v7, %v1319_v11  ;;  %v1552_v6 = vpop.f32.mrf.mxu3 }
 0x24e   : > { %v1742_v53 = vadd.f32 %v1726_v26, %v1552_v6  ;;  %v1816_v26 = vmul.f32 %v4976_v46, %v4890_v9  ;;  %v1904_v6 = vmul.f32 %v4997_v51, %v1875_v27 }
 0x24f   : > { %v1829_v25 = vadd.f32 %v1813_v5, %v1741_v21  ;;  %v959_v5 = vld [vmem:[%s6565_s29 + $0x1b0] sm:$0xff] }
 0x250   : > { %v1830_v13 = vadd.f32 %v1814_v30, %v1742_v53  ;;  %v1850_v12 = vpop.permute.xlu0 %1849  ;;  %v1866_v33 = vpop.permute.xlu1 %1865 }
 0x251   : > { %v5142_v43 = vadd.f32 %v1901_v52, %v1829_v25  ;;  %v1876_v38 = vsel %vm1869_vm4, %v1850_v12, %v1866_v33  ;;  %v1884_v54 = vsel %vm1869_vm4, %v1866_v33, %v1850_v12  ;;  %3974 = vmatmul.msk.f32.gmra.mxu2 %vm977_vm1, %v958_v3  ;;  %v1818_v12 = vmul.f32 %v4976_v46, %v4920_v41 }
 0x252   : > { %v5151_v49 = vadd.f32 %v1902_v1, %v1830_v13  ;;  %4046 = vmatmul.msk.f32.gmra.mxu3 %vm977_vm1, %v958_v3  ;;  %v1817_v13 = vmul.f32 %v4974_v15, %v4924_v44  ;;  %v1926_v44 = vpop.permute.xlu2 %1925 }
 0x254   : > { %v1322_v7 = vpop.f32.mrf.mxu2 }
 0x255   : > { %v1743_v19 = vadd.f32 %v1727_v39, %v1322_v7  ;;  %v1555_v17 = vpop.f32.mrf.mxu3  ;;  %v5187_v7 = vperm.slane %v4067_v23, 1 }
 0x256   : > { %v1744_v11 = vadd.f32 %v1728_v14, %v1555_v17 }
 0x257   : > { %v1831_v21 = vadd.f32 %v1815_v8, %v1743_v19  ;;  %v960_v8 = vld [vmem:[%s6565_s29 + $0x1b8] sm:$0xff]  ;;  %v1905_v19 = vmul.f32 %v4995_v48, %v1884_v54  ;;  %v1732_v54 = vmul.f32 %v4941_v20, %v4930_v57  ;;  %v1820_v20 = vmul.f32 %v4976_v46, %v4961_v36 }
 0x258   : > { %v1832_v30 = vadd.f32 %v1816_v26, %v1744_v11  ;;  %v1852_v53 = vpop.permute.xlu0 %1851  ;;  %v1868_v3 = vpop.permute.xlu1 %1867  ;;  %v1906_v26 = vmul.f32 %v4997_v51, %v1876_v38 }
 0x259   : > { %v5165_v52 = vadd.f32 %v1903_v4, %v1831_v21  ;;  %v1877_v9 = vsel %vm1869_vm4, %v1852_v53, %v1868_v3  ;;  %v1885_v25 = vsel %vm1869_vm4, %v1868_v3, %v1852_v53  ;;  %3975 = vmatmul.msk.f32.gmra.mxu2 %vm977_vm1, %v959_v5 }
 0x25a   : > { %v5174_v27 = vadd.f32 %v1904_v6, %v1832_v30  ;;  %4047 = vmatmul.msk.f32.gmra.mxu3 %vm977_vm1, %v959_v5  ;;  %v1731_v5 = vmul.f32 %v4939_v16, %v4934_v2 }
 0x25c   : > { %v1325_v1 = vpop.f32.mrf.mxu2 }
 0x25d   : > { %v1745_v33 = vadd.f32 %v1729_v10, %v1325_v1  ;;  %v1558_v39 = vpop.f32.mrf.mxu3  ;;  %v1819_v10 = vmul.f32 %v4974_v15, %v4965_v47  ;;  %v961_v1 = vld [vmem:[%s6565_s29 + $0x1c0] sm:$0xff] }
 0x25e   : > { %v1746_v14 = vadd.f32 %v1730_v34, %v1558_v39 }
 0x25f   : > { %v1833_v17 = vadd.f32 %v1817_v13, %v1745_v33 }
 0x260   : > { %v1834_v41 = vadd.f32 %v1818_v12, %v1746_v14  ;;  %v1942_v11 = vpop.permute.xlu0 %1941 }
 0x261   : > { %v5196_v4 = vadd.f32 %v1905_v19, %v1833_v17  ;;  %v1958_v21 = vsel %vm1957_vm5, %v1926_v44, %v1942_v11  ;;  %v1966_v6 = vsel %vm1957_vm5, %v1942_v11, %v1926_v44  ;;  %3976 = vmatmul.msk.f32.gmra.mxu2 %vm977_vm1, %v960_v8  ;;  %v962_v19 = vld [vmem:[%s6565_s29 + $0x1c8] sm:$0xff] }
 0x262   : > { %v5205_v30 = vadd.f32 %v1906_v26, %v1834_v41  ;;  %v1981_v38 = vmul.f32 %v5185_v22, %v1966_v6  ;;  %v1982_v53 = vmul.f32 %v5187_v7, %v1958_v21  ;;  %4048 = vmatmul.msk.f32.gmra.mxu3 %vm977_vm1, %v960_v8  ;;  %v1948_v26 = vpop.permute.xlu2 %1947 }
 0x264   : > { %v5211_v2 = vadd.f32 %v1981_v38, %v5022_v29  ;;  %v5214_v16 = vadd.f32 %v1982_v53, %v5024_v45  ;;  %v1328_v3 = vpop.f32.mrf.mxu2  ;;  %v1907_v29 = vmul.f32 %v4995_v48, %v1885_v25  ;;  %v1908_v45 = vmul.f32 %v4997_v51, %v1877_v9  ;;  %v963_v38 = vld [vmem:[%s6565_s29 + $0x1d0] sm:$0xff] }
 0x265   : > { %v1747_v34 = vadd.f32 %v1731_v5, %v1328_v3  ;;  %v1561_v57 = vpop.f32.mrf.mxu3 }
 0x266   : > { %v1748_v23 = vadd.f32 %v1732_v54, %v1561_v57 }
 0x267   : > { %v1835_v13 = vadd.f32 %v1819_v10, %v1747_v34 }
 0x268   : > { %v1836_v12 = vadd.f32 %v1820_v20, %v1748_v23  ;;  %v1928_v33 = vpop.permute.xlu0 %1927  ;;  %v1944_v39 = vpop.permute.xlu1 %1943 }
 0x269   : > { %v5225_v14 = vadd.f32 %v1907_v29, %v1835_v13  ;;  %v1959_v47 = vsel %vm1957_vm5, %v1928_v33, %v1944_v39  ;;  %v1967_v46 = vsel %vm1957_vm5, %v1944_v39, %v1928_v33  ;;  %3977 = vmatmul.msk.f32.gmra.mxu2 %vm977_vm1, %v961_v1  ;;  %v964_v29 = vld [vmem:[%s6565_s29 + $0x1d8] sm:$0xff] }
 0x26a   : > { %v5232_v36 = vadd.f32 %v1908_v45, %v1836_v12  ;;  %v1983_v48 = vmul.f32 %v5185_v22, %v1967_v46  ;;  %v1984_v15 = vmul.f32 %v5187_v7, %v1959_v47  ;;  %4049 = vmatmul.msk.f32.gmra.mxu3 %vm977_vm1, %v961_v1  ;;  %v1934_v34 = vpop.permute.xlu2 %1933 }
 0x26c   : > { %v5238_v51 = vadd.f32 %v1983_v48, %v5061_v31  ;;  %v5241_v9 = vadd.f32 %v1984_v15, %v5063_v37  ;;  %v1331_v25 = vpop.f32.mrf.mxu2  ;;  %v965_v15 = vld [vmem:[%s6565_s29 + $0x1e0] sm:$0xff] }
 0x26d   : > { %v1564_v8 = vpop.f32.mrf.mxu3  ;;  %2013 = vrot.lane.b32.xlu1 %v1331_v25, %s4243_s4 }
 0x26e   : > { %2029 = vrot.lane.b32.xlu2 %v1564_v8, %s4243_s4 }
 0x270   : > { %v1930_v17 = vpop.permute.xlu0 %1929  ;;  %v1946_v44 = vpop.permute.xlu1 %1945 }
 0x271   : > { %v1960_v31 = vsel %vm1957_vm5, %v1930_v17, %v1946_v44  ;;  %v1968_v37 = vsel %vm1957_vm5, %v1946_v44, %v1930_v17  ;;  %3978 = vmatmul.msk.f32.gmra.mxu2 %vm977_vm1, %v962_v19 }
 0x272   : > { %v1985_v41 = vmul.f32 %v5185_v22, %v1968_v37  ;;  %v1986_v11 = vmul.f32 %v5187_v7, %v1960_v31  ;;  %4050 = vmatmul.msk.f32.gmra.mxu3 %vm977_vm1, %v962_v19  ;;  %v1936_v46 = vpop.permute.xlu2 %1935  ;;  %v966_v37 = vld [vmem:[%s6565_s29 + $0x1e8] sm:$0xff] }
 0x274   : > { %v5257_v5 = vadd.f32 %v1985_v41, %v5080_v60  ;;  %v5260_v21 = vadd.f32 %v1986_v11, %v5092_v50  ;;  %v1334_v6 = vpop.f32.mrf.mxu2 }
 0x275   : > { %v1567_v54 = vpop.f32.mrf.mxu3  ;;  %2015 = vrot.lane.b32.xlu1 %v1334_v6, %s4243_s4 }
 0x276   : > { %2031 = vrot.lane.b32.xlu2 %v1567_v54, %s4243_s4 }
 0x278   : > { %v1932_v53 = vpop.permute.xlu1 %1931 }
 0x279   : > { %v1961_v3 = vsel %vm1957_vm5, %v1932_v53, %v1948_v26  ;;  %v1969_v60 = vsel %vm1957_vm5, %v1948_v26, %v1932_v53  ;;  %3979 = vmatmul.msk.f32.gmra.mxu2 %vm977_vm1, %v963_v38 }
 0x27a   : > { %v1987_v50 = vmul.f32 %v5185_v22, %v1969_v60  ;;  %v1988_v10 = vmul.f32 %v5187_v7, %v1961_v3  ;;  %4051 = vmatmul.msk.f32.gmra.mxu3 %vm977_vm1, %v963_v38  ;;  %v1954_v41 = vpop.permute.xlu2 %1953 }
 0x27c   : > { %v5276_v57 = vadd.f32 %v1987_v50, %v5116_v18  ;;  %v5279_v20 = vadd.f32 %v1988_v10, %v5125_v24  ;;  %v1337_v23 = vpop.f32.mrf.mxu2  ;;  %v967_v50 = vld [vmem:[%s6565_s29 + $0x1f0] sm:$0xff] }
 0x27d   : > { %v1570_v1 = vpop.f32.mrf.mxu3 }
 0x27e   : > { %2033 = vrot.lane.b32.xlu0 %v1570_v1, %s4243_s4  ;;  %2017 = vrot.lane.b32.xlu2 %v1337_v23, %s4243_s4 }
 0x280   : > { %v1950_v13 = vpop.permute.xlu0 %1949 }
 0x281   : > { %v1962_v45 = vsel %vm1957_vm5, %v1934_v34, %v1950_v13  ;;  %v1970_v18 = vsel %vm1957_vm5, %v1950_v13, %v1934_v34  ;;  %3980 = vmatmul.msk.f32.gmra.mxu2 %vm977_vm1, %v964_v29 }
 0x282   : > { %v1989_v24 = vmul.f32 %v5185_v22, %v1970_v18  ;;  %v1990_v12 = vmul.f32 %v5187_v7, %v1962_v45  ;;  %4052 = vmatmul.msk.f32.gmra.mxu3 %vm977_vm1, %v964_v29  ;;  %v1940_v10 = vpop.permute.xlu2 %1939 }
 0x284   : > { %v5295_v33 = vadd.f32 %v1989_v24, %v5142_v43  ;;  %v5298_v39 = vadd.f32 %v1990_v12, %v5151_v49  ;;  %v1340_v47 = vpop.f32.mrf.mxu2 }
 0x285   : > { %v1573_v48 = vpop.f32.mrf.mxu3 }
 0x286   : > { %2035 = vrot.lane.b32.xlu0 %v1573_v48, %s4243_s4  ;;  %2019 = vrot.lane.b32.xlu2 %v1340_v47, %s4243_s4  ;;  %v970_v47 = vld [vmem:[%s6565_s29 + $0x208] sm:$0xff] }
 0x288   : > { %v1952_v25 = vpop.permute.xlu0 %1951 }
 0x289   : > { %v1963_v8 = vsel %vm1957_vm5, %v1936_v46, %v1952_v25  ;;  %v1971_v43 = vsel %vm1957_vm5, %v1952_v25, %v1936_v46  ;;  %3981 = vmatmul.msk.f32.gmra.mxu2 %vm977_vm1, %v965_v15 }
 0x28a   : > { %v1991_v49 = vmul.f32 %v5185_v22, %v1971_v43  ;;  %v1992_v19 = vmul.f32 %v5187_v7, %v1963_v8  ;;  %4053 = vmatmul.msk.f32.gmra.mxu3 %vm977_vm1, %v965_v15  ;;  %v971_v15 = vld [vmem:[%s6565_s29 + $0x210] sm:$0xff]  ;;  %v972_v43 = vld [vmem:[%s6565_s29 + $0x218] sm:$0xff] }
 0x28c   : > { %v5314_v17 = vadd.f32 %v1991_v49, %v5165_v52  ;;  %v5317_v44 = vadd.f32 %v1992_v19, %v5174_v27  ;;  %v1343_v26 = vpop.f32.mrf.mxu2 }
 0x28d   : > { %v1576_v31 = vpop.f32.mrf.mxu3 }
 0x28e   : > { %2021 = vrot.lane.b32.xlu0 %v1343_v26, %s4243_s4  ;;  %2037 = vrot.lane.b32.xlu1 %v1576_v31, %s4243_s4  ;;  %v973_v26 = vld [vmem:[%s6565_s29 + $0x220] sm:$0xff] }
 0x28f   : > { %v1938_v11 = vpop.permute.xlu1 %1937 }
 0x290   : > { %v1964_v6 = vsel %vm1957_vm5, %v1938_v11, %v1954_v41  ;;  %v1972_v52 = vsel %vm1957_vm5, %v1954_v41, %v1938_v11  ;;  %v974_v41 = vld [vmem:[%s6565_s29 + $0x228] sm:$0xff] }
 0x291   : > { %v1993_v27 = vmul.f32 %v5185_v22, %v1972_v52  ;;  %v1994_v54 = vmul.f32 %v5187_v7, %v1964_v6  ;;  %3982 = vmatmul.msk.f32.gmra.mxu2 %vm977_vm1, %v966_v37  ;;  %v975_v52 = vld [vmem:[%s6565_s29 + $0x230] sm:$0xff] }
 0x292   : > { %4054 = vmatmul.msk.f32.gmra.mxu3 %vm977_vm1, %v966_v37 }
 0x293   : > { %v5333_v38 = vadd.f32 %v1993_v27, %v5196_v4  ;;  %v5336_v53 = vadd.f32 %v1994_v54, %v5205_v30  ;;  %v4068_v27 = vld [vmem:[%s6566_s23 + $0xa] sm:$0x3] }
 0x294   : > { %v1346_v3 = vpop.f32.mrf.mxu2 }
 0x295   : > { %v1579_v60 = vpop.f32.mrf.mxu3 }
 0x296   : > { %2023 = vrot.lane.b32.xlu1 %v1346_v3, %s4243_s4  ;;  %2039 = vrot.lane.b32.xlu2 %v1579_v60, %s4243_s4 }
 0x298   : > { %v1956_v34 = vpop.permute.xlu0 %1955 }
 0x299   : > { %v1965_v23 = vsel %vm1957_vm5, %v1940_v10, %v1956_v34  ;;  %v1973_v4 = vsel %vm1957_vm5, %v1956_v34, %v1940_v10  ;;  %3983 = vmatmul.msk.f32.gmra.mxu2 %vm977_vm1, %v967_v50  ;;  %v5419_v10 = vperm.slane %v4068_v27, 1  ;;  %v976_v34 = vld [vmem:[%s6565_s29 + $0x238] sm:$0xff] }
 0x29a   : > { %v1995_v30 = vmul.f32 %v5185_v22, %v1973_v4  ;;  %v1996_v1 = vmul.f32 %v5187_v7, %v1965_v23  ;;  %4055 = vmatmul.msk.f32.gmra.mxu3 %vm977_vm1, %v967_v50  ;;  %v968_v22 = vld [vmem:[%s6565_s29 + $0x1f8] sm:$0xff]  ;;  %v5417_v50 = vperm.slane %v4068_v27, 0 }
 0x29c   : > { %v5352_v29 = vadd.f32 %v1995_v30, %v5225_v14  ;;  %v5355_v13 = vadd.f32 %v1996_v1, %v5232_v36  ;;  %v1349_v45 = vpop.f32.mrf.mxu2  ;;  %v969_v36 = vld [vmem:[%s6565_s29 + $0x200] sm:$0xff] }
 0x29d   : > { %v1582_v18 = vpop.f32.mrf.mxu3 }
 0x29e   : > { %2025 = vrot.lane.b32.xlu1 %v1349_v45, %s4243_s4  ;;  %2041 = vrot.lane.b32.xlu2 %v1582_v18, %s4243_s4 }
 0x2a1   : > { %3984 = vmatmul.msk.f32.gmra.mxu2 %vm977_vm1, %v968_v22 }
 0x2a2   : > { %4056 = vmatmul.msk.f32.gmra.mxu3 %vm977_vm1, %v968_v22 }
 0x2a4   : > { %v1352_v7 = vpop.f32.mrf.mxu2 }
 0x2a5   : > { %v1585_v14 = vpop.f32.mrf.mxu3  ;;  %2027 = vrot.lane.b32.xlu0 %v1352_v7, %s4243_s4 }
 0x2a6   : > { %2043 = vrot.lane.b32.xlu1 %v1585_v14, %s4243_s4 }
 0x2a9   : > { %3985 = vmatmul.msk.f32.gmra.mxu2 %vm977_vm1, %v969_v36 }
 0x2aa   : > { %4057 = vmatmul.msk.f32.gmra.mxu3 %vm977_vm1, %v969_v36 }
 0x2ac   : > { %v1355_v24 = vpop.f32.mrf.mxu2 }
 0x2ad   : > { %v1588_v12 = vpop.f32.mrf.mxu3 }
 0x2ae   : > { %2101 = vrot.lane.b32.xlu1 %v1355_v24, %s4244_s3  ;;  %2117 = vrot.lane.b32.xlu2 %v1588_v12, %s4244_s3 }
 0x2b1   : > { %3986 = vmatmul.msk.f32.gmra.mxu2 %vm977_vm1, %v970_v47 }
 0x2b2   : > { %4058 = vmatmul.msk.f32.gmra.mxu3 %vm977_vm1, %v970_v47 }
 0x2b4   : > { %v1358_v46 = vpop.f32.mrf.mxu2 }
 0x2b5   : > { %v1591_v48 = vpop.f32.mrf.mxu3  ;;  %2103 = vrot.lane.b32.xlu0 %v1358_v46, %s4244_s3 }
 0x2b6   : > { %2119 = vrot.lane.b32.xlu1 %v1591_v48, %s4244_s3 }
 0x2b9   : > { %3987 = vmatmul.msk.f32.gmra.mxu2 %vm977_vm1, %v971_v15 }
 0x2ba   : > { %4059 = vmatmul.msk.f32.gmra.mxu3 %vm977_vm1, %v971_v15 }
 0x2bc   : > { %v1361_v25 = vpop.f32.mrf.mxu2 }
 0x2bd   : > { %v1594_v8 = vpop.f32.mrf.mxu3  ;;  %2105 = vrot.lane.b32.xlu0 %v1361_v25, %s4244_s3 }
 0x2be   : > { %2121 = vrot.lane.b32.xlu1 %v1594_v8, %s4244_s3 }
 0x2c1   : > { %3988 = vmatmul.msk.f32.gmra.mxu2 %vm977_vm1, %v972_v43 }
 0x2c2   : > { %4060 = vmatmul.msk.f32.gmra.mxu3 %vm977_vm1, %v972_v43 }
 0x2c4   : > { %v1364_v49 = vpop.f32.mrf.mxu2 }
 0x2c5   : > { %v1597_v19 = vpop.f32.mrf.mxu3 }
 0x2c6   : > { %2107 = vrot.lane.b32.xlu1 %v1364_v49, %s4244_s3  ;;  %2123 = vrot.lane.b32.xlu2 %v1597_v19, %s4244_s3 }
 0x2c8   : > { %v2030_v54 = vpop.permute.xlu2 %2029 }
 0x2c9   : > { %3989 = vmatmul.msk.f32.gmra.mxu2 %vm977_vm1, %v973_v26 }
 0x2ca   : > { %4061 = vmatmul.msk.f32.gmra.mxu3 %vm977_vm1, %v973_v26 }
 0x2cc   : > { %v1367_v31 = vpop.f32.mrf.mxu2 }
 0x2cd   : > { %v1600_v37 = vpop.f32.mrf.mxu3 }
 0x2ce   : > { %2109 = vrot.lane.b32.xlu1 %v1367_v31, %s4244_s3  ;;  %2125 = vrot.lane.b32.xlu2 %v1600_v37, %s4244_s3 }
 0x2d0   : > { %v2032_v36 = vpop.permute.xlu2 %2031 }
 0x2d1   : > { %3990 = vmatmul.msk.f32.gmra.mxu2 %vm977_vm1, %v974_v41 }
 0x2d2   : > { %4062 = vmatmul.msk.f32.gmra.mxu3 %vm977_vm1, %v974_v41 }
 0x2d4   : > { %v1370_v11 = vpop.f32.mrf.mxu2 }
 0x2d5   : > { %v1603_v6 = vpop.f32.mrf.mxu3 }
 0x2d6   : > { %2127 = vrot.lane.b32.xlu0 %v1603_v6, %s4244_s3  ;;  %2111 = vrot.lane.b32.xlu2 %v1370_v11, %s4244_s3 }
 0x2d8   : > { %v2018_v8 = vpop.permute.xlu2 %2017 }
 0x2d9   : > { %3991 = vmatmul.msk.f32.gmra.mxu2 %vm977_vm1, %v975_v52 }
 0x2da   : > { %4063 = vmatmul.msk.f32.gmra.mxu3 %vm977_vm1, %v975_v52 }
 0x2dc   : > { %v1373_v3 = vpop.f32.mrf.mxu2 }
 0x2dd   : > { %v1606_v60 = vpop.f32.mrf.mxu3 }
 0x2de   : > { %2113 = vrot.lane.b32.xlu0 %v1373_v3, %s4244_s3  ;;  %2129 = vrot.lane.b32.xlu1 %v1606_v60, %s4244_s3 }
 0x2df   : > { %v2014_v23 = vpop.permute.xlu1 %2013 }
 0x2e0   : > { %v2046_v4 = vsel %vm2045_vm6, %v2014_v23, %v2030_v54  ;;  %v2054_v30 = vsel %vm2045_vm6, %v2030_v54, %v2014_v23  ;;  %v2020_v11 = vpop.permute.xlu2 %2019 }
 0x2e1   : > { %v2069_v1 = vmul.f32 %v5417_v50, %v2046_v4  ;;  %v2070_v45 = vmul.f32 %v5419_v10, %v2054_v30  ;;  %3992 = vmatmul.msk.f32.gmra.mxu2 %vm977_vm1, %v976_v34 }
 0x2e2   : > { %4064 = vmatmul.msk.f32.gmra.mxu3 %vm977_vm1, %v976_v34 }
 0x2e3   : > { %v5435_v18 = vadd.f32 %v2069_v1, %v5211_v2  ;;  %v5438_v22 = vadd.f32 %v2070_v45, %v5214_v16 }
 0x2e4   : > { %v1376_v7 = vpop.f32.mrf.mxu2 }
 0x2e5   : > { %v1609_v14 = vpop.f32.mrf.mxu3 }
 0x2e6   : > { %2115 = vrot.lane.b32.xlu0 %v1376_v7, %s4244_s3  ;;  %2131 = vrot.lane.b32.xlu1 %v1609_v14, %s4244_s3  ;;  %s4245_s3 = smov 112  }
 0x2e7   : > { %v2016_v24 = vpop.permute.xlu1 %2015 }
 0x2e8   : > { %v2047_v12 = vsel %vm2045_vm6, %v2016_v24, %v2032_v36  ;;  %v2055_v47 = vsel %vm2045_vm6, %v2032_v36, %v2016_v24 }
 0x2e9   : > { %v2071_v2 = vmul.f32 %v5417_v50, %v2047_v12  ;;  %v2072_v46 = vmul.f32 %v5419_v10, %v2055_v47 }
 0x2eb   : > { %v5449_v16 = vadd.f32 %v2071_v2, %v5238_v51  ;;  %v5452_v48 = vadd.f32 %v2072_v46, %v5241_v9 }
 0x2ec   : > { %v1379_v15 = vpop.f32.mrf.mxu2 }
 0x2ed   : > { %v1612_v25 = vpop.f32.mrf.mxu3  ;;  %2189 = vrot.lane.b32.xlu2 %v1379_v15, %s4245_s3 }
 0x2ee   : > { %2205 = vrot.lane.b32.xlu0 %v1612_v25, %s4245_s3 }
 0x2f0   : > { %v2034_v43 = vpop.permute.xlu0 %2033  ;;  %v2040_v24 = vpop.permute.xlu2 %2039 }
 0x2f1   : > { %v2048_v49 = vsel %vm2045_vm6, %v2018_v8, %v2034_v43  ;;  %v2056_v19 = vsel %vm2045_vm6, %v2034_v43, %v2018_v8 }
 0x2f2   : > { %v2073_v51 = vmul.f32 %v5417_v50, %v2048_v49  ;;  %v2074_v9 = vmul.f32 %v5419_v10, %v2056_v19 }
 0x2f4   : > { %v5463_v26 = vadd.f32 %v2073_v51, %v5257_v5  ;;  %v5466_v31 = vadd.f32 %v2074_v9, %v5260_v21  ;;  %v1382_v37 = vpop.f32.mrf.mxu2 }
 0x2f5   : > { %v1615_v41 = vpop.f32.mrf.mxu3 }
 0x2f6   : > { %2191 = vrot.lane.b32.xlu0 %v1382_v37, %s4245_s3  ;;  %2207 = vrot.lane.b32.xlu1 %v1615_v41, %s4245_s3 }
 0x2f8   : > { %v2036_v6 = vpop.permute.xlu0 %2035  ;;  %v2042_v43 = vpop.permute.xlu2 %2041 }
 0x2f9   : > { %v2049_v52 = vsel %vm2045_vm6, %v2020_v11, %v2036_v6  ;;  %v2057_v27 = vsel %vm2045_vm6, %v2036_v6, %v2020_v11 }
 0x2fa   : > { %v2075_v5 = vmul.f32 %v5417_v50, %v2049_v52  ;;  %v2076_v54 = vmul.f32 %v5419_v10, %v2057_v27 }
 0x2fc   : > { %v5477_v21 = vadd.f32 %v2075_v5, %v5276_v57  ;;  %v5480_v3 = vadd.f32 %v2076_v54, %v5279_v20  ;;  %v1385_v60 = vpop.f32.mrf.mxu2 }
 0x2fd   : > { %v1618_v34 = vpop.f32.mrf.mxu3  ;;  %2193 = vrot.lane.b32.xlu2 %v1385_v60, %s4245_s3 }
 0x2fe   : > { %2209 = vrot.lane.b32.xlu0 %v1618_v34, %s4245_s3 }
 0x300   : > { %v2022_v23 = vpop.permute.xlu0 %2021  ;;  %v2038_v4 = vpop.permute.xlu1 %2037 }
 0x301   : > { %v2050_v30 = vsel %vm2045_vm6, %v2022_v23, %v2038_v4  ;;  %v2058_v1 = vsel %vm2045_vm6, %v2038_v4, %v2022_v23 }
 0x302   : > { %v2077_v57 = vmul.f32 %v5417_v50, %v2050_v30  ;;  %v2078_v45 = vmul.f32 %v5419_v10, %v2058_v1 }
 0x304   : > { %v5491_v20 = vadd.f32 %v2077_v57, %v5295_v33  ;;  %v5494_v7 = vadd.f32 %v2078_v45, %v5298_v39  ;;  %v1388_v14 = vpop.f32.mrf.mxu2 }
 0x305   : > { %v1621_v36 = vpop.f32.mrf.mxu3  ;;  %2195 = vrot.lane.b32.xlu2 %v1388_v14, %s4245_s3 }
 0x306   : > { %2211 = vrot.lane.b32.xlu0 %v1621_v36, %s4245_s3 }
 0x308   : > { %v2024_v12 = vpop.permute.xlu1 %2023  ;;  %v2118_v30 = vpop.permute.xlu2 %2117 }
 0x309   : > { %v2051_v47 = vsel %vm2045_vm6, %v2024_v12, %v2040_v24  ;;  %v2059_v2 = vsel %vm2045_vm6, %v2040_v24, %v2024_v12 }
 0x30a   : > { %v2079_v33 = vmul.f32 %v5417_v50, %v2051_v47  ;;  %v2080_v46 = vmul.f32 %v5419_v10, %v2059_v2 }
 0x30c   : > { %v5505_v39 = vadd.f32 %v2079_v33, %v5314_v17  ;;  %v5508_v15 = vadd.f32 %v2080_v46, %v5317_v44  ;;  %v1391_v25 = vpop.f32.mrf.mxu2 }
 0x30d   : > { %v1624_v8 = vpop.f32.mrf.mxu3 }
 0x30e   : > { %2197 = vrot.lane.b32.xlu0 %v1391_v25, %s4245_s3  ;;  %2213 = vrot.lane.b32.xlu1 %v1624_v8, %s4245_s3 }
 0x310   : > { %v2026_v49 = vpop.permute.xlu1 %2025 }
 0x311   : > { %v2052_v19 = vsel %vm2045_vm6, %v2026_v49, %v2042_v43  ;;  %v2060_v51 = vsel %vm2045_vm6, %v2042_v43, %v2026_v49 }
 0x312   : > { %v2081_v17 = vmul.f32 %v5417_v50, %v2052_v19  ;;  %v2082_v9 = vmul.f32 %v5419_v10, %v2060_v51 }
 0x314   : > { %v5519_v44 = vadd.f32 %v2081_v17, %v5333_v38  ;;  %v5522_v37 = vadd.f32 %v2082_v9, %v5336_v53  ;;  %v1394_v41 = vpop.f32.mrf.mxu2  ;;  %v4069_v53 = vld [vmem:[%s6566_s23 + $0xc] sm:$0x3] }
 0x315   : > { %v1627_v11 = vpop.f32.mrf.mxu3 }
 0x316   : > { %2199 = vrot.lane.b32.xlu0 %v1394_v41, %s4245_s3  ;;  %2215 = vrot.lane.b32.xlu1 %v1627_v11, %s4245_s3 }
 0x317   : > { %v2028_v6 = vpop.permute.xlu0 %2027 }
 0x318   : > { %v2044_v52 = vpop.permute.xlu1 %2043 }
 0x319   : > { %v2053_v27 = vsel %vm2045_vm6, %v2028_v6, %v2044_v52  ;;  %v2061_v5 = vsel %vm2045_vm6, %v2044_v52, %v2028_v6 }
 0x31a   : > { %v2083_v38 = vmul.f32 %v5417_v50, %v2053_v27  ;;  %v2084_v54 = vmul.f32 %v5419_v10, %v2061_v5  ;;  %v5544_v50 = vperm.slane %v4069_v53, 0  ;;  %v5546_v10 = vperm.slane %v4069_v53, 1 }
 0x31c   : > { %v5536_v60 = vadd.f32 %v2083_v38, %v5352_v29  ;;  %v5539_v34 = vadd.f32 %v2084_v54, %v5355_v13  ;;  %v1397_v23 = vpop.f32.mrf.mxu2 }
 0x31d   : > { %v1630_v4 = vpop.f32.mrf.mxu3 }
 0x31e   : > { %2201 = vrot.lane.b32.xlu1 %v1397_v23, %s4245_s3  ;;  %2217 = vrot.lane.b32.xlu2 %v1630_v4, %s4245_s3 }
 0x320   : > { %v2102_v1 = vpop.permute.xlu1 %2101  ;;  %v2124_v27 = vpop.permute.xlu2 %2123 }
 0x321   : > { %v2134_v29 = vsel %vm2133_vm7, %v2102_v1, %v2118_v30  ;;  %v2142_v13 = vsel %vm2133_vm7, %v2118_v30, %v2102_v1 }
 0x322   : > { %v2157_v57 = vmul.f32 %v5544_v50, %v2134_v29  ;;  %v2158_v45 = vmul.f32 %v5546_v10, %v2142_v13 }
 0x324   : > { %v5555_v14 = vadd.f32 %v2157_v57, %v5435_v18  ;;  %v5558_v36 = vadd.f32 %v2158_v45, %v5438_v22  ;;  %v1400_v24 = vpop.f32.mrf.mxu2 }
 0x325   : > { %v1633_v12 = vpop.f32.mrf.mxu3 }
 0x326   : > { %2219 = vrot.lane.b32.xlu0 %v1633_v12, %s4245_s3  ;;  %2203 = vrot.lane.b32.xlu2 %v1400_v24, %s4245_s3 }
 0x327   : > { %v2104_v47 = vpop.permute.xlu0 %2103 }
 0x328   : > { %v2120_v2 = vpop.permute.xlu1 %2119  ;;  %v2126_v1 = vpop.permute.xlu2 %2125 }
 0x329   : > { %v2135_v33 = vsel %vm2133_vm7, %v2104_v47, %v2120_v2  ;;  %v2143_v46 = vsel %vm2133_vm7, %v2120_v2, %v2104_v47 }
 0x32a   : > { %v2159_v18 = vmul.f32 %v5544_v50, %v2135_v33  ;;  %v2160_v25 = vmul.f32 %v5546_v10, %v2143_v46 }
 0x32c   : > { %v5569_v22 = vadd.f32 %v2159_v18, %v5449_v16  ;;  %v5572_v8 = vadd.f32 %v2160_v25, %v5452_v48  ;;  %v5574_v43 = vpop.f32.mrf.mxu2 }
 0x32d   : > { %v5576_v49 = vpop.f32.mrf.mxu3 }
 0x32f   : > { %v2106_v19 = vpop.permute.xlu0 %2105 }
 0x330   : > { %v2122_v51 = vpop.permute.xlu1 %2121  ;;  %v2112_v2 = vpop.permute.xlu2 %2111 }
 0x331   : > { %v2136_v17 = vsel %vm2133_vm7, %v2106_v19, %v2122_v51  ;;  %v2144_v9 = vsel %vm2133_vm7, %v2122_v51, %v2106_v19 }
 0x332   : > { %v2161_v41 = vmul.f32 %v5544_v50, %v2136_v17  ;;  %v2162_v16 = vmul.f32 %v5546_v10, %v2144_v9 }
 0x334   : > { %v5585_v11 = vadd.f32 %v2161_v41, %v5463_v26  ;;  %v5588_v48 = vadd.f32 %v2162_v16, %v5466_v31  ;;  %v5590_v6 = vpop.f32.mrf.mxu2 }
 0x335   : > { %v5592_v52 = vpop.f32.mrf.mxu3 }
 0x338   : > { %v2108_v5 = vpop.permute.xlu1 %2107 }
 0x339   : > { %v2137_v38 = vsel %vm2133_vm7, %v2108_v5, %v2124_v27  ;;  %v2145_v54 = vsel %vm2133_vm7, %v2124_v27, %v2108_v5 }
 0x33a   : > { %v2163_v53 = vmul.f32 %v5544_v50, %v2137_v38  ;;  %v2164_v26 = vmul.f32 %v5546_v10, %v2145_v54 }
 0x33c   : > { %v5601_v23 = vadd.f32 %v2163_v53, %v5477_v21  ;;  %v5604_v31 = vadd.f32 %v2164_v26, %v5480_v3  ;;  %v1409_v4 = vpop.f32.mrf.mxu2 }
 0x33d   : > { %v1642_v30 = vpop.f32.mrf.mxu3  ;;  %2281 = vrot.lane.b32.xlu2 %v1409_v4, %s4246_s28 }
 0x33e   : > { %2297 = vrot.lane.b32.xlu0 %v1642_v30, %s4246_s28 }
 0x340   : > { %v2110_v29 = vpop.permute.xlu1 %2109 }
 0x341   : > { %v2138_v13 = vsel %vm2133_vm7, %v2110_v29, %v2126_v1  ;;  %v2146_v57 = vsel %vm2133_vm7, %v2126_v1, %v2110_v29 }
 0x342   : > { %v2165_v21 = vmul.f32 %v5544_v50, %v2138_v13  ;;  %v2166_v3 = vmul.f32 %v5546_v10, %v2146_v57 }
 0x344   : > { %v5615_v45 = vadd.f32 %v2165_v21, %v5491_v20  ;;  %v5618_v24 = vadd.f32 %v2166_v3, %v5494_v7  ;;  %v1412_v12 = vpop.f32.mrf.mxu2 }
 0x345   : > { %v1645_v47 = vpop.f32.mrf.mxu3  ;;  %2283 = vrot.lane.b32.xlu1 %v1412_v12, %s4246_s28 }
 0x346   : > { %2299 = vrot.lane.b32.xlu2 %v1645_v47, %s4246_s28 }
 0x347   : > { %v2190_v12 = vpop.permute.xlu2 %2189 }
 0x348   : > { %v2128_v33 = vpop.permute.xlu0 %2127 }
 0x349   : > { %v2139_v46 = vsel %vm2133_vm7, %v2112_v2, %v2128_v33  ;;  %v2147_v18 = vsel %vm2133_vm7, %v2128_v33, %v2112_v2 }
 0x34a   : > { %v2167_v20 = vmul.f32 %v5544_v50, %v2139_v46  ;;  %v2168_v25 = vmul.f32 %v5546_v10, %v2147_v18 }
 0x34c   : > { %v5629_v7 = vadd.f32 %v2167_v20, %v5505_v39  ;;  %v5632_v19 = vadd.f32 %v2168_v25, %v5508_v15  ;;  %v1415_v51 = vpop.f32.mrf.mxu2 }
 0x34d   : > { %v1648_v17 = vpop.f32.mrf.mxu3  ;;  %2285 = vrot.lane.b32.xlu1 %v1415_v51, %s4246_s28 }
 0x34e   : > { %2301 = vrot.lane.b32.xlu2 %v1648_v17, %s4246_s28 }
 0x350   : > { %v2114_v9 = vpop.permute.xlu0 %2113  ;;  %v2130_v41 = vpop.permute.xlu1 %2129 }
 0x351   : > { %v2140_v16 = vsel %vm2133_vm7, %v2114_v9, %v2130_v41  ;;  %v2148_v27 = vsel %vm2133_vm7, %v2130_v41, %v2114_v9 }
 0x352   : > { %v2169_v39 = vmul.f32 %v5544_v50, %v2140_v16  ;;  %v2170_v5 = vmul.f32 %v5546_v10, %v2148_v27  ;;  %v2368_v16 = vld [vmem:[%s6556_s27 + $0x18] sm:$0xff] }
 0x354   : > { %v5643_v15 = vadd.f32 %v2169_v39, %v5519_v44  ;;  %v5646_v38 = vadd.f32 %v2170_v5, %v5522_v37  ;;  %v1418_v54 = vpop.f32.mrf.mxu2  ;;  %v4070_v37 = vld [vmem:[%s6566_s23 + $0xe] sm:$0x3] }
 0x355   : > { %v1651_v53 = vpop.f32.mrf.mxu3 }
 0x356   : > { %2303 = vrot.lane.b32.xlu0 %v1651_v53, %s4246_s28  ;;  %2287 = vrot.lane.b32.xlu2 %v1418_v54, %s4246_s28 }
 0x357   : > { %v2194_v39 = vpop.permute.xlu2 %2193 }
 0x358   : > { %v2116_v26 = vpop.permute.xlu0 %2115  ;;  %v2132_v4 = vpop.permute.xlu1 %2131 }
 0x359   : > { %v2141_v30 = vsel %vm2133_vm7, %v2116_v26, %v2132_v4  ;;  %v2149_v1 = vsel %vm2133_vm7, %v2132_v4, %v2116_v26  ;;  %v2367_v26 = vld [vmem:[%s6556_s27 + $0x10] sm:$0xff]  ;;  %v2365_v4 = vld [vmem:[%s6556_s27] sm:$0xff] }
 0x35a   : > { %v2171_v44 = vmul.f32 %v5544_v50, %v2141_v30  ;;  %v2172_v29 = vmul.f32 %v5546_v10, %v2149_v1  ;;  %v5668_v50 = vperm.slane %v4070_v37, 0  ;;  %v5670_v10 = vperm.slane %v4070_v37, 1  ;;  %v2366_v30 = vld [vmem:[%s6556_s27 + $0x8] sm:$0xff] }
 0x35c   : > { %v5660_v13 = vadd.f32 %v2171_v44, %v5536_v60  ;;  %v5663_v57 = vadd.f32 %v2172_v29, %v5539_v34  ;;  %v1421_v21 = vpop.f32.mrf.mxu2 }
 0x35d   : > { %v1654_v3 = vpop.f32.mrf.mxu3 }
 0x35e   : > { %2305 = vrot.lane.b32.xlu0 %v1654_v3, %s4246_s28  ;;  %2289 = vrot.lane.b32.xlu2 %v1421_v21, %s4246_s28 }
 0x35f   : > { %v2196_v1 = vpop.permute.xlu2 %2195 }
 0x360   : > { %v2206_v47 = vpop.permute.xlu0 %2205 }
 0x361   : > { %v2222_v60 = vsel %vm2221_vm8, %v2190_v12, %v2206_v47  ;;  %v2230_v34 = vsel %vm2221_vm8, %v2206_v47, %v2190_v12 }
 0x362   : > { %v2245_v2 = vmul.f32 %v5668_v50, %v2222_v60  ;;  %v2246_v33 = vmul.f32 %v5670_v10, %v2230_v34 }
 0x364   : > { %v5679_v46 = vadd.f32 %v2245_v2, %v5555_v14  ;;  %v5682_v18 = vadd.f32 %v2246_v33, %v5558_v36  ;;  %v1424_v20 = vpop.f32.mrf.mxu2 }
 0x365   : > { %v1657_v25 = vpop.f32.mrf.mxu3 }
 0x366   : > { %2291 = vrot.lane.b32.xlu0 %v1424_v20, %s4246_s28  ;;  %2307 = vrot.lane.b32.xlu1 %v1657_v25, %s4246_s28 }
 0x367   : > { %2295 = vrot.lane.b32.xlu2 %v5592_v52, %s4246_s28 }
 0x368   : > { %v2192_v51 = vpop.permute.xlu0 %2191  ;;  %v2208_v17 = vpop.permute.xlu1 %2207 }
 0x369   : > { %v2223_v9 = vsel %vm2221_vm8, %v2192_v51, %v2208_v17  ;;  %v2231_v14 = vsel %vm2221_vm8, %v2208_v17, %v2192_v51 }
 0x36a   : > { %v2247_v36 = vmul.f32 %v5668_v50, %v2223_v9  ;;  %v2248_v41 = vmul.f32 %v5670_v10, %v2231_v14 }
 0x36c   : > { %v5698_v27 = vadd.f32 %v2247_v36, %v5569_v22  ;;  %v5701_v52 = vadd.f32 %v2248_v41, %v5572_v8 }
 0x36e   : > { %2390 = vperm.xlu0 %4174, %v2368_v16   ;;  %2279 = vrot.lane.b32.xlu1 %v5590_v6, %s4246_s28 }
 0x36f   : > { %2293 = vrot.lane.b32.xlu2 %v5576_v49, %s4246_s28 }
 0x370   : > { %v2210_v5 = vpop.permute.xlu0 %2209 }
 0x371   : > { %v2224_v54 = vsel %vm2221_vm8, %v2194_v39, %v2210_v5  ;;  %v2232_v53 = vsel %vm2221_vm8, %v2210_v5, %v2194_v39 }
 0x372   : > { %v2249_v22 = vmul.f32 %v5668_v50, %v2224_v54  ;;  %v2250_v8 = vmul.f32 %v5670_v10, %v2232_v53 }
 0x374   : > { %v5717_v6 = vadd.f32 %v2249_v22, %v5585_v11  ;;  %v5720_v49 = vadd.f32 %v2250_v8, %v5588_v48 }
 0x376   : > { %2385 = vperm.xlu0 %4174, %v2367_v26   ;;  %2277 = vrot.lane.b32.xlu1 %v5574_v43, %s4246_s28  ;;  %v4071_v26 = vld [vmem:[%s6566_s23 + $0x10] sm:$0x3]  ;;  %s6567_s28 = sld [smem:[#allocation17_spill]] }
 0x377   : > { %2375 = vperm.xlu2 %4176, %v2365_v4  }
 0x378   : > { %v2218_v11 = vpop.permute.xlu2 %2217  ;;  %v2212_v44 = vpop.permute.xlu0 %2211 }
 0x379   : > { %v2225_v36 = vsel %vm2221_vm8, %v2196_v1, %v2212_v44  ;;  %v2233_v4 = vsel %vm2221_vm8, %v2212_v44, %v2196_v1  ;;  %v5770_v44 = vperm.slane %v4071_v26, 0 }
 0x37e   : > { %2380 = vperm.xlu1 %4175, %v2366_v30  }
 0x380   : > { %v2204_v29 = vpop.permute.xlu2 %2203  ;;  %v2198_v48 = vpop.permute.xlu0 %2197 }
 0x381   : > { %v2214_v37 = vpop.permute.xlu1 %2213 }
 0x382   : > { %v2226_v54 = vsel %vm2221_vm8, %v2198_v48, %v2214_v37  ;;  %v2234_v53 = vsel %vm2221_vm8, %v2214_v37, %v2198_v48 }
 0x383   : > { %v2254_v1 = vmul.f32 %v5670_v10, %v2234_v53 }
 0x388   : > { %v2200_v3 = vpop.permute.xlu0 %2199 }
 0x389   : > { %v2216_v12 = vpop.permute.xlu1 %2215 }
 0x38a   : > { %v2227_v51 = vsel %vm2221_vm8, %v2200_v3, %v2216_v12  ;;  %v2235_v17 = vsel %vm2221_vm8, %v2216_v12, %v2200_v3 }
 0x38b   : > { %v2255_v22 = vmul.f32 %v5668_v50, %v2227_v51  ;;  %v2256_v8 = vmul.f32 %v5670_v10, %v2235_v17 }
 0x38d   : > { %v2271_v51 = vadd.f32 %v2255_v22, %v5629_v7  ;;  %v2272_v17 = vadd.f32 %v2256_v8, %v5632_v19 }
 0x391   : > { %v2202_v34 = vpop.permute.xlu1 %2201 }
 0x392   : > { %v2228_v9 = vsel %vm2221_vm8, %v2202_v34, %v2218_v11  ;;  %v2236_v14 = vsel %vm2221_vm8, %v2218_v11, %v2202_v34  ;;  %v5772_v34 = vperm.slane %v4071_v26, 1 }
 0x393   : > { %v2257_v30 = vmul.f32 %v5668_v50, %v2228_v9  ;;  %v2258_v11 = vmul.f32 %v5670_v10, %v2236_v14 }
 0x395   : > { %v2273_v7 = vadd.f32 %v2257_v30, %v5643_v15  ;;  %v2274_v19 = vadd.f32 %v2258_v11, %v5646_v38 }
 0x397   : > { %v5730_v21 = vpop.permute.xlu2 %2281 }
 0x398   : > { %v2220_v60 = vpop.permute.xlu0 %2219 }
 0x399   : > { %v2229_v41 = vsel %vm2221_vm8, %v2204_v29, %v2220_v60  ;;  %v2237_v16 = vsel %vm2221_vm8, %v2220_v60, %v2204_v29  ;;  %v2253_v60 = vmul.f32 %v5668_v50, %v2226_v54 }
 0x39a   : > { %v2259_v48 = vmul.f32 %v5668_v50, %v2229_v41  ;;  %v2260_v37 = vmul.f32 %v5670_v10, %v2237_v16 }
 0x39c   : > { %v2275_v53 = vadd.f32 %v2259_v48, %v5660_v13  ;;  %v2276_v22 = vadd.f32 %v2260_v37, %v5663_v57  ;;  %v2252_v48 = vmul.f32 %v5670_v10, %v2233_v4  ;;  %v2269_v37 = vadd.f32 %v2253_v60, %v5615_v45 }
 0x3a0   : > { %v2300_v47 = vpop.permute.xlu2 %2299 }
 0x3a8   : > { %v2302_v43 = vpop.permute.xlu2 %2301 }
 0x3b0   : > { %v5732_v2 = vpop.permute.xlu0 %2297  ;;  %v2288_v20 = vpop.permute.xlu2 %2287 }
 0x3b1   : > { %v2312_v4 = vsel %vm2309_vm9, %v5730_v21, %v5732_v2  ;;  %v2320_v60 = vsel %vm2309_vm9, %v5732_v2, %v5730_v21 }
 0x3b2   : > { %v2337_v21 = vmul.f32 %v5770_v44, %v2312_v4  ;;  %v2338_v2 = vmul.f32 %v5772_v34, %v2320_v60 }
 0x3b7   : > { %v2284_v33 = vpop.permute.xlu1 %2283 }
 0x3b8   : > { %v2290_v29 = vpop.permute.xlu2 %2289 }
 0x3bf   : > { %v2286_v39 = vpop.permute.xlu1 %2285 }
 0x3c0   : > { %v2314_v41 = vsel %vm2309_vm9, %v2286_v39, %v2302_v43  ;;  %v2322_v16 = vsel %vm2309_vm9, %v2302_v43, %v2286_v39 }
 0x3c1   : > { %v2341_v15 = vmul.f32 %v5770_v44, %v2314_v41  ;;  %v2342_v38 = vmul.f32 %v5772_v34, %v2322_v16 }
 0x3c8   : > { %v2304_v25 = vpop.permute.xlu0 %2303 }
 0x3c9   : > { %v2315_v9 = vsel %vm2309_vm9, %v2288_v20, %v2304_v25  ;;  %v2323_v14 = vsel %vm2309_vm9, %v2304_v25, %v2288_v20  ;;  %v2313_v20 = vsel %vm2309_vm9, %v2284_v33, %v2300_v47  ;;  %v2321_v25 = vsel %vm2309_vm9, %v2300_v47, %v2284_v33 }
 0x3ca   : > { %v2343_v43 = vmul.f32 %v5770_v44, %v2315_v9  ;;  %v2344_v39 = vmul.f32 %v5772_v34, %v2323_v14 }
 0x3cc   : > { %v2359_v9 = vadd.f32 %v2343_v43, %v2271_v51  ;;  %v2360_v14 = vadd.f32 %v2344_v39, %v2272_v17 }
 0x3d0   : > { %v2306_v5 = vpop.permute.xlu0 %2305 }
 0x3d1   : > { %v2316_v3 = vsel %vm2309_vm9, %v2290_v29, %v2306_v5  ;;  %v2324_v12 = vsel %vm2309_vm9, %v2306_v5, %v2290_v29  ;;  %v2251_v29 = vmul.f32 %v5668_v50, %v2225_v36  ;;  %v2268_v36 = vadd.f32 %v2252_v48, %v5604_v31 }
 0x3d2   : > { %v2345_v5 = vmul.f32 %v5770_v44, %v2316_v3  ;;  %v2346_v54 = vmul.f32 %v5772_v34, %v2324_v12  ;;  %v2270_v3 = vadd.f32 %v2254_v1, %v5618_v24  ;;  %v2296_v12 = vpop.permute.xlu2 %2295 }
 0x3d3   : > { %v2267_v24 = vadd.f32 %v2251_v29, %v5601_v23  ;;  %v2424_v23 = vadd.f32 %v4785_v42, %v2360_v14 }
 0x3d4   : > { %v2361_v30 = vadd.f32 %v2345_v5, %v2273_v7  ;;  %v2362_v11 = vadd.f32 %v2346_v54, %v2274_v19  ;;  %v2339_v5 = vmul.f32 %v5770_v44, %v2313_v20  ;;  %v2340_v54 = vmul.f32 %v5772_v34, %v2321_v25 }
 0x3d5   : > { %v2357_v7 = vadd.f32 %v2341_v15, %v2269_v37  ;;  %v2358_v19 = vadd.f32 %v2342_v38, %v2270_v3 }
 0x3d6   : > { %v2425_v10 = vadd.f32 %v4765_v35, %v2361_v30  ;;  %v2426_v45 = vadd.f32 %v4765_v35, %v2362_v11  ;;  %v2423_v35 = vadd.f32 %v4785_v42, %v2359_v9  ;;  %v2356_v31 = vadd.f32 %v2340_v54, %v2268_v36 }
 0x3d7   : > { %v2421_v25 = vadd.f32 %v4777_v40, %v2357_v7  ;;  %v2422_v43 = vadd.f32 %v4777_v40, %v2358_v19  ;;  %v2440_v42 = vmax.f32 %v2424_v23, 0.0  ;;  %v2353_v30 = vadd.f32 %v2337_v21, %v5717_v6  ;;  %v2539_v23 = vld [vmem:[%s6513_s21 + $0xe0] sm:$0xff]  ;;  %v2536_v21 = vld [vmem:[%s6513_s21 + $0xc8] sm:$0xff] }
 0x3d8   : > { %v2292_v8 = vpop.permute.xlu0 %2291  ;;  %v2308_v26 = vpop.permute.xlu1 %2307  ;;  %v2442_v20 = vmax.f32 %v2426_v45, 0.0  ;;  %v2439_v15 = vmax.f32 %v2423_v35, 0.0  ;;  %v2354_v11 = vadd.f32 %v2338_v2, %v5720_v49  ;;  %v2523_v35 = vld [vmem:[%s6513_s21 + $0x60] sm:$0xff] }
 0x3d9   : > { %v2317_v13 = vsel %vm2309_vm9, %v2292_v8, %v2308_v26  ;;  %v2325_v57 = vsel %vm2309_vm9, %v2308_v26, %v2292_v8  ;;  %v2519_v2 = vld [vmem:[%s6513_s21 + $0x40] sm:$0xff] }
 0x3da   : > { %v2347_v47 = vmul.f32 %v5770_v44, %v2317_v13  ;;  %v2348_v33 = vmul.f32 %v5772_v34, %v2325_v57  ;;  %v2294_v38 = vpop.permute.xlu2 %2293  ;;  %v2437_v13 = vmax.f32 %v2421_v25, 0.0  ;;  %v2438_v57 = vmax.f32 %v2422_v43, 0.0  ;;  %v2537_v25 = vld [vmem:[%s6513_s21 + $0xd0] sm:$0xff]  ;;  %v2520_v43 = vld [vmem:[%s6513_s21 + $0x48] sm:$0xff] }
 0x3dc   : > { %v2363_v41 = vadd.f32 %v2347_v47, %v2275_v53  ;;  %v2364_v16 = vadd.f32 %v2348_v33, %v2276_v22  ;;  %v2355_v53 = vadd.f32 %v2339_v5, %v2267_v24  ;;  %v2441_v22 = vmax.f32 %v2425_v10, 0.0 }
 0x3de   : > { %v2427_v8 = vadd.f32 %v4763_v32, %v2363_v41  ;;  %v2428_v50 = vadd.f32 %v4763_v32, %v2364_v16 }
 0x3e0   : > { %v2443_v1 = vmax.f32 %v2427_v8, 0.0  ;;  %v2444_v32 = vmax.f32 %v2428_v50, 0.0  ;;  %v2391_v51 = vpop.permute.xlu0 %2390  ;;  %v2280_v17 = vpop.permute.xlu1 %2279 }
 0x3e1   : > { %v2419_v39 = vadd.f32 %v2391_v51, %v2355_v53  ;;  %v2420_v26 = vadd.f32 %v2391_v51, %v2356_v31  ;;  %v2311_v33 = vsel %vm2309_vm9, %v2280_v17, %v2296_v12  ;;  %v2319_v29 = vsel %vm2309_vm9, %v2296_v12, %v2280_v17  ;;  %v2524_v51 = vld [vmem:[%s6513_s21 + $0x68] sm:$0xff]  ;;  %v2522_v53 = vld [vmem:[%s6513_s21 + $0x58] sm:$0xff] }
 0x3e2   : > { %2473 = vmatpush.msra.mxu0 %v2443_v1  ;;  %2496 = vmatpush.msra.mxu1 %v2444_v32  ;;  %v2335_v12 = vmul.f32 %v5770_v44, %v2311_v33  ;;  %v2336_v16 = vmul.f32 %v5772_v34, %v2319_v29  ;;  %v2376_v50 = vpop.permute.xlu2 %2375  ;;  %v2525_v1 = vld [vmem:[%s6513_s21 + $0x70] sm:$0xff]  ;;  %v2540_v17 = vld [vmem:[%s6513_s21 + $0xe8] sm:$0xff]  ;;  %v2538_v31 = vld [vmem:[%s6513_s21 + $0xd8] sm:$0xff] }
 0x3e3   : > { %v2435_v40 = vmax.f32 %v2419_v39, 0.0  ;;  %v2436_v47 = vmax.f32 %v2420_v26, 0.0  ;;  %v2541_v32 = vld [vmem:[%s6513_s21 + $0xf0] sm:$0xff]  ;;  %v2535_v39 = vld [vmem:[%s6513_s21 + $0xc0] sm:$0xff]  ;;  %v2518_v26 = vld [vmem:[%s6513_s21 + $0x38] sm:$0xff] }
 0x3e4   : > { %2474 = vmatpush.msra.mxu0 %v2441_v22  ;;  %2497 = vmatpush.msra.mxu1 %v2442_v20  ;;  %v2351_v28 = vadd.f32 %v2335_v12, %v5698_v27  ;;  %v2352_v8 = vadd.f32 %v2336_v16, %v5701_v52  ;;  %v2542_v27 = vld [vmem:[%s6513_s21 + $0xf8] sm:$0xff]  ;;  %v2445_v52 = vld [vmem:[%s6567_s28] sm:$0xff]  ;;  %v2446_v22 = vld [vmem:[%s6567_s28 + $0x8] sm:$0xff] }
 0x3e5   : > { %v2521_v20 = vld [vmem:[%s6513_s21 + $0x50] sm:$0xff]  ;;  %v2634_v12 = vld [vmem:[%s6514_s22 + $0x68] sm:$0xff] }
 0x3e6   : > { %2475 = vmatpush.msra.mxu0 %v2439_v15  ;;  %2498 = vmatpush.msra.mxu1 %v2440_v42  ;;  %v2534_v15 = vld [vmem:[%s6513_s21 + $0xb8] sm:$0xff]  ;;  %v2517_v42 = vld [vmem:[%s6513_s21 + $0x30] sm:$0xff]  ;;  %v2650_v16 = vld [vmem:[%s6514_s22 + $0xe8] sm:$0xff] }
 0x3e7   : > { %v2513_v33 = vld [vmem:[%s6513_s21 + $0x10] sm:$0xff] }
 0x3e8   : > { %v2386_v48 = vpop.permute.xlu0 %2385  ;;  %v2278_v37 = vpop.permute.xlu1 %2277  ;;  %2476 = vmatpush.msra.mxu0 %v2437_v13  ;;  %2499 = vmatpush.msra.mxu1 %v2438_v57  ;;  %v2516_v13 = vld [vmem:[%s6513_s21 + $0x28] sm:$0xff]  ;;  %v2529_v29 = vld [vmem:[%s6513_s21 + $0x90] sm:$0xff] }
 0x3e9   : > { %v2417_v3 = vadd.f32 %v2386_v48, %v2353_v30  ;;  %v2418_v9 = vadd.f32 %v2386_v48, %v2354_v11  ;;  %v2310_v14 = vsel %vm2309_vm9, %v2278_v37, %v2294_v38  ;;  %v2318_v6 = vsel %vm2309_vm9, %v2294_v38, %v2278_v37  ;;  %v2533_v38 = vld [vmem:[%s6513_s21 + $0xb0] sm:$0xff]  ;;  %v2532_v57 = vld [vmem:[%s6513_s21 + $0xa8] sm:$0xff]  ;;  %v2515_v30 = vld [vmem:[%s6513_s21 + $0x20] sm:$0xff] }
 0x3ea   : > { %v2333_v49 = vmul.f32 %v5770_v44, %v2310_v14  ;;  %v2334_v41 = vmul.f32 %v5772_v34, %v2318_v6  ;;  %2477 = vmatpush.msra.mxu0 %v2435_v40  ;;  %2500 = vmatpush.msra.mxu1 %v2436_v47  ;;  %v2531_v11 = vld [vmem:[%s6513_s21 + $0xa0] sm:$0xff]  ;;  %v2514_v40 = vld [vmem:[%s6513_s21 + $0x18] sm:$0xff]  ;;  %v2512_v48 = vld [vmem:[%s6513_s21 + $0x8] sm:$0xff] }
 0x3eb   : > { %v2433_v5 = vmax.f32 %v2417_v3, 0.0  ;;  %v2434_v54 = vmax.f32 %v2418_v9, 0.0  ;;  %v2530_v47 = vld [vmem:[%s6513_s21 + $0x98] sm:$0xff]  ;;  %v2528_v37 = vld [vmem:[%s6513_s21 + $0x88] sm:$0xff]  ;;  %v2511_v3 = vld [vmem:[%s6513_s21] sm:$0xff] }
 0x3ec   : > { %v2349_v7 = vadd.f32 %v2333_v49, %v5679_v46  ;;  %v2350_v19 = vadd.f32 %v2334_v41, %v5682_v18  ;;  %v2526_v18 = vld [vmem:[%s6513_s21 + $0x78] sm:$0xff]  ;;  %v2527_v9 = vld [vmem:[%s6513_s21 + $0x80] sm:$0xff]  ;;  %v2635_v49 = vld [vmem:[%s6514_s22 + $0x70] sm:$0xff] }
 0x3ed   : > { %2478 = vmatpush.msra.mxu0 %v2433_v5  ;;  %2501 = vmatpush.msra.mxu1 %v2434_v54  ;;  %v2636_v14 = vld [vmem:[%s6514_s22 + $0x78] sm:$0xff]  ;;  %v2651_v41 = vld [vmem:[%s6514_s22 + $0xf0] sm:$0xff]  ;;  %v2633_v5 = vld [vmem:[%s6514_s22 + $0x60] sm:$0xff] }
 0x3ee   : > { %v2413_v36 = vadd.f32 %v2376_v50, %v2349_v7  ;;  %v2414_v44 = vadd.f32 %v2376_v50, %v2350_v19  ;;  %v2652_v6 = vld [vmem:[%s6514_s22 + $0xf8] sm:$0xff]  ;;  %v2649_v54 = vld [vmem:[%s6514_s22 + $0xe0] sm:$0xff]  ;;  %v2630_v50 = vld [vmem:[%s6514_s22 + $0x48] sm:$0xff] }
 0x3ef   : > { %v2632_v7 = vld [vmem:[%s6514_s22 + $0x58] sm:$0xff] }
 0x3f0   : > { %v2381_v10 = vpop.permute.xlu1 %2380  ;;  %v2429_v60 = vmax.f32 %v2413_v36, 0.0  ;;  %v2430_v46 = vmax.f32 %v2414_v44, 0.0  ;;  %v2648_v19 = vld [vmem:[%s6514_s22 + $0xd8] sm:$0xff] }
 0x3f1   : > { %v2415_v45 = vadd.f32 %v2381_v10, %v2351_v28  ;;  %v2416_v24 = vadd.f32 %v2381_v10, %v2352_v8  ;;  %v2631_v28 = vld [vmem:[%s6514_s22 + $0x50] sm:$0xff]  ;;  %v2646_v10 = vld [vmem:[%s6514_s22 + $0xc8] sm:$0xff]  ;;  %v2628_v36 = vld [vmem:[%s6514_s22 + $0x38] sm:$0xff] }
 0x3f2   : > { %v2647_v8 = vld [vmem:[%s6514_s22 + $0xd0] sm:$0xff]  ;;  %v2644_v44 = vld [vmem:[%s6514_s22 + $0xb8] sm:$0xff] }
 0x3f3   : > { %v2431_v4 = vmax.f32 %v2415_v45, 0.0  ;;  %v2432_v34 = vmax.f32 %v2416_v24, 0.0  ;;  %v2629_v45 = vld [vmem:[%s6514_s22 + $0x40] sm:$0xff] }
 0x3f4   : > { %v2645_v24 = vld [vmem:[%s6514_s22 + $0xc0] sm:$0xff] }
 0x3f5   : > { %2479 = vmatpush.msra.mxu0 %v2431_v4  ;;  %2502 = vmatpush.msra.mxu1 %v2432_v34  ;;  %v2627_v4 = vld [vmem:[%s6514_s22 + $0x30] sm:$0xff] }
 0x3f6   : > { %v2643_v34 = vld [vmem:[%s6514_s22 + $0xb0] sm:$0xff] }
 0x3f7   : > { %2480 = vmatpush.msra.mxu0 %v2429_v60  ;;  %2503 = vmatpush.msra.mxu1 %v2430_v46  ;;  %v2626_v60 = vld [vmem:[%s6514_s22 + $0x28] sm:$0xff] }
 0x3f8   : > { %4072 = vmatmul.msk.f32.vlgmr.msra.gmra.mxu0 %vm977_vm1, %v2445_v52  ;;  %4074 = vmatmul.msk.f32.vlgmr.msra.gmra.mxu1 %vm977_vm1, %v2445_v52  ;;  %v2642_v46 = vld [vmem:[%s6514_s22 + $0xa8] sm:$0xff]  ;;  %v2624_v52 = vld [vmem:[%s6514_s22 + $0x18] sm:$0xff] }
 0x3f9   : > { %2543 = vmatpush.msrb.mxu0 %v2526_v18  ;;  %2582 = vmatpush.msrb.mxu1 %v2542_v27  ;;  %v2625_v18 = vld [vmem:[%s6514_s22 + $0x20] sm:$0xff] }
 0x3fa   : > { %v2641_v27 = vld [vmem:[%s6514_s22 + $0xa0] sm:$0xff] }
 0x3fb   : > { %2544 = vmatpush.msrb.mxu0 %v2525_v1  ;;  %2583 = vmatpush.msrb.mxu1 %v2541_v32  ;;  %v2640_v1 = vld [vmem:[%s6514_s22 + $0x98] sm:$0xff]  ;;  %v2623_v32 = vld [vmem:[%s6514_s22 + $0x10] sm:$0xff] }
 0x3fd   : > { %2545 = vmatpush.msrb.mxu0 %v2524_v51  ;;  %2584 = vmatpush.msrb.mxu1 %v2540_v17  ;;  %v2639_v51 = vld [vmem:[%s6514_s22 + $0x90] sm:$0xff]  ;;  %v2622_v17 = vld [vmem:[%s6514_s22 + $0x8] sm:$0xff] }
 0x3ff   : > { %2546 = vmatpush.msrb.mxu0 %v2523_v35  ;;  %2585 = vmatpush.msrb.mxu1 %v2539_v23  ;;  %v2638_v35 = vld [vmem:[%s6514_s22 + $0x88] sm:$0xff]  ;;  %v2621_v23 = vld [vmem:[%s6514_s22] sm:$0xff] }
 0x400   : > { %4073 = vmatmul.msk.f32.gmra.mxu0 %vm977_vm1, %v2446_v22  ;;  %4075 = vmatmul.msk.f32.gmra.mxu1 %vm977_vm1, %v2446_v22  ;;  %v6569_v22 = vld [vmem:[#allocation9_spill] sm:$0xff] }
 0x401   : > { %2547 = vmatpush.msrb.mxu0 %v2522_v53  ;;  %2586 = vmatpush.msrb.mxu1 %v2538_v31  ;;  %v2637_v53 = vld [vmem:[%s6514_s22 + $0x80] sm:$0xff]  ;;  %v6568_v31 = vld [vmem:[#allocation8_spill] sm:$0xff] }
 0x403   : > { %2548 = vmatpush.msrb.mxu0 %v2521_v20  ;;  %2587 = vmatpush.msrb.mxu1 %v2537_v25  ;;  %v4226_v20 = vld [vmem:[%s4395_s25 + $0x10] sm:$0xff]  ;;  %v4227_v25 = vld [vmem:[%s4395_s25 + $0x18] sm:$0xff] }
 0x405   : > { %2549 = vmatpush.msrb.mxu0 %v2520_v43  ;;  %2588 = vmatpush.msrb.mxu1 %v2536_v21  ;;  %v4228_v43 = vld [vmem:[%s4395_s25] sm:$0xff]  ;;  %v4229_v21 = vld [vmem:[%s4395_s25 + $0x8] sm:$0xff]  ;;  %s6578_s25 = sld [smem:[#allocation18_spill]] }
 0x407   : > { %2550 = vmatpush.msrb.mxu0 %v2519_v2  ;;  %2589 = vmatpush.msrb.mxu1 %v2535_v39  ;;  %v6570_v2 = vld [vmem:[#allocation6_spill] sm:$0xff]  ;;  %v6571_v39 = vld [vmem:[#allocation7_spill] sm:$0xff] }
 0x409   : > { %2551 = vmatpush.msrb.mxu0 %v2518_v26  ;;  %2590 = vmatpush.msrb.mxu1 %v2534_v15  ;;  %v6572_v26 = vld [vmem:[#allocation4_spill] sm:$0xff]  ;;  %v6573_v15 = vld [vmem:[#allocation5_spill] sm:$0xff] }
 0x40b   : > { %2552 = vmatpush.msrb.mxu0 %v2517_v42  ;;  %2591 = vmatpush.msrb.mxu1 %v2533_v38  ;;  %v6574_v42 = vld [vmem:[#allocation2_spill] sm:$0xff]  ;;  %v6575_v38 = vld [vmem:[#allocation3_spill] sm:$0xff] }
 0x40d   : > { %2553 = vmatpush.msrb.mxu0 %v2516_v13  ;;  %2592 = vmatpush.msrb.mxu1 %v2532_v57  ;;  %v2844_v13 = vld [vmem:[%s6576_s6 + $0x8] sm:$0xff]  ;;  %v2843_v57 = vld [vmem:[%s6576_s6] sm:$0xff] }
 0x40f   : > { %2554 = vmatpush.msrb.mxu0 %v2515_v30  ;;  %2593 = vmatpush.msrb.mxu1 %v2531_v11 }
 0x411   : > { %2555 = vmatpush.msrb.mxu0 %v2514_v40  ;;  %2594 = vmatpush.msrb.mxu1 %v2530_v47  ;;  %v6115_v40 = vld [vmem:[%s6511_s19 + $0x10] sm:$0xff]  ;;  %v6120_v47 = vld [vmem:[%s6511_s19 + $0x18] sm:$0xff] }
 0x413   : > { %2556 = vmatpush.msrb.mxu0 %v2513_v33  ;;  %2595 = vmatpush.msrb.mxu1 %v2529_v29 }
 0x415   : > { %2557 = vmatpush.msrb.mxu0 %v2512_v48  ;;  %2596 = vmatpush.msrb.mxu1 %v2528_v37  ;;  %v2731_v48 = vld [vmem:[%s6508_s16] sm:$0xff] }
 0x416   : > { %v6130_v37 = vld [vmem:[%s6512_s20] sm:$0xff] }
 0x417   : > { %2558 = vmatpush.msrb.mxu0 %v2511_v3  ;;  %2597 = vmatpush.msrb.mxu1 %v2527_v9  ;;  %v6135_v3 = vld [vmem:[%s6512_s20 + $0x8] sm:$0xff] }
 0x418   : > { %2559 = vmatmul.f32.vlgmr.msrb.gmra.mxu0 %v4525_v63  ;;  %2598 = vmatmul.f32.vlgmr.msrb.gmra.mxu1 %v4530_v0 }
 0x419   : > { %2653 = vmatpush.msra.mxu0 %v2636_v14  ;;  %2692 = vmatpush.msra.mxu1 %v2652_v6 }
 0x41b   : > { %2654 = vmatpush.msra.mxu0 %v2635_v49  ;;  %2693 = vmatpush.msra.mxu1 %v2651_v41  ;;  %v6142_v41 = vld [vmem:[%s6512_s20 + $0x10] sm:$0xff] }
 0x41d   : > { %2655 = vmatpush.msra.mxu0 %v2634_v12  ;;  %2694 = vmatpush.msra.mxu1 %v2650_v16  ;;  %v6147_v12 = vld [vmem:[%s6512_s20 + $0x18] sm:$0xff] }
 0x41f   : > { %2656 = vmatpush.msra.mxu0 %v2633_v5  ;;  %2695 = vmatpush.msra.mxu1 %v2649_v54 }
 0x420   : > { %2561 = vmatmul.f32.gmra.mxu0 %v4517_v61  ;;  %2600 = vmatmul.f32.gmra.mxu1 %v4521_v62 }
 0x421   : > { %2657 = vmatpush.msra.mxu0 %v2632_v7  ;;  %2696 = vmatpush.msra.mxu1 %v2648_v19 }
 0x423   : > { %2658 = vmatpush.msra.mxu0 %v2631_v28  ;;  %2697 = vmatpush.msra.mxu1 %v2647_v8 }
 0x425   : > { %2659 = vmatpush.msra.mxu0 %v2630_v50  ;;  %2698 = vmatpush.msra.mxu1 %v2646_v10 }
 0x427   : > { %2660 = vmatpush.msra.mxu0 %v2629_v45  ;;  %2699 = vmatpush.msra.mxu1 %v2645_v24 }
 0x428   : > { %2563 = vmatmul.f32.gmra.mxu0 %v4509_v58  ;;  %2602 = vmatmul.f32.gmra.mxu1 %v4513_v59 }
 0x429   : > { %2661 = vmatpush.msra.mxu0 %v2628_v36  ;;  %2700 = vmatpush.msra.mxu1 %v2644_v44 }
 0x42b   : > { %2662 = vmatpush.msra.mxu0 %v2627_v4  ;;  %2701 = vmatpush.msra.mxu1 %v2643_v34 }
 0x42d   : > { %2663 = vmatpush.msra.mxu0 %v2626_v60  ;;  %2702 = vmatpush.msra.mxu1 %v2642_v46 }
 0x42f   : > { %2664 = vmatpush.msra.mxu0 %v2625_v18  ;;  %2703 = vmatpush.msra.mxu1 %v2641_v27 }
 0x430   : > { %2566 = vmatmul.f32.gmra.mxu0 %v4501_v55  ;;  %2605 = vmatmul.f32.gmra.mxu1 %v4505_v56 }
 0x431   : > { %2665 = vmatpush.msra.mxu0 %v2624_v52  ;;  %2704 = vmatpush.msra.mxu1 %v2640_v1 }
 0x433   : > { %2666 = vmatpush.msra.mxu0 %v2623_v32  ;;  %2705 = vmatpush.msra.mxu1 %v2639_v51 }
 0x435   : > { %2667 = vmatpush.msra.mxu0 %v2622_v17  ;;  %2706 = vmatpush.msra.mxu1 %v2638_v35 }
 0x437   : > { %2668 = vmatpush.msra.mxu0 %v2621_v23  ;;  %2707 = vmatpush.msra.mxu1 %v2637_v53 }
 0x438   : > { %2569 = vmatmul.f32.gmra.mxu0 %v6568_v31  ;;  %2608 = vmatmul.f32.gmra.mxu1 %v6569_v22 }
 0x439   : > { %2757 = vmatpush.xpose.msrb.mxu0 %v4226_v20  ;;  %2780 = vmatpush.xpose.msrb.mxu1 %v4227_v25 }
 0x43d   : > { %2758 = vmatpush.xpose.msrb.mxu0 %v4228_v43  ;;  %2781 = vmatpush.xpose.msrb.mxu1 %v4229_v21 }
 0x440   : > { %2572 = vmatmul.f32.gmra.mxu0 %v6570_v2  ;;  %2611 = vmatmul.f32.gmra.mxu1 %v6571_v39 }
 0x448   : > { %2575 = vmatmul.f32.gmra.mxu0 %v6572_v26  ;;  %2614 = vmatmul.f32.gmra.mxu1 %v6573_v15 }
 0x450   : > { %2578 = vmatmul.f32.gmra.mxu0 %v6574_v42  ;;  %2617 = vmatmul.f32.gmra.mxu1 %v6575_v38 }
 0x458   : > { %2669 = vmatmul.f32.vlgmr.msra.gmra.mxu0 %v4525_v63  ;;  %2708 = vmatmul.f32.vlgmr.msra.gmra.mxu1 %v4530_v0  ;;  %v6102_v0 = vld [vmem:[%s6511_s19 + $0x8] sm:$0xff] }
 0x459   : > { %2809 = vmatpush.xpose.msra.mxu0 %v4226_v20  ;;  %2832 = vmatpush.xpose.msra.mxu1 %v4227_v25  ;;  %v2732_v20 = vld [vmem:[%s6508_s16 + $0x8] sm:$0xff] }
 0x45d   : > { %2810 = vmatpush.xpose.msra.mxu0 %v4228_v43  ;;  %2833 = vmatpush.xpose.msra.mxu1 %v4229_v21 }
 0x460   : > { %2671 = vmatmul.f32.gmra.mxu0 %v4517_v61  ;;  %2710 = vmatmul.f32.gmra.mxu1 %v4521_v62  ;;  %v6097_v62 = vld [vmem:[%s6511_s19] sm:$0xff] }
 0x468   : > { %2673 = vmatmul.f32.gmra.mxu0 %v4509_v58  ;;  %2712 = vmatmul.f32.gmra.mxu1 %v4513_v59 }
 0x470   : > { %2676 = vmatmul.f32.gmra.mxu0 %v4501_v55  ;;  %2715 = vmatmul.f32.gmra.mxu1 %v4505_v56 }
 0x475   : > { %v6082_v63 = vpop.f32.mrf.mxu0  ;;  %v6084_v61 = vpop.f32.mrf.mxu1 }
 0x478   : > { %2679 = vmatmul.f32.gmra.mxu0 %v6568_v31  ;;  %2718 = vmatmul.f32.gmra.mxu1 %v6569_v22 }
 0x47d   : > { %v6088_v58 = vpop.f32.mrf.mxu0  ;;  %v6090_v55 = vpop.f32.mrf.mxu1 }
 0x480   : > { %2682 = vmatmul.f32.gmra.mxu0 %v6570_v2  ;;  %2721 = vmatmul.f32.gmra.mxu1 %v6571_v39 }
 0x488   : > { %2685 = vmatmul.f32.gmra.mxu0 %v6572_v26  ;;  %2724 = vmatmul.f32.gmra.mxu1 %v6573_v15 }
 0x490   : > { %2688 = vmatmul.f32.gmra.mxu0 %v6574_v42  ;;  %2727 = vmatmul.f32.gmra.mxu1 %v6575_v38 }
 0x495   : > { %v2560_v56 = vpop.f32.mrf.mxu0  ;;  %v2599_v59 = vpop.f32.mrf.mxu1 }
 0x498   : > { %2759 = vmatmul.f32.vlgmr.msrb.gmra.mxu0 %v6097_v62  ;;  %2782 = vmatmul.f32.vlgmr.msrb.gmra.mxu1 %v6102_v0 }
 0x499   : > { %2869 = vmatpush.msrb.mxu0 %v2844_v13  ;;  %2902 = vmatpush.msrb.mxu1 %v2844_v13 }
 0x49b   : > { %2870 = vmatpush.msrb.mxu0 %v2843_v57  ;;  %2903 = vmatpush.msrb.mxu1 %v2843_v57 }
 0x49d   : > { %v2562_v30 = vpop.f32.mrf.mxu0  ;;  %v2601_v11 = vpop.f32.mrf.mxu1 }
 0x4a0   : > { %2762 = vmatmul.f32.gmra.mxu0 %v6115_v40  ;;  %2785 = vmatmul.f32.gmra.mxu1 %v6120_v47 }
 0x4a5   : > { %v2564_v33 = vpop.f32.mrf.mxu0  ;;  %v2603_v29 = vpop.f32.mrf.mxu1 }
 0x4a6   : > { %v2604_v9 = vadd.f32 %v2603_v29, %v2564_v33 }
 0x4a8   : > { %v2733_v14 = vadd.f32 %v2731_v48, %v2604_v9  ;;  %2811 = vmatmul.f32.vlgmr.msra.gmra.mxu0 %v6130_v37  ;;  %2834 = vmatmul.f32.vlgmr.msra.gmra.mxu1 %v6135_v3 }
 0x4aa   : > { %2937 = vmatpush.msra.mxu0 %v2733_v14 }
 0x4ad   : > { %v2567_v6 = vpop.f32.mrf.mxu0  ;;  %v2606_v49 = vpop.f32.mrf.mxu1 }
 0x4ae   : > { %v2607_v35 = vadd.f32 %v2606_v49, %v2567_v6  ;;  %v4177_v49 = vld [vmem:[%s6577_s8] ss:$0 sm:$0xff] }
 0x4b0   : > { %2814 = vmatmul.f32.gmra.mxu0 %v6142_v41  ;;  %2837 = vmatmul.f32.gmra.mxu1 %v6147_v12  ;;  %v2734_v21 = vadd.f32 %v2732_v20, %v2607_v35 }
 0x4b5   : > { %v6151_v16 = vpop.f32.mrf.mxu0  ;;  %v6153_v5 = vpop.f32.mrf.mxu1 }
 0x4bd   : > { %v6155_v54 = vpop.f32.mrf.mxu0  ;;  %v6157_v7 = vpop.f32.mrf.mxu1 }
 0x4c5   : > { %v6159_v19 = vpop.f32.mrf.mxu0  ;;  %v6161_v28 = vpop.f32.mrf.mxu1 }
 0x4cd   : > { %v6163_v8 = vpop.f32.mrf.mxu0  ;;  %v6165_v50 = vpop.f32.mrf.mxu1 }
 0x4d5   : > { %v2670_v10 = vpop.f32.mrf.mxu0  ;;  %v2709_v45 = vpop.f32.mrf.mxu1 }
 0x4dd   : > { %v2672_v24 = vpop.f32.mrf.mxu0  ;;  %v2711_v36 = vpop.f32.mrf.mxu1 }
 0x4de   : > { %v2878_v24 = vld [vmem:[%s6507_s15] sm:$0xff] }
 0x4df   : > { %v2735_v36 = vld [vmem:[%s6510_s18] sm:$0xff] }
 0x4e5   : > { %v2674_v44 = vpop.f32.mrf.mxu0  ;;  %v2713_v4 = vpop.f32.mrf.mxu1 }
 0x4e6   : > { %v2714_v10 = vadd.f32 %v2713_v4, %v2674_v44  ;;  %v2879_v44 = vld [vmem:[%s6507_s15 + $0x8] sm:$0xff] }
 0x4ed   : > { %v6167_v34 = vpop.f32.mrf.mxu0  ;;  %v2716_v60 = vpop.f32.mrf.mxu1 }
 0x4f5   : > { %v6169_v46 = vpop.f32.mrf.mxu0  ;;  %v6171_v18 = vpop.f32.mrf.mxu1 }
 0x4fd   : > { %v6173_v27 = vpop.f32.mrf.mxu0  ;;  %v6175_v52 = vpop.f32.mrf.mxu1 }
 0x505   : > { %v6177_v1 = vpop.f32.mrf.mxu0  ;;  %v6179_v32 = vpop.f32.mrf.mxu1 }
 0x50d   : > { %v6181_v51 = vpop.f32.mrf.mxu0  ;;  %v6183_v17 = vpop.f32.mrf.mxu1 }
 0x515   : > { %v2760_v23 = vpop.f32.mrf.mxu0  ;;  %v2783_v53 = vpop.f32.mrf.mxu1 }
 0x516   : > { %v2784_v25 = vadd.f32 %v2783_v53, %v2760_v23  ;;  %v2737_v53 = vadd.f32 %v2735_v36, %v2714_v10 }
 0x518   : > { %v2789_v43 = vmul.f32 0.0625, %v2784_v25 }
 0x51a   : > { %4076 = vmatmul.msk.f32.vlgmr.msrb.gmra.mxu0 %vm798_vm0, %v2789_v43 }
 0x51b   : > { %3053 = vmatpush.msrb.mxu0 %v2734_v21  ;;  %v2911_v21 = vld [vmem:[%s6509_s17] sm:$0xff] }
 0x51d   : > { %v2763_v56 = vpop.f32.mrf.mxu0  ;;  %v2786_v59 = vpop.f32.mrf.mxu1 }
 0x51e   : > { %v2787_v13 = vadd.f32 %v2786_v59, %v2763_v56 }
 0x520   : > { %v2790_v57 = vmul.f32 0.0625, %v2787_v13 }
 0x522   : > { %4077 = vmatmul.msk.f32.gmra.mxu0 %vm798_vm0, %v2790_v57  ;;  %v2912_v57 = vld [vmem:[%s6509_s17 + $0x8] sm:$0xff] }
 0x525   : > { %v2812_v30 = vpop.f32.mrf.mxu0  ;;  %v2835_v11 = vpop.f32.mrf.mxu1 }
 0x526   : > { %v2836_v33 = vadd.f32 %v2835_v11, %v2812_v30 }
 0x528   : > { %v2841_v29 = vmul.f32 0.0625, %v2836_v33  ;;  %v2717_v33 = vadd.f32 %v2716_v60, %v6167_v34 }
 0x52a   : > { %4078 = vmatmul.msk.f32.vlgmr.msrb.gmra.mxu1 %vm798_vm0, %v2841_v29  ;;  %v2736_v29 = vld [vmem:[%s6510_s18 + $0x8] sm:$0xff] }
 0x52d   : > { %v2815_v48 = vpop.f32.mrf.mxu0  ;;  %v2838_v9 = vpop.f32.mrf.mxu1 }
 0x52e   : > { %v2839_v14 = vadd.f32 %v2838_v9, %v2815_v48  ;;  %v2738_v48 = vadd.f32 %v2736_v29, %v2717_v33 }
 0x530   : > { %v2842_v6 = vmul.f32 0.0625, %v2839_v14 }
 0x532   : > { %4079 = vmatmul.msk.f32.gmra.mxu1 %vm798_vm0, %v2842_v6 }
 0x597   : > { %v2872_v45 = vpop.f32.mrf.mxu0 }
 0x598   : > { %v2873_v35 = vadd.f32 %v4177_v49, %v2872_v45 }
 0x59a   : > { %v2880_v23 = vadd.f32 %v2878_v24, %v2873_v35 }
 0x59c   : > { %3030 = vrot.lane.b32.xlu0 %v2880_v23, %s4247_s7  ;;  %4080 = vmatmul.msk.f32.vlgmr.msra.gmra.mxu0 %vm2915_vm10, %v2880_v23 }
 0x59d   : > { %3167 = vmatpush.msra.mxu0 %v2737_v53 }
 0x59f   : > { %v2875_v20 = vpop.f32.mrf.mxu0 }
 0x5a0   : > { %v2876_v4 = vadd.f32 %v4177_v49, %v2875_v20 }
 0x5a2   : > { %v2881_v25 = vadd.f32 %v2879_v44, %v2876_v4 }
 0x5a4   : > { %3032 = vrot.lane.b32.xlu1 %v2881_v25, %s4247_s7  ;;  %4081 = vmatmul.msk.f32.gmra.mxu0 %vm2915_vm10, %v2881_v25 }
 0x5a7   : > { %v2905_v43 = vpop.f32.mrf.mxu1 }
 0x5a8   : > { %v2906_v56 = vadd.f32 %v4177_v49, %v2905_v43 }
 0x5aa   : > { %v2913_v59 = vadd.f32 %v2911_v21, %v2906_v56 }
 0x5ac   : > { %3260 = vrot.lane.b32.xlu2 %v2913_v59, %s4247_s7 }
 0x5af   : > { %v2908_v13 = vpop.f32.mrf.mxu1 }
 0x5b0   : > { %v2909_v30 = vadd.f32 %v4177_v49, %v2908_v13 }
 0x5b2   : > { %v2914_v11 = vadd.f32 %v2912_v57, %v2909_v30 }
 0x5b4   : > { %3262 = vrot.lane.b32.xlu0 %v2914_v11, %s4247_s7  ;;  %s6470_s7 = scalar_lea.vmem %s6516_s24, %s6585_s30 }
 0x606   : > { %v3261_v24 = vpop.permute.xlu2 %3260 }
 0x60e   : > { %v3031_v9 = vpop.permute.xlu0 %3030 }
 0x60f   : > { %4086 = vmatmul.msk.f32.vlgmr.msrb.gmra.mxu0 %vm2915_vm10, %v3031_v9 }
 0x610   : > { %3283 = vmatpush.msrb.mxu0 %v2738_v48 }
 0x616   : > { %v3033_v14 = vpop.permute.xlu1 %3032 }
 0x617   : > { %4087 = vmatmul.msk.f32.gmra.mxu0 %vm2915_vm10, %v3033_v14 }
 0x619   : > { %v2939_v6 = vpop.f32.mrf.mxu0 }
 0x61a   : > { %v2945_v10 = vmul.f32 0.35355338, %v2939_v6 }
 0x61c   : > { %v2947_v49 = vsel %vm798_vm0, %v2945_v10, -inf }
 0x61d   : > { %2948 = vmax.xlane.f32.xlu2 %v2947_v49 }
 0x61f   : > { %4092 = vmatmul.msk.f32.vlgmr.msra.gmra.mxu0 %vm2915_vm10, %v2913_v59 }
 0x621   : > { %v2942_v34 = vpop.f32.mrf.mxu0 }
 0x622   : > { %v2946_v60 = vmul.f32 0.35355338, %v2942_v34 }
 0x624   : > { %v2950_v45 = vsel %vm798_vm0, %v2946_v60, -inf }
 0x625   : > { %2951 = vmax.xlane.f32.xlu1 %v2950_v45 }
 0x626   : > { %v3263_v36 = vpop.permute.xlu0 %3262 }
 0x627   : > { %4093 = vmatmul.msk.f32.gmra.mxu0 %vm2915_vm10, %v2914_v11 }
 0x62f   : > { %4098 = vmatmul.msk.f32.vlgmr.msrb.gmra.mxu0 %vm2915_vm10, %v3261_v24 }
 0x637   : > { %4099 = vmatmul.msk.f32.gmra.mxu0 %vm2915_vm10, %v3263_v36 }
 0x68c   : > { %v3055_v35 = vpop.f32.mrf.mxu0 }
 0x68d   : > { %v3061_v23 = vmul.f32 0.35355338, %v3055_v35 }
 0x68f   : > { %v3063_v53 = vsel %vm798_vm0, %v3061_v23, -inf }
 0x690   : > { %3064 = vmax.xlane.f32.xlu2 %v3063_v53  ;;  %v2949_v33 = vpop.xlane.xlu2 %2948 }
 0x691   : > { %v2953_v14 = vsub.f32 %v2945_v10, %v2949_v33 }
 0x693   : > { %v2955_v34 = vmul.f32 1.442695, %v2953_v14 }
 0x694   : > { %v3058_v20 = vpop.f32.mrf.mxu0 }
 0x695   : > { %v3062_v44 = vmul.f32 0.35355338, %v3058_v20 }
 0x697   : > { %v3066_v4 = vsel %vm798_vm0, %v3062_v44, -inf }
 0x698   : > { %3067 = vmax.xlane.f32.xlu0 %v3066_v4  ;;  %v2952_v25 = vpop.xlane.xlu1 %2951 }
 0x699   : > { %v2954_v56 = vsub.f32 %v2946_v60, %v2952_v25 }
 0x69b   : > { %v2957_v13 = vmul.f32 1.442695, %v2954_v56 }
 0x69c   : > { %v3169_v43 = vpop.f32.mrf.mxu0 }
 0x69d   : > { %v3175_v21 = vmul.f32 0.35355338, %v3169_v43  ;;  %4178 = vpow2.f32 %v2957_v13 }
 0x69e   : > { %4180 = vpow2.f32 %v2955_v34 }
 0x69f   : > { %v3177_v59 = vsel %vm798_vm0, %v3175_v21, -inf }
 0x6a0   : > { %3178 = vmax.xlane.f32.xlu2 %v3177_v59 }
 0x6a3   : > { %v6228_v29 = vpop.eup %4178 }
 0x6a4   : > { %v3172_v57 = vpop.f32.mrf.mxu0  ;;  %v2962_v49 = vsel %vm798_vm0, %v6228_v29, 0.0  ;;  %v6234_v36 = vpop.eup %4180 }
 0x6a5   : > { %v3176_v30 = vmul.f32 0.35355338, %v3172_v57  ;;  %v2959_v35 = vsel %vm798_vm0, %v6234_v36, 0.0 }
 0x6a7   : > { %v3180_v11 = vsel %vm798_vm0, %v3176_v30, -inf }
 0x6a8   : > { %3181 = vmax.xlane.f32.xlu1 %v3180_v11 }
 0x6ac   : > { %v3285_v48 = vpop.f32.mrf.mxu0 }
 0x6ad   : > { %v3291_v9 = vmul.f32 0.35355338, %v3285_v48 }
 0x6af   : > { %v3293_v6 = vsel %vm798_vm0, %v3291_v9, -inf }
 0x6b0   : > { %3294 = vmax.xlane.f32.xlu2 %v3293_v6  ;;  %2963 = vadd.xlane.f32.xlu1 %v2962_v49 }
 0x6b4   : > { %v3288_v60 = vpop.f32.mrf.mxu0 }
 0x6b5   : > { %v3292_v45 = vmul.f32 0.35355338, %v3288_v60 }
 0x6b7   : > { %v3296_v24 = vsel %vm798_vm0, %v3292_v45, -inf }
 0x6b8   : > { %3297 = vmax.xlane.f32.xlu0 %v3296_v24 }
 0x6c0   : > { %2960 = vadd.xlane.f32.xlu0 %v2959_v35 }
 0x703   : > { %v3065_v10 = vpop.xlane.xlu2 %3064 }
 0x704   : > { %v3069_v53 = vsub.f32 %v3061_v23, %v3065_v10 }
 0x706   : > { %v3071_v20 = vmul.f32 1.442695, %v3069_v53 }
 0x708   : > { %4182 = vpow2.f32 %v3071_v20 }
 0x70b   : > { %v3068_v4 = vpop.xlane.xlu0 %3067 }
 0x70c   : > { %v3070_v25 = vsub.f32 %v3062_v44, %v3068_v4 }
 0x70e   : > { %v6238_v43 = vpop.eup %4182  ;;  %v3073_v56 = vmul.f32 1.442695, %v3070_v25 }
 0x70f   : > { %v3075_v59 = vsel %vm798_vm0, %v6238_v43, 0.0 }
 0x710   : > { %4184 = vpow2.f32 %v3073_v56  ;;  %3076 = vadd.xlane.f32.xlu2 %v3075_v59 }
 0x713   : > { %v3179_v13 = vpop.xlane.xlu2 %3178 }
 0x714   : > { %v3183_v57 = vsub.f32 %v3175_v21, %v3179_v13 }
 0x716   : > { %v6242_v11 = vpop.eup %4184  ;;  %v3185_v33 = vmul.f32 1.442695, %v3183_v57 }
 0x717   : > { %v3078_v23 = vsel %vm798_vm0, %v6242_v11, 0.0 }
 0x718   : > { %4186 = vpow2.f32 %v3185_v33  ;;  %3079 = vadd.xlane.f32.xlu1 %v3078_v23 }
 0x71b   : > { %v3182_v48 = vpop.xlane.xlu1 %3181 }
 0x71c   : > { %v3184_v44 = vsub.f32 %v3176_v30, %v3182_v48 }
 0x71e   : > { %v6246_v14 = vpop.eup %4186  ;;  %v3187_v6 = vmul.f32 1.442695, %v3184_v44 }
 0x71f   : > { %v3189_v49 = vsel %vm798_vm0, %v6246_v14, 0.0 }
 0x720   : > { %4188 = vpow2.f32 %v3187_v6  ;;  %3190 = vadd.xlane.f32.xlu1 %v3189_v49 }
 0x723   : > { %v3295_v34 = vpop.xlane.xlu2 %3294  ;;  %v2964_v21 = vpop.xlane.xlu1 %2963 }
 0x724   : > { %v3299_v60 = vsub.f32 %v3291_v9, %v3295_v34  ;;  %4190 = vrcp.f32 %v2964_v21  ;;  %v2990_v59 = vand.u32 2147483648, %v2964_v21  ;;  %v2988_v9 = vand.u32 2147483647, %v2964_v21 }
 0x725   : > { %vm2984_vm12 = vweird.f32 %v2964_v21 }
 0x726   : > { %v6250_v24 = vpop.eup %4188  ;;  %v3301_v35 = vmul.f32 1.442695, %v3299_v60  ;;  %v2991_v48 = vor.u32 1.1754944e-38, %v2990_v59  ;;  %vm2989_vm14 = vcmp.eq.f32.partialorder %v2988_v9, 8.507059e+37  ;;  %v3384_v60 = vld [vmem:[%s6502_s10] sm:$0xff]  ;;  %v3386_v59 = vld [vmem:[%s6502_s10 + $0x10] sm:$0xff] }
 0x727   : > { %v3192_v10 = vsel %vm798_vm0, %v6250_v24, 0.0 }
 0x728   : > { %4192 = vpow2.f32 %v3301_v35  ;;  %3193 = vadd.xlane.f32.xlu0 %v3192_v10 }
 0x72a   : > { %v4191_v30 = vpop.eup %4190 }
 0x72b   : > { %v2980_v53 = vmul.f32 %v4191_v30, %v2964_v21  ;;  %v3298_v20 = vpop.xlane.xlu0 %3297  ;;  %vm2985_vm11 = vweird.f32 %v4191_v30 }
 0x72c   : > { %v3300_v4 = vsub.f32 %v3292_v45, %v3298_v20  ;;  %vm2986_vm13 = vmor %vm2984_vm12, %vm2985_vm11 }
 0x72d   : > { %v2981_v25 = vsub.f32 1.0, %v2980_v53 }
 0x72e   : > { %v6254_v56 = vpop.eup %4192  ;;  %v3303_v13 = vmul.f32 1.442695, %v3300_v4 }
 0x72f   : > { %v2982_v57 = vmul.f32 %v4191_v30, %v2981_v25  ;;  %v3305_v33 = vsel %vm798_vm0, %v6254_v56, 0.0 }
 0x730   : > { %4194 = vpow2.f32 %v3303_v13  ;;  %3306 = vadd.xlane.f32.xlu0 %v3305_v33 }
 0x731   : > { %v2983_v23 = vadd.f32 %v4191_v30, %v2982_v57 }
 0x733   : > { %v2987_v44 = vsel %vm2986_vm13, %v4191_v30, %v2983_v23  ;;  %v2961_v45 = vpop.xlane.xlu0 %2960  ;;  %v3460_v23 = vld [vmem:[%s6504_s12 + $0x10] sm:$0xff] }
 0x734   : > { %v2992_v6 = vsel %vm2989_vm14, %v2991_v48, %v2987_v44  ;;  %4196 = vrcp.f32 %v2961_v45  ;;  %v2976_v53 = vand.u32 2147483648, %v2961_v45  ;;  %v2974_v4 = vand.u32 2147483647, %v2961_v45  ;;  %v3458_v44 = vld [vmem:[%s6504_s12] sm:$0xff] }
 0x735   : > { %v2994_v49 = vmul.f32 %v6228_v29, %v2992_v6  ;;  %v3387_v29 = vld [vmem:[%s6502_s10 + $0x18] sm:$0xff]  ;;  %vm2970_vm1 = vweird.f32 %v2961_v45  ;;  %v2610_v48 = vadd.f32 %v6153_v5, %v6151_v16  ;;  %v2613_v6 = vadd.f32 %v6157_v7, %v6155_v54  ;;  %v3459_v5 = vld [vmem:[%s6504_s12 + $0x8] sm:$0xff]  ;;  %v3689_v54 = vld [vmem:[%s6506_s14] sm:$0xff] }
 0x736   : > { %v6259_v34 = vpop.eup %4194  ;;  %v2977_v13 = vor.u32 1.1754944e-38, %v2976_v53  ;;  %vm2975_vm3 = vcmp.eq.f32.partialorder %v2974_v4, 8.507059e+37  ;;  %v3461_v16 = vld [vmem:[%s6504_s12 + $0x18] sm:$0xff]  ;;  %v2448_v7 = vld [vmem:[%s6578_s25 + $0x8] sm:$0xff] }
 0x737   : > { %4082 = vmatpush.xpose.msk.msra.mxu1 %vm798_vm0, %v2994_v49  ;;  %v3308_v21 = vsel %vm798_vm0, %v6259_v34, 0.0  ;;  %v2447_v49 = vld [vmem:[%s6578_s25] sm:$0xff] }
 0x738   : > { %3309 = vadd.xlane.f32.xlu2 %v3308_v21 }
 0x739   : > { %3390 = vperm.xlu1 %4175, %v3384_v60  }
 0x73a   : > { %v4197_v35 = vpop.eup %4196 }
 0x73b   : > { %v2966_v10 = vmul.f32 %v4197_v35, %v2961_v45  ;;  %vm2971_vm15 = vweird.f32 %v4197_v35  ;;  %v3690_v45 = vld [vmem:[%s6506_s14 + $0x8] sm:$0xff] }
 0x73c   : > { %vm2972_vm2 = vmor %vm2970_vm1, %vm2971_vm15 }
 0x73d   : > { %v2967_v30 = vsub.f32 1.0, %v2966_v10 }
 0x73f   : > { %v2968_v20 = vmul.f32 %v4197_v35, %v2967_v30 }
 0x741   : > { %v2969_v25 = vadd.f32 %v4197_v35, %v2968_v20  ;;  %3405 = vperm.xlu1 %4175, %v3387_v29  }
 0x743   : > { %v2973_v57 = vsel %vm2972_vm2, %v4197_v35, %v2969_v25 }
 0x744   : > { %3400 = vperm.xlu0 %4174, %v3386_v59   ;;  %v2978_v9 = vsel %vm2975_vm3, %v2977_v13, %v2973_v57 }
 0x745   : > { %v2993_v33 = vmul.f32 %v6234_v36, %v2978_v9  ;;  %v3385_v36 = vld [vmem:[%s6502_s10 + $0x8] sm:$0xff] }
 0x747   : > { %4083 = vmatpush.xpose.msk.msra.mxu1 %vm798_vm0, %v2993_v33 }
 0x749   : > { %3474 = vperm.xlu1 %4175, %v3460_v23  }
 0x74a   : > { %4084 = vmatmul.msk.f32.vlgmr.msra.gmra.mxu1 %vm798_vm0, %v2610_v48 }
 0x74c   : > { %3464 = vperm.xlu0 %4174, %v3458_v44  }
 0x750   : > { %3395 = vperm.xlu2 %4176, %v3385_v36  }
 0x751   : > { %3698 = vperm.xlu1 %4175, %v3690_v45  }
 0x752   : > { %4085 = vmatmul.msk.f32.gmra.mxu1 %vm798_vm0, %v2613_v6 }
 0x754   : > { %3479 = vperm.xlu0 %4174, %v3461_v16  }
 0x758   : > { %3469 = vperm.xlu2 %4176, %v3459_v5  }
 0x75c   : > { %2451 = vperm.xlu0 %4174, %v2447_v49  }
 0x760   : > { %3693 = vperm.xlu2 %4176, %v3689_v54  }
 0x768   : > { %2456 = vperm.xlu2 %4176, %v2448_v7  }
 0x783   : > { %v3077_v60 = vpop.xlane.xlu2 %3076 }
 0x784   : > { %4198 = vrcp.f32 %v3077_v60  ;;  %vm3086_vm6 = vweird.f32 %v3077_v60  ;;  %v3092_v33 = vand.u32 2147483648, %v3077_v60  ;;  %v3090_v48 = vand.u32 2147483647, %v3077_v60 }
 0x786   : > { %v3093_v54 = vor.u32 1.1754944e-38, %v3092_v33  ;;  %vm3091_vm11 = vcmp.eq.f32.partialorder %v3090_v48, 8.507059e+37 }
 0x78a   : > { %v4199_v21 = vpop.eup %4198 }
 0x78b   : > { %v3082_v35 = vmul.f32 %v4199_v21, %v3077_v60  ;;  %v3080_v10 = vpop.xlane.xlu1 %3079  ;;  %vm3087_vm4 = vweird.f32 %v4199_v21 }
 0x78c   : > { %4200 = vrcp.f32 %v3080_v10  ;;  %v3106_v59 = vand.u32 2147483648, %v3080_v10  ;;  %v3104_v9 = vand.u32 2147483647, %v3080_v10  ;;  %vm6311_vm7 = vmor %vm3086_vm6, %vm3087_vm4  ;;  %vm3100_vm8 = vweird.f32 %v3080_v10 }
 0x78d   : > { %v3083_v30 = vsub.f32 1.0, %v3082_v35 }
 0x78e   : > { %v3107_v45 = vor.u32 1.1754944e-38, %v3106_v59  ;;  %vm3105_vm10 = vcmp.eq.f32.partialorder %v3104_v9, 8.507059e+37 }
 0x78f   : > { %v3084_v29 = vmul.f32 %v4199_v21, %v3083_v30 }
 0x791   : > { %v3085_v13 = vadd.f32 %v4199_v21, %v3084_v29 }
 0x792   : > { %v4201_v53 = vpop.eup %4200 }
 0x793   : > { %v3096_v20 = vmul.f32 %v4201_v53, %v3080_v10  ;;  %v6308_v4 = vpop.xlane.xlu1 %3190  ;;  %vm3101_vm5 = vweird.f32 %v4201_v53  ;;  %v3089_v49 = vsel %vm6311_vm7, %v4199_v21, %v3085_v13  ;;  %v2616_v21 = vadd.f32 %v6161_v28, %v6159_v19 }
 0x794   : > { %4202 = vrcp.f32 %v6308_v4  ;;  %vm3102_vm9 = vmor %vm3100_vm8, %vm3101_vm5  ;;  %v3094_v60 = vsel %vm3091_vm11, %v3093_v54, %v3089_v49  ;;  %vm3200_vm14 = vweird.f32 %v6308_v4  ;;  %v3206_v9 = vand.u32 2147483648, %v6308_v4 }
 0x795   : > { %v3097_v25 = vsub.f32 1.0, %v3096_v20  ;;  %v3109_v10 = vmul.f32 %v6238_v43, %v3094_v60  ;;  %v3204_v19 = vand.u32 2147483647, %v6308_v4  ;;  %v2619_v49 = vadd.f32 %v6165_v50, %v6163_v8 }
 0x796   : > { %v3207_v54 = vor.u32 1.1754944e-38, %v3206_v9  ;;  %v2720_v8 = vadd.f32 %v6171_v18, %v6169_v46 }
 0x797   : > { %v3098_v57 = vmul.f32 %v4201_v53, %v3097_v25  ;;  %vm3205_vm4 = vcmp.eq.f32.partialorder %v3204_v19, 8.507059e+37 }
 0x799   : > { %v3099_v44 = vadd.f32 %v4201_v53, %v3098_v57 }
 0x79a   : > { %v4203_v36 = vpop.eup %4202 }
 0x79b   : > { %v3103_v6 = vsel %vm3102_vm9, %v4201_v53, %v3099_v44  ;;  %v3196_v16 = vmul.f32 %v4203_v36, %v6308_v4  ;;  %v3194_v5 = vpop.xlane.xlu0 %3193  ;;  %vm3201_vm12 = vweird.f32 %v4203_v36 }
 0x79c   : > { %v3108_v7 = vsel %vm3105_vm10, %v3107_v45, %v3103_v6  ;;  %4204 = vrcp.f32 %v3194_v5  ;;  %v3218_v43 = vand.u32 2147483647, %v3194_v5  ;;  %vm6330_vm15 = vmor %vm3200_vm14, %vm3201_vm12  ;;  %vm3214_vm1 = vweird.f32 %v3194_v5 }
 0x79d   : > { %v3110_v35 = vmul.f32 %v6242_v11, %v3108_v7  ;;  %v3197_v30 = vsub.f32 1.0, %v3196_v16  ;;  %v3220_v11 = vand.u32 2147483648, %v3194_v5 }
 0x79e   : > { %vm3219_vm3 = vcmp.eq.f32.partialorder %v3218_v43, 8.507059e+37 }
 0x79f   : > { %4088 = vmatpush.xpose.msk.msrb.mxu1 %vm798_vm0, %v3110_v35  ;;  %v3198_v29 = vmul.f32 %v4203_v36, %v3197_v30  ;;  %v3221_v48 = vor.u32 1.1754944e-38, %v3220_v11 }
 0x7a1   : > { %v3199_v13 = vadd.f32 %v4203_v36, %v3198_v29 }
 0x7a2   : > { %v4205_v53 = vpop.eup %4204 }
 0x7a3   : > { %v3210_v20 = vmul.f32 %v4205_v53, %v3194_v5  ;;  %v6321_v25 = vpop.xlane.xlu0 %3306  ;;  %4089 = vmatpush.xpose.msk.msrb.mxu1 %vm798_vm0, %v3109_v10  ;;  %vm3215_vm13 = vweird.f32 %v4205_v53  ;;  %v3203_v16 = vsel %vm6330_vm15, %v4203_v36, %v3199_v13 }
 0x7a4   : > { %4206 = vrcp.f32 %v6321_v25  ;;  %vm3216_vm2 = vmor %vm3214_vm1, %vm3215_vm13  ;;  %v3208_v5 = vsel %vm3205_vm4, %v3207_v54, %v3203_v16  ;;  %vm3316_vm7 = vweird.f32 %v6321_v25  ;;  %vm3408_vm13 = vcmask 261120   ;;  %v3378_v16 = vld [vmem:[%s6501_s9 + $0x10] sm:$0xff] }
 0x7a5   : > { %v3211_v59 = vsub.f32 1.0, %v3210_v20  ;;  %v3223_v60 = vmul.f32 %v6246_v14, %v3208_v5  ;;  %v3322_v14 = vand.u32 2147483648, %v6321_v25  ;;  %v3451_v5 = vld [vmem:[%s6503_s11 + $0x8] sm:$0xff] }
 0x7a6   : > { %4090 = vmatmul.msk.f32.vlgmr.msrb.gmra.mxu1 %vm798_vm0, %v2616_v21 }
 0x7a7   : > { %v3212_v57 = vmul.f32 %v4205_v53, %v3211_v59  ;;  %v3320_v59 = vand.u32 2147483647, %v6321_v25  ;;  %v3323_v43 = vor.u32 1.1754944e-38, %v3322_v14 }
 0x7a9   : > { %v3213_v28 = vadd.f32 %v4205_v53, %v3212_v57  ;;  %v2723_v57 = vadd.f32 %v6175_v52, %v6173_v27  ;;  %vm3321_vm12 = vcmp.eq.f32.partialorder %v3320_v59, 8.507059e+37  ;;  %v2729_v27 = vadd.f32 %v6183_v17, %v6181_v51  ;;  %v3377_v51 = vld [vmem:[%s6501_s9 + $0x8] sm:$0xff] }
 0x7aa   : > { %v4207_v23 = vpop.eup %4206 }
 0x7ab   : > { %v3217_v44 = vsel %vm3216_vm2, %v4205_v53, %v3213_v28  ;;  %v3312_v45 = vmul.f32 %v4207_v23, %v6321_v25  ;;  %v3310_v6 = vpop.xlane.xlu2 %3309  ;;  %vm3317_vm5 = vweird.f32 %v4207_v23  ;;  %v2726_v28 = vadd.f32 %v6179_v32, %v6177_v1  ;;  %v3376_v1 = vld [vmem:[%s6501_s9] sm:$0xff] }
 0x7ac   : > { %v3222_v7 = vsel %vm3219_vm3, %v3221_v48, %v3217_v44  ;;  %4208 = vrcp.f32 %v3310_v6  ;;  %v3336_v53 = vand.u32 2147483648, %v3310_v6  ;;  %v3334_v20 = vand.u32 2147483647, %v3310_v6  ;;  %vm6350_vm8 = vmor %vm3316_vm7, %vm3317_vm5 }
 0x7ad   : > { %v3224_v4 = vmul.f32 %v6250_v24, %v3222_v7  ;;  %v3313_v35 = vsub.f32 1.0, %v3312_v45  ;;  %vm3330_vm9 = vweird.f32 %v3310_v6 }
 0x7ae   : > { %4091 = vmatmul.msk.f32.gmra.mxu1 %vm798_vm0, %v2619_v49  ;;  %v3337_v18 = vor.u32 1.1754944e-38, %v3336_v53  ;;  %vm3335_vm11 = vcmp.eq.f32.partialorder %v3334_v20, 8.507059e+37 }
 0x7af   : > { %4094 = vmatpush.xpose.msk.msra.mxu1 %vm798_vm0, %v3224_v4  ;;  %v3314_v10 = vmul.f32 %v4207_v23, %v3313_v35  ;;  %v3450_v4 = vld [vmem:[%s6503_s11] sm:$0xff]  ;;  %v3452_v35 = vld [vmem:[%s6503_s11 + $0x10] sm:$0xff] }
 0x7b1   : > { %v3315_v24 = vadd.f32 %v4207_v23, %v3314_v10 }
 0x7b2   : > { %v4209_v30 = vpop.eup %4208 }
 0x7b3   : > { %v3326_v36 = vmul.f32 %v4209_v30, %v3310_v6  ;;  %4095 = vmatpush.xpose.msk.msra.mxu1 %vm798_vm0, %v3223_v60  ;;  %vm3331_vm6 = vweird.f32 %v4209_v30  ;;  %v3319_v13 = vsel %vm6350_vm8, %v4207_v23, %v3315_v24 }
 0x7b4   : > { %vm3332_vm10 = vmor %vm3330_vm9, %vm3331_vm6  ;;  %v3324_v25 = vsel %vm3321_vm12, %v3323_v43, %v3319_v13 }
 0x7b5   : > { %v3327_v50 = vsub.f32 1.0, %v3326_v36  ;;  %v3339_v19 = vmul.f32 %v6254_v56, %v3324_v25 }
 0x7b6   : > { %4096 = vmatmul.msk.f32.vlgmr.msra.gmra.mxu1 %vm798_vm0, %v2720_v8  ;;  %v3401_v36 = vpop.permute.xlu0 %3400 }
 0x7b7   : > { %v3328_v29 = vmul.f32 %v4209_v30, %v3327_v50 }
 0x7b9   : > { %v3329_v46 = vadd.f32 %v4209_v30, %v3328_v29 }
 0x7bb   : > { %v3333_v11 = vsel %vm3332_vm10, %v4209_v30, %v3329_v46 }
 0x7bc   : > { %v3338_v9 = vsel %vm3335_vm11, %v3337_v18, %v3333_v11 }
 0x7bd   : > { %v3340_v33 = vmul.f32 %v6259_v34, %v3338_v9 }
 0x7be   : > { %4097 = vmatmul.msk.f32.gmra.mxu1 %vm798_vm0, %v2723_v57  ;;  %v3465_v20 = vpop.permute.xlu0 %3464 }
 0x7bf   : > { %4100 = vmatpush.xpose.msk.msrb.mxu1 %vm798_vm0, %v3340_v33 }
 0x7c3   : > { %4101 = vmatpush.xpose.msk.msrb.mxu1 %vm798_vm0, %v3339_v19 }
 0x7c6   : > { %4102 = vmatmul.msk.f32.vlgmr.msrb.gmra.mxu1 %vm798_vm0, %v2726_v28  ;;  %v3480_v43 = vpop.permute.xlu0 %3479 }
 0x7c7   : > { %v3024_v52 = vpop.f32.mrf.mxu1 }
 0x7c8   : > { %v3380_v6 = vmax.f32 %v3024_v52, 0.0 }
 0x7ce   : > { %4103 = vmatmul.msk.f32.gmra.mxu1 %vm798_vm0, %v2729_v27 }
 0x7cf   : > { %v3027_v34 = vpop.f32.mrf.mxu1 }
 0x7d0   : > { %v3381_v56 = vmax.f32 %v3027_v34, 0.0 }
 0x823   : > { %v3140_v23 = vpop.f32.mrf.mxu1 }
 0x824   : > { %v3382_v45 = vmax.f32 %v3140_v23, 0.0 }
 0x82b   : > { %v3143_v48 = vpop.f32.mrf.mxu1 }
 0x82c   : > { %v3383_v44 = vmax.f32 %v3143_v48, 0.0 }
 0x82e   : > { %3433 = vmatpush.msra.mxu0 %v3383_v44 }
 0x830   : > { %3434 = vmatpush.msra.mxu0 %v3382_v45 }
 0x832   : > { %3435 = vmatpush.msra.mxu0 %v3381_v56 }
 0x833   : > { %v3254_v32 = vpop.f32.mrf.mxu1 }
 0x834   : > { %3436 = vmatpush.msra.mxu0 %v3380_v6  ;;  %v3454_v7 = vmax.f32 %v3254_v32, 0.0 }
 0x835   : > { %4104 = vmatmul.msk.f32.vlgmr.msra.gmra.mxu0 %vm3408_vm13, %v3376_v1 }
 0x836   : > { %3549 = vmatpush.msrb.mxu0 %v6115_v40 }
 0x838   : > { %3550 = vmatpush.msrb.mxu0 %v6097_v62  ;;  %v3379_v62 = vld [vmem:[%s6501_s9 + $0x18] sm:$0xff] }
 0x83a   : > { %3619 = vmatpush.msra.mxu0 %v6142_v41 }
 0x83b   : > { %v3257_v17 = vpop.f32.mrf.mxu1 }
 0x83c   : > { %3620 = vmatpush.msra.mxu0 %v6130_v37  ;;  %v3455_v37 = vmax.f32 %v3257_v17, 0.0 }
 0x83d   : > { %4105 = vmatmul.msk.f32.gmra.mxu0 %vm3408_vm13, %v3377_v51 }
 0x843   : > { %v3370_v49 = vpop.f32.mrf.mxu1 }
 0x844   : > { %v3456_v54 = vmax.f32 %v3370_v49, 0.0 }
 0x845   : > { %4106 = vmatmul.msk.f32.gmra.mxu0 %vm3408_vm13, %v3378_v16 }
 0x84b   : > { %v3373_v40 = vpop.f32.mrf.mxu1 }
 0x84c   : > { %v3457_v41 = vmax.f32 %v3373_v40, 0.0 }
 0x84d   : > { %4107 = vmatmul.msk.f32.gmra.mxu0 %vm3408_vm13, %v3379_v62 }
 0x84e   : > { %3506 = vmatpush.msra.mxu1 %v3457_v41 }
 0x850   : > { %3507 = vmatpush.msra.mxu1 %v3456_v54 }
 0x852   : > { %3508 = vmatpush.msra.mxu1 %v3455_v37 }
 0x854   : > { %3509 = vmatpush.msra.mxu1 %v3454_v7 }
 0x855   : > { %4108 = vmatmul.msk.f32.vlgmr.msra.gmra.mxu1 %vm3408_vm13, %v3450_v4 }
 0x856   : > { %3578 = vmatpush.msrb.mxu1 %v6120_v47  ;;  %v3391_v47 = vpop.permute.xlu1 %3390 }
 0x858   : > { %3579 = vmatpush.msrb.mxu1 %v6102_v0  ;;  %v3453_v0 = vld [vmem:[%s6503_s11 + $0x18] sm:$0xff] }
 0x85a   : > { %3648 = vmatpush.msra.mxu1 %v6147_v12 }
 0x85c   : > { %3649 = vmatpush.msra.mxu1 %v6135_v3  ;;  %v3396_v3 = vpop.permute.xlu2 %3395 }
 0x85d   : > { %4109 = vmatmul.msk.f32.gmra.mxu1 %vm3408_vm13, %v3451_v5 }
 0x85e   : > { %v3406_v53 = vpop.permute.xlu1 %3405 }
 0x864   : > { %v3470_v59 = vpop.permute.xlu2 %3469 }
 0x865   : > { %4110 = vmatmul.msk.f32.gmra.mxu1 %vm3408_vm13, %v3452_v35 }
 0x866   : > { %v3475_v11 = vpop.permute.xlu1 %3474 }
 0x86d   : > { %4111 = vmatmul.msk.f32.gmra.mxu1 %vm3408_vm13, %v3453_v0 }
 0x8b2   : > { %v3438_v12 = vpop.f32.mrf.mxu0 }
 0x8b3   : > { %v3439_v60 = vadd.f32 %v3438_v12, %v3391_v47 }
 0x8b5   : > { %4112 = vmatmul.msk.f32.vlgmr.msrb.gmra.mxu0 %vm798_vm0, %v3439_v60  ;;  %4116 = vmatmul.msk.f32.vlgmr.msrb.gmra.mxu1 %vm798_vm0, %v3439_v60 }
 0x8ba   : > { %v3441_v30 = vpop.f32.mrf.mxu0 }
 0x8bb   : > { %v3442_v10 = vadd.f32 %v3441_v30, %v3396_v3 }
 0x8bd   : > { %4113 = vmatmul.msk.f32.gmra.mxu0 %vm798_vm0, %v3442_v10  ;;  %4117 = vmatmul.msk.f32.gmra.mxu1 %vm798_vm0, %v3442_v10 }
 0x8c2   : > { %v3444_v8 = vpop.f32.mrf.mxu0 }
 0x8c3   : > { %v3445_v50 = vadd.f32 %v3444_v8, %v3401_v36  ;;  %v3694_v36 = vpop.permute.xlu2 %3693 }
 0x8c5   : > { %4114 = vmatmul.msk.f32.gmra.mxu0 %vm798_vm0, %v3445_v50  ;;  %4118 = vmatmul.msk.f32.gmra.mxu1 %vm798_vm0, %v3445_v50 }
 0x8ca   : > { %v3447_v24 = vpop.f32.mrf.mxu0 }
 0x8cb   : > { %v3448_v29 = vadd.f32 %v3447_v24, %v3406_v53 }
 0x8cd   : > { %4115 = vmatmul.msk.f32.gmra.mxu0 %vm798_vm0, %v3448_v29  ;;  %4119 = vmatmul.msk.f32.gmra.mxu1 %vm798_vm0, %v3448_v29 }
 0x8d2   : > { %v3511_v14 = vpop.f32.mrf.mxu1 }
 0x8d3   : > { %v3512_v21 = vadd.f32 %v3511_v14, %v3465_v20  ;;  %v3699_v14 = vpop.permute.xlu1 %3698 }
 0x8d5   : > { %4120 = vmatmul.msk.f32.vlgmr.msra.gmra.mxu0 %vm798_vm0, %v3512_v21  ;;  %4124 = vmatmul.msk.f32.vlgmr.msra.gmra.mxu1 %vm798_vm0, %v3512_v21 }
 0x8da   : > { %v3514_v46 = vpop.f32.mrf.mxu1 }
 0x8db   : > { %v3515_v18 = vadd.f32 %v3514_v46, %v3470_v59 }
 0x8dd   : > { %4121 = vmatmul.msk.f32.gmra.mxu0 %vm798_vm0, %v3515_v18  ;;  %4125 = vmatmul.msk.f32.gmra.mxu1 %vm798_vm0, %v3515_v18 }
 0x8e2   : > { %v3517_v13 = vpop.f32.mrf.mxu1 }
 0x8e3   : > { %v3518_v57 = vadd.f32 %v3517_v13, %v3475_v11 }
 0x8e5   : > { %4122 = vmatmul.msk.f32.gmra.mxu0 %vm798_vm0, %v3518_v57  ;;  %4126 = vmatmul.msk.f32.gmra.mxu1 %vm798_vm0, %v3518_v57 }
 0x8ea   : > { %v3520_v9 = vpop.f32.mrf.mxu1 }
 0x8eb   : > { %v3521_v33 = vadd.f32 %v3520_v9, %v3480_v43 }
 0x8ed   : > { %4123 = vmatmul.msk.f32.gmra.mxu0 %vm798_vm0, %v3521_v33  ;;  %4127 = vmatmul.msk.f32.gmra.mxu1 %vm798_vm0, %v3521_v33 }
 0x932   : > { %v3552_v25 = vpop.f32.mrf.mxu0  ;;  %v3581_v19 = vpop.f32.mrf.mxu1 }
 0x933   : > { %v3663_v35 = vadd.f32 %v3552_v25, %v6568_v31  ;;  %v3687_v31 = vld [vmem:[%s6505_s13] sm:$0xff] }
 0x93a   : > { %v3555_v28 = vpop.f32.mrf.mxu0  ;;  %v3584_v27 = vpop.f32.mrf.mxu1 }
 0x93b   : > { %v3665_v62 = vadd.f32 %v3555_v28, %v6570_v2  ;;  %v3666_v40 = vadd.f32 %v3584_v27, %v6571_v39 }
 0x942   : > { %v3558_v52 = vpop.f32.mrf.mxu0  ;;  %v3587_v34 = vpop.f32.mrf.mxu1 }
 0x943   : > { %v3667_v51 = vadd.f32 %v3558_v52, %v6572_v26  ;;  %v3668_v17 = vadd.f32 %v3587_v34, %v6573_v15  ;;  %v3664_v26 = vadd.f32 %v3581_v19, %v6569_v22  ;;  %v3688_v22 = vld [vmem:[%s6505_s13 + $0x8] sm:$0xff] }
 0x94a   : > { %v3561_v23 = vpop.f32.mrf.mxu0  ;;  %v3590_v48 = vpop.f32.mrf.mxu1 }
 0x94b   : > { %v3669_v16 = vadd.f32 %v3561_v23, %v6574_v42  ;;  %v3670_v49 = vadd.f32 %v3590_v48, %v6575_v38 }
 0x952   : > { %v3622_v44 = vpop.f32.mrf.mxu0  ;;  %v3651_v45 = vpop.f32.mrf.mxu1 }
 0x953   : > { %v3671_v12 = vadd.f32 %v3663_v35, %v3622_v44  ;;  %v3672_v38 = vadd.f32 %v3664_v26, %v3651_v45 }
 0x955   : > { %v3679_v30 = vmax.f32 %v3671_v12, 0.0  ;;  %v3680_v10 = vmax.f32 %v3672_v38, 0.0 }
 0x95a   : > { %v3625_v56 = vpop.f32.mrf.mxu0  ;;  %v3654_v6 = vpop.f32.mrf.mxu1 }
 0x95b   : > { %v3673_v0 = vadd.f32 %v3665_v62, %v3625_v56  ;;  %v3674_v15 = vadd.f32 %v3666_v40, %v3654_v6 }
 0x95d   : > { %v3681_v39 = vmax.f32 %v3673_v0, 0.0  ;;  %v3682_v3 = vmax.f32 %v3674_v15, 0.0 }
 0x962   : > { %v3628_v1 = vpop.f32.mrf.mxu0  ;;  %v3657_v32 = vpop.f32.mrf.mxu1 }
 0x963   : > { %v3675_v37 = vadd.f32 %v3667_v51, %v3628_v1  ;;  %v3676_v7 = vadd.f32 %v3668_v17, %v3657_v32  ;;  %v2452_v1 = vpop.permute.xlu0 %2451 }
 0x964   : > { %v2483_v40 = vadd.f32 %v6082_v63, %v2452_v1 }
 0x965   : > { %v3683_v60 = vmax.f32 %v3675_v37, 0.0  ;;  %v3684_v2 = vmax.f32 %v3676_v7, 0.0 }
 0x96a   : > { %v3631_v41 = vpop.f32.mrf.mxu0  ;;  %v3660_v54 = vpop.f32.mrf.mxu1 }
 0x96b   : > { %v3677_v4 = vadd.f32 %v3669_v16, %v3631_v41  ;;  %v3678_v5 = vadd.f32 %v3670_v49, %v3660_v54 }
 0x96d   : > { %v3685_v47 = vmax.f32 %v3677_v4, 0.0  ;;  %v3686_v42 = vmax.f32 %v3678_v5, 0.0  ;;  %v2506_v5 = vadd.f32 %v6084_v61, %v2452_v1 }
 0x96f   : > { %3719 = vmatpush.msrb.mxu0 %v3685_v47  ;;  %3742 = vmatpush.msrb.mxu1 %v3686_v42 }
 0x971   : > { %3720 = vmatpush.msrb.mxu0 %v3683_v60  ;;  %3743 = vmatpush.msrb.mxu1 %v3684_v2 }
 0x973   : > { %3721 = vmatpush.msrb.mxu0 %v3681_v39  ;;  %3744 = vmatpush.msrb.mxu1 %v3682_v3  ;;  %v2457_v39 = vpop.permute.xlu2 %2456 }
 0x975   : > { %3722 = vmatpush.msrb.mxu0 %v3679_v30  ;;  %3745 = vmatpush.msrb.mxu1 %v3680_v10 }
 0x976   : > { %4128 = vmatmul.msk.f32.vlgmr.msrb.gmra.mxu0 %vm3408_vm13, %v3687_v31  ;;  %4130 = vmatmul.msk.f32.vlgmr.msrb.gmra.mxu1 %vm3408_vm13, %v3687_v31 }
 0x97e   : > { %4129 = vmatmul.msk.f32.gmra.mxu0 %vm3408_vm13, %v3688_v22  ;;  %4131 = vmatmul.msk.f32.gmra.mxu1 %vm3408_vm13, %v3688_v22 }
 0x9f3   : > { %v3724_v8 = vpop.f32.mrf.mxu0  ;;  %v3747_v50 = vpop.f32.mrf.mxu1 }
 0x9f4   : > { %v6444_v53 = vadd.f32 %v3724_v8, %v3694_v36  ;;  %v6446_v24 = vadd.f32 %v3747_v50, %v3694_v36  ;;  %v2486_v50 = vadd.f32 %v6088_v58, %v2457_v39 }
 0x9f6   : > { %v4132_v29 = vmul.f32 -1.442695, %v6444_v53  ;;  %v4133_v20 = vmul.f32 -1.442695, %v6446_v24 }
 0x9f8   : > { %4210 = vpow2.f32 %v4132_v29 }
 0x9f9   : > { %4212 = vpow2.f32 %v4133_v20 }
 0x9fb   : > { %v3727_v21 = vpop.f32.mrf.mxu0  ;;  %v3750_v59 = vpop.f32.mrf.mxu1 }
 0x9fc   : > { %v6450_v46 = vadd.f32 %v3727_v21, %v3699_v14  ;;  %v6452_v18 = vadd.f32 %v3750_v59, %v3699_v14  ;;  %v2509_v21 = vadd.f32 %v6090_v55, %v2457_v39 }
 0x9fe   : > { %v4211_v11 = vpop.eup %4210  ;;  %v4134_v13 = vmul.f32 -1.442695, %v6450_v46  ;;  %v4135_v9 = vmul.f32 -1.442695, %v6452_v18 }
 0x9ff   : > { %v4213_v57 = vpop.eup %4212  ;;  %v3765_v43 = vadd.f32 1.0, %v4211_v11 }
 0xa00   : > { %v3766_v33 = vadd.f32 1.0, %v4213_v57  ;;  %4214 = vpow2.f32 %v4134_v13 }
 0xa01   : > { %4216 = vrcp.f32 %v3765_v43  ;;  %v3778_v45 = vand.u32 2147483647, %v3765_v43  ;;  %v3780_v56 = vand.u32 2147483648, %v3765_v43  ;;  %vm3774_vm15 = vweird.f32 %v3765_v43 }
 0xa02   : > { %4218 = vrcp.f32 %v3766_v33  ;;  %v3795_v51 = vand.u32 2147483648, %v3766_v33  ;;  %v3793_v16 = vand.u32 2147483647, %v3766_v33  ;;  %vm3789_vm2 = vweird.f32 %v3766_v33 }
 0xa03   : > { %4220 = vpow2.f32 %v4135_v9  ;;  %v3781_v41 = vor.u32 1.1754944e-38, %v3780_v56  ;;  %vm3779_vm3 = vcmp.eq.f32.partialorder %v3778_v45, 8.507059e+37 }
 0xa04   : > { %v3796_v7 = vor.u32 1.1754944e-38, %v3795_v51  ;;  %vm3794_vm5 = vcmp.eq.f32.partialorder %v3793_v16, 8.507059e+37 }
 0xa06   : > { %v4215_v25 = vpop.eup %4214 }
 0xa07   : > { %v4217_v19 = vpop.eup %4216  ;;  %v6456_v28 = vadd.f32 1.0, %v4215_v25 }
 0xa08   : > { %v4219_v27 = vpop.eup %4218  ;;  %v3770_v52 = vmul.f32 %v4217_v19, %v3765_v43  ;;  %vm3775_vm0 = vweird.f32 %v4217_v19 }
 0xa09   : > { %v4221_v34 = vpop.eup %4220  ;;  %v3785_v23 = vmul.f32 %v4219_v27, %v3766_v33  ;;  %4222 = vrcp.f32 %v6456_v28  ;;  %vm3790_vm14 = vweird.f32 %v4219_v27  ;;  %vm3776_vm1 = vmor %vm3774_vm15, %vm3775_vm0  ;;  %v3810_v12 = vand.u32 2147483648, %v6456_v28 }
 0xa0a   : > { %v3771_v48 = vsub.f32 1.0, %v3770_v52  ;;  %v6459_v44 = vadd.f32 1.0, %v4221_v34  ;;  %vm3791_vm4 = vmor %vm3789_vm2, %vm3790_vm14  ;;  %v3808_v2 = vand.u32 2147483647, %v6456_v28  ;;  %vm3804_vm7 = vweird.f32 %v6456_v28 }
 0xa0b   : > { %v3786_v6 = vsub.f32 1.0, %v3785_v23  ;;  %v3811_v22 = vor.u32 1.1754944e-38, %v3810_v12 }
 0xa0c   : > { %v3772_v32 = vmul.f32 %v4217_v19, %v3771_v48  ;;  %4224 = vrcp.f32 %v6459_v44  ;;  %v3825_v31 = vand.u32 2147483648, %v6459_v44  ;;  %v3823_v8 = vand.u32 2147483647, %v6459_v44 }
 0xa0d   : > { %v3787_v17 = vmul.f32 %v4219_v27, %v3786_v6  ;;  %vm3809_vm10 = vcmp.eq.f32.partialorder %v3808_v2, 8.507059e+37  ;;  %vm3819_vm11 = vweird.f32 %v6459_v44 }
 0xa0e   : > { %v3773_v49 = vadd.f32 %v4217_v19, %v3772_v32  ;;  %v3826_v14 = vor.u32 1.1754944e-38, %v3825_v31  ;;  %vm3824_vm13 = vcmp.eq.f32.partialorder %v3823_v8, 8.507059e+37 }
 0xa0f   : > { %v4223_v62 = vpop.eup %4222  ;;  %v3788_v54 = vadd.f32 %v4219_v27, %v3787_v17 }
 0xa10   : > { %v3777_v37 = vsel %vm3776_vm1, %v4217_v19, %v3773_v49  ;;  %v3800_v4 = vmul.f32 %v4223_v62, %v6456_v28  ;;  %vm3805_vm6 = vweird.f32 %v4223_v62 }
 0xa11   : > { %v3782_v35 = vsel %vm3779_vm3, %v3781_v41, %v3777_v37  ;;  %v3792_v26 = vsel %vm3791_vm4, %v4219_v27, %v3788_v54  ;;  %vm3806_vm8 = vmor %vm3804_vm7, %vm3805_vm6 }
 0xa12   : > { %v4225_v0 = vpop.eup %4224  ;;  %v3829_v15 = vmul.f32 %v3782_v35, %v2483_v40  ;;  %v3797_v47 = vsel %vm3794_vm5, %v3796_v7, %v3792_v26  ;;  %v3801_v63 = vsub.f32 1.0, %v3800_v4 }
 0xa13   : > { %v3830_v42 = vmul.f32 %v3797_v47, %v2506_v5  ;;  %v3815_v61 = vmul.f32 %v4225_v0, %v6459_v44  ;;  %vm3820_vm9 = vweird.f32 %v4225_v0 }
 0xa14   : > { %v3833_v38 = vadd.f32 %v3829_v15, %v6444_v53  ;;  %v3802_v60 = vmul.f32 %v4223_v62, %v3801_v63  ;;  %vm3821_vm12 = vmor %vm3819_vm11, %vm3820_vm9 }
 0xa15   : > { %v3834_v3 = vadd.f32 %v3830_v42, %v6446_v24  ;;  %v3816_v30 = vsub.f32 1.0, %v3815_v61 }
 0xa16   : > { %3837 = vst [vmem:[%s6470_s7] sm:$0xff] %v3833_v38  ;;  %v3803_v10 = vadd.f32 %v4223_v62, %v3802_v60 }
 0xa17   : > { %3838 = vst [vmem:[%s6470_s7 + $0x8] sm:$0xff] %v3834_v3  ;;  %v3817_v36 = vmul.f32 %v4225_v0, %v3816_v30 }
 0xa18   : > { %v3807_v53 = vsel %vm3806_vm8, %v4223_v62, %v3803_v10 }
 0xa19   : > { %v3812_v24 = vsel %vm3809_vm10, %v3811_v22, %v3807_v53  ;;  %v3818_v29 = vadd.f32 %v4225_v0, %v3817_v36 }
 0xa1a   : > { %v3831_v20 = vmul.f32 %v3812_v24, %v2486_v50 }
 0xa1b   : > { %v3822_v59 = vsel %vm3821_vm12, %v4225_v0, %v3818_v29 }
 0xa1c   : > { %v3835_v11 = vadd.f32 %v3831_v20, %v6450_v46  ;;  %v3827_v13 = vsel %vm3824_vm13, %v3826_v14, %v3822_v59 }
 0xa1d   : > { %v3832_v57 = vmul.f32 %v3827_v13, %v2509_v21 }
 0xa1e   : > { %3839 = vst [vmem:[%s6470_s7 + $0x10] sm:$0xff] %v3835_v11 }
 0xa1f   : > { %v3836_v58 = vadd.f32 %v3832_v57, %v6452_v18 }
 0xa21   : > { %3840 = vst [vmem:[%s6470_s7 + $0x18] sm:$0xff] %v3836_v58 }
 0xa22 PF: > { %s34_s5 = sadd.s32 1, %s4236_s5  }
 0xa23   : > { %p31_p4 = scmp.ge.s32.totalorder %s34_s5, 4  }
 0xa25   :  { %33 = sbr.rel (!%p31_p4) target bundleno = 11 (0xb), region = 153 }

</bundles_post_ra>
